<compile_context>
chip_gen: v7x
topology: tpu7x:2x2x1
jax: 0.10.0
libtpu: 0.0.40
codegen_flags: <defaults>
</compile_context>

<pallas_src>
import functools

import jax
import jax.numpy as jnp
from jax.experimental import pallas as pl
from jax.experimental.pallas import tpu as pltpu


def _round_up(v, m):
    return ((v + m - 1) // m) * m


def _kernel(x_ref, w_ref, b_ref, o_ref, *, tn, j_axis, cast_dtype):
    # x_ref: (tm, D) original dtype; w_ref: (D, tn) compute dtype (W.T layout);
    # b_ref: (1, tn); o_ref: (tm, tn).
    x = x_ref[...]
    xc = x.astype(cast_dtype) if cast_dtype is not None else x
    # RHS contraction dim (D) is second-minor -> native MXU layout, no vxpose.
    h = jnp.dot(xc, w_ref[...], preferred_element_type=jnp.float32)
    h = jnp.maximum(h + b_ref[...].astype(jnp.float32), 0.0)      # bias + ReLU in f32
    # Residual: matching column slice of the resident x tile (lane-aligned view).
    off = pl.program_id(j_axis) * tn
    if tn % 128 == 0:
        off = pl.multiple_of(off, 128)
    x_res = x_ref[:, pl.ds(off, tn)]
    o_ref[...] = (x_res.astype(jnp.float32) + h).astype(o_ref.dtype)


def _pipeline_vmem_bytes(tm, tn, D, x_item, w_item, o_item, w_bufs):
    return (2 * tm * D * x_item          # x tiles (double-buffered)
            + w_bufs * D * tn * w_item   # weight block(s)
            + 2 * tm * tn * o_item       # output tiles (double-buffered)
            + 2 * tn * w_item)           # bias (tiny)


def _select_tiles(M, D, tm_req, tn_req, x_item, w_item, o_item, budget, resident_bufs):
    tm = min(_round_up(max(int(tm_req), 16), 16), _round_up(M, 16))
    if D % 256 == 0:
        gran = 256          # fill the 256x256 MXU on v6e/v7x
    elif D % 128 == 0:
        gran = 128          # v5e granularity / odd-256 D
    else:
        gran = D            # lane dim cannot be blocked cleanly

    def fits(tm_, tn_, bufs):
        return _pipeline_vmem_bytes(tm_, tn_, D, x_item, w_item, o_item, bufs) <= budget

    while True:
        if tn_req is not None:
            tn = int(tn_req)
            break
        if fits(tm, D, resident_bufs):
            tn = D                                   # resident-weight fast path
            break
        cands = [t for t in range(gran, D, gran) if D % t == 0 and fits(tm, t, 2)]
        if cands:
            tn = max(cands)
            break
        if tm <= 128:
            # TODO(synk): a huge non-128-aligned D cannot be blocked along lanes and
            # may exceed the VMEM budget; fall back to the smallest legal tile.
            tn = gran if gran < D else D
            break
        tm = max(128, _round_up(tm // 2, 16))        # shrink rows and retry
    return tm, tn


def residual_linear(x, weight, bias, *, tm=512, tn=None, compute_dtype=jnp.bfloat16,
                    vmem_budget_bytes=44 << 20, single_buffer_weight=True):
    """y = x + relu(x @ weight.T + bias).
    x: [..., D]; weight: [D, D] (PyTorch nn.Linear layout [out, in]); bias: [D]."""
    orig_shape = x.shape
    out_dtype = x.dtype
    D = orig_shape[-1]
    assert weight.shape == (D, D) and bias.shape == (D,)

    x2d = x.reshape(-1, D)               # x stays in its original dtype (HBM + residual)
    M = x2d.shape[0]

    # One-time weight prep (amortised over all grid steps / calls): transpose into
    # [D_in, D_out] and cast the MXU operand to the compute dtype (bf16 by default).
    w_t = weight.T
    cast_dtype = jnp.dtype(compute_dtype) if compute_dtype is not None else None
    if cast_dtype is not None:
        w_t = w_t.astype(cast_dtype)
    b2d = bias.reshape(1, D)

    x_item = jnp.dtype(x2d.dtype).itemsize
    w_item = jnp.dtype(w_t.dtype).itemsize
    o_item = jnp.dtype(out_dtype).itemsize

    resident_bufs = 1 if single_buffer_weight else 2
    tm_eff, tn_eff = _select_tiles(M, D, tm, tn, x_item, w_item, o_item,
                                   vmem_budget_bytes, resident_bufs)
    assert D % tn_eff == 0, "tn must divide D"
    assert tn_eff == D or tn_eff % 128 == 0, "blocked tn must be lane-aligned"

    M_pad = _round_up(M, tm_eff)
    if M_pad != M:
        x2d = jnp.pad(x2d, ((0, M_pad - M), (0, 0)))

    num_i = M_pad // tm_eff
    num_j = D // tn_eff

    # Grid-axis ordering: pick the order with less HBM traffic.
    #   order A (rows outer, cols inner): x read once, weight re-read num_i times.
    #   order B (cols outer, rows inner): weight read once, x re-read num_j times.
    x_bytes = M_pad * D * x_item
    w_bytes = D * D * w_item
    o_bytes = M_pad * D * o_item
    traffic_a = x_bytes + (num_i if num_j > 1 else 1) * w_bytes + o_bytes
    traffic_b = (num_j if num_i > 1 else 1) * x_bytes + w_bytes + o_bytes
    swap = traffic_b < traffic_a
    traffic = traffic_b if swap else traffic_a

    if swap:
        grid = (num_j, num_i)
        i_of = lambda a, b: b
        j_of = lambda a, b: a
        j_axis = 0
    else:
        grid = (num_i, num_j)
        i_of = lambda a, b: a
        j_of = lambda a, b: b
        j_axis = 1

    x_spec = pl.BlockSpec((tm_eff, D), lambda a, b: (i_of(a, b), 0))
    o_spec = pl.BlockSpec((tm_eff, tn_eff), lambda a, b: (i_of(a, b), j_of(a, b)))
    w_map = lambda a, b: (0, j_of(a, b))
    b_map = lambda a, b: (0, j_of(a, b))

    kernel = functools.partial(_kernel, tn=tn_eff, j_axis=j_axis, cast_dtype=cast_dtype)

    vmem_bytes = _pipeline_vmem_bytes(tm_eff, tn_eff, D, x_item, w_item, o_item,
                                      resident_bufs if tn_eff == D else 2)
    vmem_limit = max(32 << 20, int(vmem_bytes * 1.25) + (2 << 20))

    cost = pl.CostEstimate(flops=2 * M_pad * D * D, transcendentals=0,
                           bytes_accessed=traffic + D * w_item)

    def _call(single_buffer):
        if single_buffer and tn_eff == D:
            # Grid-invariant weight/bias blocks -> a second pipeline buffer is dead VMEM.
            w_spec = pl.BlockSpec((D, tn_eff), w_map, pipeline_mode=pl.Buffered(1))
            b_spec = pl.BlockSpec((1, tn_eff), b_map, pipeline_mode=pl.Buffered(1))
        else:
            w_spec = pl.BlockSpec((D, tn_eff), w_map)
            b_spec = pl.BlockSpec((1, tn_eff), b_map)
        return pl.pallas_call(
            kernel,
            out_shape=jax.ShapeDtypeStruct((M_pad, D), out_dtype),
            grid_spec=pltpu.PrefetchScalarGridSpec(
                num_scalar_prefetch=0,
                grid=grid,
                in_specs=[x_spec, w_spec, b_spec],
                out_specs=o_spec),
            compiler_params=pltpu.CompilerParams(
                dimension_semantics=("parallel", "parallel"),
                vmem_limit_bytes=vmem_limit),
            cost_estimate=cost,
        )(x2d, w_t, b2d)

    if single_buffer_weight and tn_eff == D:
        try:
            out = _call(True)
        except Exception:
            # pl.Buffered(1) not supported on this JAX build: fall back to default buffering.
            out = _call(False)
    else:
        out = _call(False)

    if M_pad != M:
        out = out[:M]
    return out.reshape(orig_shape)


def _reference(x, weight, bias):
    return x + jnp.maximum(x @ weight.T + bias, 0.0)


if __name__ == "__main__":
    key = jax.random.PRNGKey(0)
    k_x, k_w, k_b = jax.random.split(key, 3)

    batch, seq, dim = 2, 256, 256            # tokens M = 512, feature dim D = 256
    x = jax.random.normal(k_x, (batch, seq, dim), dtype=jnp.float32)

    # Deterministic nn.Linear-style init: U(-1/sqrt(dim), 1/sqrt(dim))
    bound = 1.0 / jnp.sqrt(jnp.float32(dim))
    weight = jax.random.uniform(k_w, (dim, dim), jnp.float32, -bound, bound)
    bias = jax.random.uniform(k_b, (dim,), jnp.float32, -bound, bound)

    ref = _reference(x, weight, bias)

    # 1) Default path: bf16 MXU inputs (cast per-tile in-kernel), f32 accumulate,
    #    resident weight (tn == D), single-buffered weight/bias, f32 residual.
    out = jax.block_until_ready(residual_linear(x, weight, bias))
    assert jnp.allclose(out, ref, atol=2e-2, rtol=0.0), "bf16-default mismatch vs reference"

    # 2) Exact f32 MXU path (compute_dtype=None) -- tight tolerance.
    out_f32 = jax.block_until_ready(residual_linear(x, weight, bias, compute_dtype=None))
    assert jnp.allclose(out_f32, ref, atol=1e-4, rtol=1e-4), "f32 mismatch vs reference"

    # 3) Ragged token count (pad-and-slice path, no divisibility assert).
    x_odd = jax.random.normal(k_x, (2, 100, dim), dtype=jnp.float32)
    out_odd = jax.block_until_ready(residual_linear(x_odd, weight, bias))
    assert jnp.allclose(out_odd, _reference(x_odd, weight, bias),
                        atol=2e-2, rtol=0.0), "ragged-M mismatch vs reference"

    # 4) Forced N-blocked path (tn < D): residual sliced from the resident x tile.
    out_blk = jax.block_until_ready(residual_linear(x, weight, bias, tm=256, tn=128))
    assert jnp.allclose(out_blk, ref, atol=2e-2, rtol=0.0), "N-blocked mismatch vs reference"

    # 5) Forced grid-order swap (weight resident on the inner loop, x streamed), f32 compute.
    out_swap = jax.block_until_ready(
        residual_linear(x, weight, bias, tm=16, tn=128, compute_dtype=None))
    assert jnp.allclose(out_swap, ref, atol=1e-4, rtol=1e-4), "swapped-grid mismatch vs reference"

    print("KERNEL_OK")
</pallas_src>

<mosaic_0001>
module attributes {stable_mosaic.version = 11 : i64} {
  func.func @_kernel(%arg0: i32, %arg1: i32, %arg2: memref<512x256xf32, #tpu.memory_space<vmem>>, %arg3: memref<256x256xbf16, #tpu.memory_space<vmem>>, %arg4: memref<1x256xf32, #tpu.memory_space<vmem>>, %arg5: memref<512x256xf32, #tpu.memory_space<vmem>>) attributes {dimension_semantics = [#tpu.dimension_semantics<parallel>, #tpu.dimension_semantics<parallel>], iteration_bounds = array<i64: 1, 1>, scalar_prefetch = 0 : i64, scratch_operands = 0 : i64, tpu.core_type = #tpu.core_type<tc>, window_params = [{transform_indices = @transform_0, window_bounds = array<i64: 512, 256>}, {pipeline_mode = #tpu.pipeline_mode<synchronous>, transform_indices = @transform_1, window_bounds = array<i64: 256, 256>}, {pipeline_mode = #tpu.pipeline_mode<synchronous>, transform_indices = @transform_2, window_bounds = array<i64: 1, 256>}, {transform_indices = @transform_3, window_bounds = array<i64: 512, 256>}]} {
    %c0 = arith.constant 0 : index
    %c0_0 = arith.constant 0 : index
    %0 = vector.load %arg2[%c0, %c0_0] : memref<512x256xf32, #tpu.memory_space<vmem>>, vector<512x256xf32>
    %1 = arith.truncf %0 : vector<512x256xf32> to vector<512x256xbf16>
    %c0_1 = arith.constant 0 : index
    %c0_2 = arith.constant 0 : index
    %2 = vector.load %arg3[%c0_1, %c0_2] : memref<256x256xbf16, #tpu.memory_space<vmem>>, vector<256x256xbf16>
    %cst = arith.constant dense<0.000000e+00> : vector<512x256xf32>
    %3 = tpu.matmul %1, %2, %cst {dimension_numbers = #tpu.dot_dimension_numbers<[1], [0], [0], [1], [0, 0, 1, 1], [], []>} : vector<512x256xbf16>, vector<256x256xbf16>, vector<512x256xf32> -> vector<512x256xf32>
    %c0_3 = arith.constant 0 : index
    %c0_4 = arith.constant 0 : index
    %4 = vector.load %arg4[%c0_3, %c0_4] : memref<1x256xf32, #tpu.memory_space<vmem>>, vector<1x256xf32>
    %5 = vector.broadcast %4 : vector<1x256xf32> to vector<512x256xf32>
    %6 = arith.addf %3, %5 : vector<512x256xf32>
    %cst_5 = arith.constant 0.000000e+00 : f32
    %7 = vector.broadcast %cst_5 : f32 to vector<512x256xf32>
    %8 = arith.maximumf %6, %7 : vector<512x256xf32>
    %c256_i32 = arith.constant 256 : i32
    %9 = arith.muli %arg1, %c256_i32 : i32
    %10 = tpu.assume_multiple %9, 128 : i32
    %c0_6 = arith.constant 0 : index
    %11 = arith.index_cast %10 : i32 to index
    %12 = vector.load %arg2[%c0_6, %11] : memref<512x256xf32, #tpu.memory_space<vmem>>, vector<512x256xf32>
    %13 = arith.addf %12, %8 : vector<512x256xf32>
    %c0_7 = arith.constant 0 : index
    %c0_8 = arith.constant 0 : index
    %14 = vector.load %arg5[%c0_7, %c0_8] : memref<512x256xf32, #tpu.memory_space<vmem>>, vector<512x256xf32>
    tpu.vector_store %arg5[%c0_7, %c0_8], %13 {strides = array<i32>} : memref<512x256xf32, #tpu.memory_space<vmem>>, vector<512x256xf32>,
    return
  }
  func.func @transform_0(%arg0: i32, %arg1: i32) -> (i32, i32) {
    %c0_i32 = arith.constant 0 : i32
    %c0_i32_0 = arith.constant 0 : i32
    return %arg0, %c0_i32 : i32, i32
  }
  func.func @transform_1(%arg0: i32, %arg1: i32) -> (i32, i32) {
    %c0_i32 = arith.constant 0 : i32
    %c0_i32_0 = arith.constant 0 : i32
    return %c0_i32, %arg1 : i32, i32
  }
  func.func @transform_2(%arg0: i32, %arg1: i32) -> (i32, i32) {
    %c0_i32 = arith.constant 0 : i32
    %c0_i32_0 = arith.constant 0 : i32
    return %c0_i32, %arg1 : i32, i32
  }
  func.func @transform_3(%arg0: i32, %arg1: i32) -> (i32, i32) {
    %c0_i32 = arith.constant 0 : i32
    return %arg0, %arg1 : i32, i32
  }
}

module attributes {stable_mosaic.version = 11 : i64} {
  func.func @_kernel(%arg0: i32, %arg1: i32, %arg2: memref<512x256xf32, #tpu.memory_space<vmem>>, %arg3: memref<256x256xbf16, #tpu.memory_space<vmem>>, %arg4: memref<1x256xf32, #tpu.memory_space<vmem>>, %arg5: memref<512x256xf32, #tpu.memory_space<vmem>>) attributes {dimension_semantics = [#tpu.dimension_semantics<parallel>, #tpu.dimension_semantics<parallel>], iteration_bounds = array<i64: 1, 1>, scalar_prefetch = 0 : i64, scratch_operands = 0 : i64, tpu.core_type = #tpu.core_type<tc>, window_params = [{transform_indices = @transform_0, window_bounds = array<i64: 512, 256>}, {transform_indices = @transform_1, window_bounds = array<i64: 256, 256>}, {transform_indices = @transform_2, window_bounds = array<i64: 1, 256>}, {transform_indices = @transform_3, window_bounds = array<i64: 512, 256>}]} {
    %c0 = arith.constant 0 : index
    %c0_0 = arith.constant 0 : index
    %0 = vector.load %arg2[%c0, %c0_0] : memref<512x256xf32, #tpu.memory_space<vmem>>, vector<512x256xf32>
    %1 = arith.truncf %0 : vector<512x256xf32> to vector<512x256xbf16>
    %c0_1 = arith.constant 0 : index
    %c0_2 = arith.constant 0 : index
    %2 = vector.load %arg3[%c0_1, %c0_2] : memref<256x256xbf16, #tpu.memory_space<vmem>>, vector<256x256xbf16>
    %cst = arith.constant dense<0.000000e+00> : vector<512x256xf32>
    %3 = tpu.matmul %1, %2, %cst {dimension_numbers = #tpu.dot_dimension_numbers<[1], [0], [0], [1], [0, 0, 1, 1], [], []>} : vector<512x256xbf16>, vector<256x256xbf16>, vector<512x256xf32> -> vector<512x256xf32>
    %c0_3 = arith.constant 0 : index
    %c0_4 = arith.constant 0 : index
    %4 = vector.load %arg4[%c0_3, %c0_4] : memref<1x256xf32, #tpu.memory_space<vmem>>, vector<1x256xf32>
    %5 = vector.broadcast %4 : vector<1x256xf32> to vector<512x256xf32>
    %6 = arith.addf %3, %5 : vector<512x256xf32>
    %cst_5 = arith.constant 0.000000e+00 : f32
    %7 = vector.broadcast %cst_5 : f32 to vector<512x256xf32>
    %8 = arith.maximumf %6, %7 : vector<512x256xf32>
    %c256_i32 = arith.constant 256 : i32
    %9 = arith.muli %arg1, %c256_i32 : i32
    %10 = tpu.assume_multiple %9, 128 : i32
    %c0_6 = arith.constant 0 : index
    %11 = arith.index_cast %10 : i32 to index
    %12 = vector.load %arg2[%c0_6, %11] : memref<512x256xf32, #tpu.memory_space<vmem>>, vector<512x256xf32>
    %13 = arith.addf %12, %8 : vector<512x256xf32>
    %c0_7 = arith.constant 0 : index
    %c0_8 = arith.constant 0 : index
    %14 = vector.load %arg5[%c0_7, %c0_8] : memref<512x256xf32, #tpu.memory_space<vmem>>, vector<512x256xf32>
    tpu.vector_store %arg5[%c0_7, %c0_8], %13 {strides = array<i32>} : memref<512x256xf32, #tpu.memory_space<vmem>>, vector<512x256xf32>,
    return
  }
  func.func @transform_0(%arg0: i32, %arg1: i32) -> (i32, i32) {
    %c0_i32 = arith.constant 0 : i32
    %c0_i32_0 = arith.constant 0 : i32
    return %arg0, %c0_i32 : i32, i32
  }
  func.func @transform_1(%arg0: i32, %arg1: i32) -> (i32, i32) {
    %c0_i32 = arith.constant 0 : i32
    %c0_i32_0 = arith.constant 0 : i32
    return %c0_i32, %arg1 : i32, i32
  }
  func.func @transform_2(%arg0: i32, %arg1: i32) -> (i32, i32) {
    %c0_i32 = arith.constant 0 : i32
    %c0_i32_0 = arith.constant 0 : i32
    return %c0_i32, %arg1 : i32, i32
  }
  func.func @transform_3(%arg0: i32, %arg1: i32) -> (i32, i32) {
    %c0_i32 = arith.constant 0 : i32
    return %arg0, %arg1 : i32, i32
  }
}

</mosaic_0001>

<bundles_post_ra>
// kernel: tpu_custom_call.1
= control target key start
LH: loop header
LB: loop body
LE: loop exit
PB: predicated region body
PF: predicated region fallthrough
CT: control target
= control target key end

     0   :  { %8 = vsyncpa [#allocation3], 0  ;;  %s1972_s0 = inlined_call_operand.hbm [shape: f32[512,256], index: 0, kind: input, shape index: {}]   ;;  %s1973_s1 = inlined_call_operand.hbm [shape: bf16[256,256], index: 1, kind: input, shape index: {}]   ;;  %s1974_s2 = inlined_call_operand.vmem [shape: f32[1,256], index: 2, kind: input, shape index: {}]   ;;  %s1975_s3 = inlined_call_operand.hbm [shape: f32[512,256], index: 3, kind: output, shape index: {}]  }
   0x1   :  { %9 = vsyncpa [#allocation6], 0 }
   0x2   :  { %10 = vsyncpa [#allocation4], 0  ;;  %s1520_s12 = smov [#allocation2]   ;;  %s1448_s16 = scalar_lea.hbm %s1972_s0, 16384 }
   0x3   :  { %s16_s13 = sshll.u32 %s1520_s12, 4  ;;  %p1449_p0 = scmp.ne.s32.totalorder %s1972_s0, %s1448_s16  ;;  %s17_s13 = int_to_ptr.vmem [resolvable:$true] %s16_s13 }
   0x4   :  { %p1452_p1 = scmp.lt.u32.totalorder %s1448_s16, %s1972_s0 }
   0x6   :  { %p1454_p2 = pnand %p1452_p1, %p1449_p0 }
   0x8   :  { %1457 = shalt.err (!%p1454_p2)
}
   0x9   :  { %s1458_s21 = scalar_lea.vmem %s17_s13, 16384  ;;  %p1463_p4 = scmp.lt.s32.totalorder %s17_s13, %s17_s13 }
   0xa   :  { %p1459_p3 = scmp.ne.s32.totalorder %s17_s13, %s1458_s21  ;;  %p1464_p5 = scmp.lt.s32.totalorder %s1458_s21, %s1458_s21 }
   0xc   :  { %p1465_p6 = por %p1464_p5, %p1463_p4 }
   0xe   :  { %p1466_p7 = pnand %p1465_p6, %p1459_p3 }
  0x10   :  { %1469 = shalt.err (!%p1466_p7)
}
  0x11   :  { %s1521_s22 = smov 256   ;;  %s1522_s23 = smov 16  }
  0x12   :  { %22 = dma.hbm_to_vmem [thread:$0]  %s1972_s0, 16384, %s17_s13, [#allocation3], %s1521_s22, %s1521_s22, %s1522_s23  }
  0x13   :  { %s1523_s26 = smov [#allocation5]   ;;  %s1470_s30 = scalar_lea.hbm %s1973_s1, 4096 }
  0x14   :  { %s28_s27 = sshll.u32 %s1523_s26, 4  ;;  %p1471_p8 = scmp.ne.s32.totalorder %s1973_s1, %s1470_s30  ;;  %s29_s27 = int_to_ptr.vmem [resolvable:$true] %s28_s27 }
  0x15   :  { %p1474_p9 = scmp.lt.u32.totalorder %s1470_s30, %s1973_s1 }
  0x17   :  { %p1476_p10 = pnand %p1474_p9, %p1471_p8 }
  0x19   :  { %1479 = shalt.err (!%p1476_p10)
}
  0x1a   :  { %s1480_s8 = scalar_lea.vmem %s29_s27, 4096  ;;  %p1485_p12 = scmp.lt.s32.totalorder %s29_s27, %s29_s27 }
  0x1b   :  { %p1481_p11 = scmp.ne.s32.totalorder %s29_s27, %s1480_s8  ;;  %p1486_p13 = scmp.lt.s32.totalorder %s1480_s8, %s1480_s8 }
  0x1d   :  { %p1487_p0 = por %p1486_p13, %p1485_p12 }
  0x1f   :  { %p1488_p1 = pnand %p1487_p0, %p1481_p11 }
  0x21   :  { %1491 = shalt.err (!%p1488_p1)
}
  0x22   :  { %s1524_s0 = smov 128   ;;  %s1525_s9 = smov 8  }
  0x23   :  { %34 = dma.hbm_to_vmem [thread:$0]  %s1973_s1, 4096, %s29_s27, [#allocation6], %s1524_s0, %s1524_s0, %s1525_s9  }
  0x24   :  { %1514 = dma.done.wait [#allocation3], 16384  }
  0x25   :  { %1515 = vsyncadd [#allocation3], 4294950912 }
  0x26   :  { %1516 = dma.done.wait [#allocation6], 4096  }
  0x27   :  { %1517 = vsyncadd [#allocation6], 4294963200  ;;  %v1400_v0 = vld [vmem:[#allocation5 + $0x4] ss:$8 sps:$4 sm:$0xff]   ;;  %v1402_v1 = vld [vmem:[#allocation5] ss:$8 sps:$4 sm:$0xff]  }
  0x28   :  { %439 = vmatprep.subr.bf16.mxu0 %v1400_v0  ;;  %1361 = vmatprep.subr.bf16.mxu1 %v1400_v0  ;;  %v1403_v2 = vld [vmem:[#allocation5 + $0x14] ss:$8 sps:$4 sm:$0xff]   ;;  %v1405_v3 = vld [vmem:[#allocation5 + $0x10] ss:$8 sps:$4 sm:$0xff]   ;;  %v1406_v4 = vld [vmem:[#allocation5 + $0x24] ss:$8 sps:$4 sm:$0xff]  }
  0x29   :  { %440 = vmatpush1.bf16.msra.mxu0 %v1402_v1  ;;  %1377 = vmatpush1.bf16.msra.mxu1 %v1402_v1  ;;  %v1408_v5 = vld [vmem:[#allocation5 + $0x20] ss:$8 sps:$4 sm:$0xff]   ;;  %v1409_v6 = vld [vmem:[#allocation5 + $0x34] ss:$8 sps:$4 sm:$0xff]   ;;  %v1411_v7 = vld [vmem:[#allocation5 + $0x30] ss:$8 sps:$4 sm:$0xff]  }
  0x2a   :  { %441 = vmatprep.subr.bf16.mxu0 %v1403_v2  ;;  %1362 = vmatprep.subr.bf16.mxu1 %v1403_v2  ;;  %v1412_v8 = vld [vmem:[#allocation5 + $0x44] ss:$8 sps:$4 sm:$0xff]   ;;  %v1414_v9 = vld [vmem:[#allocation5 + $0x40] ss:$8 sps:$4 sm:$0xff]   ;;  %v1415_v10 = vld [vmem:[#allocation5 + $0x54] ss:$8 sps:$4 sm:$0xff]  }
  0x2b   :  { %v1417_v11 = vld [vmem:[#allocation5 + $0x50] ss:$8 sps:$4 sm:$0xff]   ;;  %v1418_v12 = vld [vmem:[#allocation5 + $0x64] ss:$8 sps:$4 sm:$0xff]   ;;  %v1420_v18 = vld [vmem:[#allocation5 + $0x60] ss:$8 sps:$4 sm:$0xff]  }
  0x2c   :  { %v1574_v13 = vld [vmem:[#allocation2 + $0x8] sm:$0xff]  ;;  %v1576_v14 = vld [vmem:[#allocation2 + $0x18] sm:$0xff]  ;;  %v1586_v38 = vld [vmem:[#allocation2] sm:$0xff] }
  0x2d   :  { %442 = vmatpush1.bf16.msra.mxu0 %v1405_v3  ;;  %1378 = vmatpush1.bf16.msra.mxu1 %v1405_v3  ;;  %v172_v15 = vpack.c.bf16 %v1576_v14, %v1574_v13  ;;  %v1580_v16 = vld [vmem:[#allocation2 + $0x208] sm:$0xff]  ;;  %v1582_v17 = vld [vmem:[#allocation2 + $0x218] sm:$0xff]  ;;  %v1588_v39 = vld [vmem:[#allocation2 + $0x10] sm:$0xff] }
  0x2e   :  { %443 = vmatprep.subr.bf16.mxu0 %v1406_v4  ;;  %1363 = vmatprep.subr.bf16.mxu1 %v1406_v4  ;;  %v204_v19 = vpack.c.bf16 %v1582_v17, %v1580_v16  ;;  %v1421_v20 = vld [vmem:[#allocation5 + $0x74] ss:$8 sps:$4 sm:$0xff]   ;;  %v1423_v21 = vld [vmem:[#allocation5 + $0x70] ss:$8 sps:$4 sm:$0xff]   ;;  %v1424_v22 = vld [vmem:[#allocation5 + $0x84] ss:$8 sps:$4 sm:$0xff]   ;;  %v171_v46 = vpack.c.bf16 %v1588_v39, %v1586_v38 }
  0x2f   :  { %471 = vmatprep.mubr.bf16.mxu0 %v172_v15  ;;  %v1426_v23 = vld [vmem:[#allocation5 + $0x80] ss:$8 sps:$4 sm:$0xff]   ;;  %v1427_v24 = vld [vmem:[#allocation5 + $0x94] ss:$8 sps:$4 sm:$0xff]   ;;  %v1429_v25 = vld [vmem:[#allocation5 + $0x90] ss:$8 sps:$4 sm:$0xff]  }
  0x30   :  { %631 = vmatprep.mubr.bf16.mxu1 %v204_v19  ;;  %v1430_v26 = vld [vmem:[#allocation5 + $0xa4] ss:$8 sps:$4 sm:$0xff]   ;;  %v1432_v27 = vld [vmem:[#allocation5 + $0xa0] ss:$8 sps:$4 sm:$0xff]   ;;  %v1433_v28 = vld [vmem:[#allocation5 + $0xb4] ss:$8 sps:$4 sm:$0xff]  }
  0x31   :  { %444 = vmatpush1.bf16.msra.mxu0 %v1408_v5  ;;  %1379 = vmatpush1.bf16.msra.mxu1 %v1408_v5  ;;  %v1435_v29 = vld [vmem:[#allocation5 + $0xb0] ss:$8 sps:$4 sm:$0xff]   ;;  %v1436_v30 = vld [vmem:[#allocation5 + $0xc4] ss:$8 sps:$4 sm:$0xff]   ;;  %v1438_v31 = vld [vmem:[#allocation5 + $0xc0] ss:$8 sps:$4 sm:$0xff]  }
  0x32   :  { %445 = vmatprep.subr.bf16.mxu0 %v1409_v6  ;;  %1364 = vmatprep.subr.bf16.mxu1 %v1409_v6  ;;  %v1439_v32 = vld [vmem:[#allocation5 + $0xd4] ss:$8 sps:$4 sm:$0xff]   ;;  %v1441_v33 = vld [vmem:[#allocation5 + $0xd0] ss:$8 sps:$4 sm:$0xff]   ;;  %v1442_v34 = vld [vmem:[#allocation5 + $0xe4] ss:$8 sps:$4 sm:$0xff]  }
  0x33   :  { %v1444_v35 = vld [vmem:[#allocation5 + $0xe0] ss:$8 sps:$4 sm:$0xff]   ;;  %v1445_v36 = vld [vmem:[#allocation5 + $0xf4] ss:$8 sps:$4 sm:$0xff]   ;;  %v1447_v37 = vld [vmem:[#allocation5 + $0xf0] ss:$8 sps:$4 sm:$0xff]  }
  0x34   :  { %v1590_v40 = vld [vmem:[#allocation2 + $0x200] sm:$0xff]  ;;  %v1592_v41 = vld [vmem:[#allocation2 + $0x210] sm:$0xff]  ;;  %v1594_v42 = vld [vmem:[#allocation2 + $0x28] sm:$0xff] }
  0x35   :  { %446 = vmatpush1.bf16.msra.mxu0 %v1411_v7  ;;  %1380 = vmatpush1.bf16.msra.mxu1 %v1411_v7  ;;  %v1596_v43 = vld [vmem:[#allocation2 + $0x38] sm:$0xff]  ;;  %v1598_v44 = vld [vmem:[#allocation2 + $0x228] sm:$0xff]  ;;  %v203_v47 = vpack.c.bf16 %v1592_v41, %v1590_v40  ;;  %v1610_v50 = vld [vmem:[#allocation2 + $0x20] sm:$0xff] }
  0x36   :  { %447 = vmatprep.subr.bf16.mxu0 %v1412_v8  ;;  %1365 = vmatprep.subr.bf16.mxu1 %v1412_v8  ;;  %v1600_v45 = vld [vmem:[#allocation2 + $0x238] sm:$0xff]  ;;  %v174_v48 = vpack.c.bf16 %v1596_v43, %v1594_v42  ;;  %v1612_v51 = vld [vmem:[#allocation2 + $0x30] sm:$0xff]  ;;  %v1614_v52 = vld [vmem:[#allocation2 + $0x220] sm:$0xff] }
  0x37   :  { %v206_v49 = vpack.c.bf16 %v1600_v45, %v1598_v44  ;;  %v1616_v53 = vld [vmem:[#allocation2 + $0x230] sm:$0xff]  ;;  %v1618_v54 = vld [vmem:[#allocation2 + $0x48] sm:$0xff]  ;;  %v1620_v55 = vld [vmem:[#allocation2 + $0x58] sm:$0xff]  ;;  %v173_v58 = vpack.c.bf16 %v1612_v51, %v1610_v50 }
  0x38   :  { %v1622_v56 = vld [vmem:[#allocation2 + $0x248] sm:$0xff]  ;;  %v1624_v57 = vld [vmem:[#allocation2 + $0x258] sm:$0xff]  ;;  %v205_v59 = vpack.c.bf16 %v1616_v53, %v1614_v52  ;;  %v176_v60 = vpack.c.bf16 %v1620_v55, %v1618_v54  ;;  %v1634_v62 = vld [vmem:[#allocation2 + $0x40] sm:$0xff] }
  0x39   :  { %448 = vmatpush1.bf16.msra.mxu0 %v1414_v9  ;;  %1381 = vmatpush1.bf16.msra.mxu1 %v1414_v9  ;;  %v208_v61 = vpack.c.bf16 %v1624_v57, %v1622_v56  ;;  %v1636_v63 = vld [vmem:[#allocation2 + $0x50] sm:$0xff]  ;;  %v1638_v0 = vld [vmem:[#allocation2 + $0x240] sm:$0xff]  ;;  %v1642_v2 = vld [vmem:[#allocation2 + $0x68] sm:$0xff] }
  0x3a   :  { %449 = vmatprep.subr.bf16.mxu0 %v1415_v10  ;;  %1366 = vmatprep.subr.bf16.mxu1 %v1415_v10  ;;  %v1640_v1 = vld [vmem:[#allocation2 + $0x250] sm:$0xff]  ;;  %v1644_v3 = vld [vmem:[#allocation2 + $0x78] sm:$0xff]  ;;  %v1646_v4 = vld [vmem:[#allocation2 + $0x268] sm:$0xff]  ;;  %v175_v6 = vpack.c.bf16 %v1636_v63, %v1634_v62 }
  0x3b   :  { %v1648_v5 = vld [vmem:[#allocation2 + $0x278] sm:$0xff]  ;;  %v207_v7 = vpack.c.bf16 %v1640_v1, %v1638_v0  ;;  %v178_v8 = vpack.c.bf16 %v1644_v3, %v1642_v2  ;;  %v1658_v10 = vld [vmem:[#allocation2 + $0x60] sm:$0xff]  ;;  %v1664_v15 = vld [vmem:[#allocation2 + $0x270] sm:$0xff] }
  0x3c   :  { %v210_v9 = vpack.c.bf16 %v1648_v5, %v1646_v4  ;;  %v1668_v19 = vld [vmem:[#allocation2 + $0x98] sm:$0xff] }
  0x3d   :  { %450 = vmatpush1.bf16.msra.mxu0 %v1417_v11  ;;  %1382 = vmatpush1.bf16.msra.mxu1 %v1417_v11  ;;  %v1660_v11 = vld [vmem:[#allocation2 + $0x70] sm:$0xff] }
  0x3e   :  { %451 = vmatprep.subr.bf16.mxu0 %v1418_v12  ;;  %1367 = vmatprep.subr.bf16.mxu1 %v1418_v12  ;;  %v1662_v12 = vld [vmem:[#allocation2 + $0x260] sm:$0xff] }
  0x41   :  { %452 = vmatpush1.bf16.msra.mxu0 %v1420_v18  ;;  %1383 = vmatpush1.bf16.msra.mxu1 %v1420_v18  ;;  %v1666_v18 = vld [vmem:[#allocation2 + $0x88] sm:$0xff] }
  0x42   :  { %453 = vmatprep.subr.bf16.mxu0 %v1421_v20  ;;  %1368 = vmatprep.subr.bf16.mxu1 %v1421_v20  ;;  %v1670_v20 = vld [vmem:[#allocation2 + $0x288] sm:$0xff] }
  0x45   :  { %454 = vmatpush1.bf16.msra.mxu0 %v1423_v21  ;;  %1384 = vmatpush1.bf16.msra.mxu1 %v1423_v21  ;;  %v1672_v21 = vld [vmem:[#allocation2 + $0x298] sm:$0xff] }
  0x46   :  { %455 = vmatprep.subr.bf16.mxu0 %v1424_v22  ;;  %1369 = vmatprep.subr.bf16.mxu1 %v1424_v22  ;;  %v177_v22 = vpack.c.bf16 %v1660_v11, %v1658_v10 }
  0x49   :  { %456 = vmatpush1.bf16.msra.mxu0 %v1426_v23  ;;  %1385 = vmatpush1.bf16.msra.mxu1 %v1426_v23  ;;  %v209_v23 = vpack.c.bf16 %v1664_v15, %v1662_v12 }
  0x4a   :  { %457 = vmatprep.subr.bf16.mxu0 %v1427_v24  ;;  %1370 = vmatprep.subr.bf16.mxu1 %v1427_v24  ;;  %v180_v24 = vpack.c.bf16 %v1668_v19, %v1666_v18 }
  0x4d   :  { %458 = vmatpush1.bf16.msra.mxu0 %v1429_v25  ;;  %1386 = vmatpush1.bf16.msra.mxu1 %v1429_v25  ;;  %v212_v25 = vpack.c.bf16 %v1672_v21, %v1670_v20 }
  0x4e   :  { %459 = vmatprep.subr.bf16.mxu0 %v1430_v26  ;;  %1371 = vmatprep.subr.bf16.mxu1 %v1430_v26  ;;  %v1682_v26 = vld [vmem:[#allocation2 + $0x80] sm:$0xff] }
  0x51   :  { %460 = vmatpush1.bf16.msra.mxu0 %v1432_v27  ;;  %1387 = vmatpush1.bf16.msra.mxu1 %v1432_v27  ;;  %v1684_v27 = vld [vmem:[#allocation2 + $0x90] sm:$0xff] }
  0x52   :  { %461 = vmatprep.subr.bf16.mxu0 %v1433_v28  ;;  %1372 = vmatprep.subr.bf16.mxu1 %v1433_v28  ;;  %v1686_v28 = vld [vmem:[#allocation2 + $0x280] sm:$0xff] }
  0x55   :  { %462 = vmatpush1.bf16.msra.mxu0 %v1435_v29  ;;  %1388 = vmatpush1.bf16.msra.mxu1 %v1435_v29  ;;  %v1688_v29 = vld [vmem:[#allocation2 + $0x290] sm:$0xff] }
  0x56   :  { %463 = vmatprep.subr.bf16.mxu0 %v1436_v30  ;;  %1373 = vmatprep.subr.bf16.mxu1 %v1436_v30  ;;  %v1690_v30 = vld [vmem:[#allocation2 + $0xa8] sm:$0xff] }
  0x57   :  { %1998 = vst [vmem:[#allocation11_spill] sm:$0xff] %v1690_v30 }
  0x59   :  { %464 = vmatpush1.bf16.msra.mxu0 %v1438_v31  ;;  %1389 = vmatpush1.bf16.msra.mxu1 %v1438_v31  ;;  %v1692_v31 = vld [vmem:[#allocation2 + $0xb8] sm:$0xff] }
  0x5a   :  { %465 = vmatprep.subr.bf16.mxu0 %v1439_v32  ;;  %1374 = vmatprep.subr.bf16.mxu1 %v1439_v32  ;;  %1999 = vst [vmem:[#allocation12_spill] sm:$0xff] %v1692_v31  ;;  %v1694_v32 = vld [vmem:[#allocation2 + $0x2a8] sm:$0xff] }
  0x5b   :  { %2000 = vst [vmem:[#allocation13_spill] sm:$0xff] %v1694_v32 }
  0x5d   :  { %466 = vmatpush1.bf16.msra.mxu0 %v1441_v33  ;;  %1390 = vmatpush1.bf16.msra.mxu1 %v1441_v33  ;;  %v1696_v33 = vld [vmem:[#allocation2 + $0x2b8] sm:$0xff] }
  0x5e   :  { %467 = vmatprep.subr.bf16.mxu0 %v1442_v34  ;;  %1375 = vmatprep.subr.bf16.mxu1 %v1442_v34  ;;  %2001 = vst [vmem:[#allocation14_spill] sm:$0xff] %v1696_v33  ;;  %v179_v34 = vpack.c.bf16 %v1684_v27, %v1682_v26 }
  0x61   :  { %468 = vmatpush1.bf16.msra.mxu0 %v1444_v35  ;;  %1391 = vmatpush1.bf16.msra.mxu1 %v1444_v35  ;;  %v211_v35 = vpack.c.bf16 %v1688_v29, %v1686_v28 }
  0x62   :  { %469 = vmatprep.subr.bf16.mxu0 %v1445_v36  ;;  %1376 = vmatprep.subr.bf16.mxu1 %v1445_v36  ;;  %v182_v36 = vpack.c.bf16 %v1692_v31, %v1690_v30  ;;  %v82_v31 = vld [vmem:[#allocation2 + $0x138] sm:$0xff] }
  0x65   :  { %470 = vmatpush1.bf16.msra.mxu0 %v1447_v37  ;;  %1392 = vmatpush1.bf16.msra.mxu1 %v1447_v37  ;;  %v214_v37 = vpack.c.bf16 %v1696_v33, %v1694_v32  ;;  %v140_v33 = vld [vmem:[#allocation2 + $0x308] sm:$0xff] }
  0x68   :  { %472 = vmatmul.mubr.bf16.vlgmr.msra.gmra.mrb[0].mxu0 %v171_v46  ;;  %632 = vmatmul.mubr.bf16.vlgmr.msra.gmra.mrb[0].mxu1 %v203_v47  ;;  %v1706_v46 = vld [vmem:[#allocation2 + $0xa0] sm:$0xff]  ;;  %v1708_v47 = vld [vmem:[#allocation2 + $0xb0] sm:$0xff] }
  0x69   :  { %481 = vmatprep.mubr.bf16.mxu0 %v174_v48  ;;  %641 = vmatprep.mubr.bf16.mxu1 %v206_v49  ;;  %2002 = vst [vmem:[#allocation15_spill] sm:$0xff] %v1706_v46  ;;  %2003 = vst [vmem:[#allocation16_spill] sm:$0xff] %v1708_v47  ;;  %v1710_v48 = vld [vmem:[#allocation2 + $0x2a0] sm:$0xff]  ;;  %v1712_v49 = vld [vmem:[#allocation2 + $0x2b0] sm:$0xff] }
  0x6a   :  { %2004 = vst [vmem:[#allocation17_spill] sm:$0xff] %v1710_v48  ;;  %2005 = vst [vmem:[#allocation18_spill] sm:$0xff] %v1712_v49 }
  0x70   :  { %482 = vmatmul.mubr.bf16.gmra.mrb[4].mxu0 %v173_v58  ;;  %642 = vmatmul.mubr.bf16.gmra.mrb[4].mxu1 %v205_v59  ;;  %v1714_v58 = vld [vmem:[#allocation2 + $0xc8] sm:$0xff]  ;;  %v1716_v59 = vld [vmem:[#allocation2 + $0xd8] sm:$0xff] }
  0x71   :  { %491 = vmatprep.mubr.bf16.mxu0 %v176_v60  ;;  %651 = vmatprep.mubr.bf16.mxu1 %v208_v61  ;;  %2006 = vst [vmem:[#allocation19_spill] sm:$0xff] %v1714_v58  ;;  %2007 = vst [vmem:[#allocation20_spill] sm:$0xff] %v1716_v59  ;;  %v1718_v60 = vld [vmem:[#allocation2 + $0x2c8] sm:$0xff]  ;;  %v1720_v61 = vld [vmem:[#allocation2 + $0x2d8] sm:$0xff] }
  0x72   :  { %2008 = vst [vmem:[#allocation21_spill] sm:$0xff] %v1718_v60  ;;  %2009 = vst [vmem:[#allocation22_spill] sm:$0xff] %v1720_v61 }
  0x78   :  { %492 = vmatmul.mubr.bf16.gmra.mrb[8].mxu0 %v175_v6  ;;  %652 = vmatmul.mubr.bf16.gmra.mrb[8].mxu1 %v207_v7  ;;  %v181_v6 = vpack.c.bf16 %v1708_v47, %v1706_v46  ;;  %v213_v7 = vpack.c.bf16 %v1712_v49, %v1710_v48  ;;  %v144_v49 = vld [vmem:[#allocation2 + $0x328] sm:$0xff]  ;;  %v146_v47 = vld [vmem:[#allocation2 + $0x338] sm:$0xff] }
  0x79   :  { %501 = vmatprep.mubr.bf16.mxu0 %v178_v8  ;;  %661 = vmatprep.mubr.bf16.mxu1 %v210_v9  ;;  %v184_v8 = vpack.c.bf16 %v1716_v59, %v1714_v58  ;;  %v216_v9 = vpack.c.bf16 %v1720_v61, %v1718_v60  ;;  %v1750_v59 = vld [vmem:[#allocation2 + $0xf0] sm:$0xff]  ;;  %v1752_v60 = vld [vmem:[#allocation2 + $0x2e0] sm:$0xff] }
  0x7a   :  { %2017 = vst [vmem:[#allocation30_spill] sm:$0xff] %v1750_v59  ;;  %2018 = vst [vmem:[#allocation31_spill] sm:$0xff] %v1752_v60  ;;  %v1754_v58 = vld [vmem:[#allocation2 + $0x2f0] sm:$0xff] }
  0x7b   :  { %2019 = vst [vmem:[#allocation32_spill] sm:$0xff] %v1754_v58 }
  0x80   :  { %502 = vmatmul.mubr.bf16.gmra.mrb[12].mxu0 %v177_v22  ;;  %662 = vmatmul.mubr.bf16.gmra.mrb[12].mxu1 %v209_v23  ;;  %v1730_v22 = vld [vmem:[#allocation2 + $0xc0] sm:$0xff]  ;;  %v1732_v23 = vld [vmem:[#allocation2 + $0xd0] sm:$0xff] }
  0x81   :  { %511 = vmatprep.mubr.bf16.mxu0 %v180_v24  ;;  %671 = vmatprep.mubr.bf16.mxu1 %v212_v25  ;;  %2010 = vst [vmem:[#allocation23_spill] sm:$0xff] %v1730_v22  ;;  %2011 = vst [vmem:[#allocation24_spill] sm:$0xff] %v1732_v23  ;;  %v1734_v24 = vld [vmem:[#allocation2 + $0x2c0] sm:$0xff]  ;;  %v1736_v25 = vld [vmem:[#allocation2 + $0x2d0] sm:$0xff] }
  0x82   :  { %2012 = vst [vmem:[#allocation25_spill] sm:$0xff] %v1734_v24  ;;  %2013 = vst [vmem:[#allocation26_spill] sm:$0xff] %v1736_v25 }
  0x88   :  { %512 = vmatmul.mubr.bf16.gmra.mrb[16].mxu0 %v179_v34  ;;  %672 = vmatmul.mubr.bf16.gmra.mrb[16].mxu1 %v211_v35  ;;  %v1738_v34 = vld [vmem:[#allocation2 + $0xe8] sm:$0xff]  ;;  %v74_v35 = vld [vmem:[#allocation2 + $0xf8] sm:$0xff] }
  0x89   :  { %521 = vmatprep.mubr.bf16.mxu0 %v182_v36  ;;  %681 = vmatprep.mubr.bf16.mxu1 %v214_v37  ;;  %2014 = vst [vmem:[#allocation27_spill] sm:$0xff] %v1738_v34  ;;  %v1740_v36 = vld [vmem:[#allocation2 + $0x2e8] sm:$0xff]  ;;  %v138_v37 = vld [vmem:[#allocation2 + $0x2f8] sm:$0xff]  ;;  %v186_v61 = vpack.c.bf16 %v74_v35, %v1738_v34  ;;  %v141_v34 = vld [vmem:[#allocation2 + $0x310] sm:$0xff] }
  0x8a   :  { %2015 = vst [vmem:[#allocation28_spill] sm:$0xff] %v1740_v36 }
  0x90   :  { %522 = vmatmul.mubr.bf16.gmra.mrb[20].mxu0 %v181_v6  ;;  %682 = vmatmul.mubr.bf16.gmra.mrb[20].mxu1 %v213_v7  ;;  %v183_v6 = vpack.c.bf16 %v1732_v23, %v1730_v22  ;;  %v215_v7 = vpack.c.bf16 %v1736_v25, %v1734_v24  ;;  %v76_v23 = vld [vmem:[#allocation2 + $0x108] sm:$0xff]  ;;  %v78_v22 = vld [vmem:[#allocation2 + $0x118] sm:$0xff] }
  0x91   :  { %531 = vmatprep.mubr.bf16.mxu0 %v184_v8  ;;  %691 = vmatprep.mubr.bf16.mxu1 %v216_v9  ;;  %v218_v8 = vpack.c.bf16 %v138_v37, %v1740_v36  ;;  %v1748_v9 = vld [vmem:[#allocation2 + $0xe0] sm:$0xff]  ;;  %v142_v25 = vld [vmem:[#allocation2 + $0x318] sm:$0xff]  ;;  %v217_v37 = vpack.c.bf16 %v1754_v58, %v1752_v60  ;;  %v80_v24 = vld [vmem:[#allocation2 + $0x128] sm:$0xff] }
  0x92   :  { %2016 = vst [vmem:[#allocation29_spill] sm:$0xff] %v1748_v9  ;;  %v185_v35 = vpack.c.bf16 %v1750_v59, %v1748_v9  ;;  %v139_v36 = vld [vmem:[#allocation2 + $0x300] sm:$0xff]  ;;  %v190_v59 = vpack.c.bf16 %v82_v31, %v80_v24  ;;  %v222_v9 = vpack.c.bf16 %v146_v47, %v144_v49  ;;  %v85_v47 = vld [vmem:[#allocation2 + $0x150] sm:$0xff]  ;;  %v88_v49 = vld [vmem:[#allocation2 + $0x168] sm:$0xff] }
  0x93   :  { %v219_v30 = vpack.c.bf16 %v141_v34, %v139_v36  ;;  %v83_v31 = vld [vmem:[#allocation2 + $0x140] sm:$0xff]  ;;  %v152_v24 = vld [vmem:[#allocation2 + $0x368] sm:$0xff]  ;;  %v154_v34 = vld [vmem:[#allocation2 + $0x378] sm:$0xff] }
  0x94   :  { %v191_v36 = vpack.c.bf16 %v85_v47, %v83_v31  ;;  %v91_v31 = vld [vmem:[#allocation2 + $0x180] sm:$0xff]  ;;  %v93_v47 = vld [vmem:[#allocation2 + $0x190] sm:$0xff] }
  0x98   :  { %532 = vmatmul.mubr.bf16.gmra.mrb[24].mxu0 %v183_v6  ;;  %692 = vmatmul.mubr.bf16.gmra.mrb[24].mxu1 %v215_v7  ;;  %v188_v6 = vpack.c.bf16 %v78_v22, %v76_v23  ;;  %v220_v7 = vpack.c.bf16 %v142_v25, %v140_v33  ;;  %v79_v22 = vld [vmem:[#allocation2 + $0x120] sm:$0xff]  ;;  %v81_v33 = vld [vmem:[#allocation2 + $0x130] sm:$0xff] }
  0x99   :  { %541 = vmatprep.mubr.bf16.mxu0 %v186_v61  ;;  %701 = vmatprep.mubr.bf16.mxu1 %v218_v8  ;;  %v75_v61 = vld [vmem:[#allocation2 + $0x100] sm:$0xff]  ;;  %v77_v8 = vld [vmem:[#allocation2 + $0x110] sm:$0xff]  ;;  %v189_v58 = vpack.c.bf16 %v81_v33, %v79_v22 }
  0x9a   :  { %v187_v32 = vpack.c.bf16 %v77_v8, %v75_v61  ;;  %v143_v23 = vld [vmem:[#allocation2 + $0x320] sm:$0xff]  ;;  %v145_v25 = vld [vmem:[#allocation2 + $0x330] sm:$0xff]  ;;  %v226_v8 = vpack.c.bf16 %v154_v34, %v152_v24  ;;  %v160_v24 = vld [vmem:[#allocation2 + $0x3a8] sm:$0xff] }
  0x9b   :  { %v221_v60 = vpack.c.bf16 %v145_v25, %v143_v23  ;;  %v87_v22 = vld [vmem:[#allocation2 + $0x160] sm:$0xff]  ;;  %v89_v33 = vld [vmem:[#allocation2 + $0x170] sm:$0xff]  ;;  %v156_v23 = vld [vmem:[#allocation2 + $0x388] sm:$0xff] }
  0x9c   :  { %v158_v25 = vld [vmem:[#allocation2 + $0x398] sm:$0xff] }
  0x9d   :  { %v162_v34 = vld [vmem:[#allocation2 + $0x3b8] sm:$0xff] }
  0xa0   :  { %542 = vmatmul.mubr.bf16.gmra.mrb[28].mxu0 %v185_v35  ;;  %702 = vmatmul.mubr.bf16.gmra.mrb[28].mxu1 %v217_v37  ;;  %v84_v35 = vld [vmem:[#allocation2 + $0x148] sm:$0xff]  ;;  %v86_v37 = vld [vmem:[#allocation2 + $0x158] sm:$0xff] }
  0xa1   :  { %551 = vmatprep.mubr.bf16.mxu0 %v188_v6  ;;  %711 = vmatprep.mubr.bf16.mxu1 %v220_v7  ;;  %v148_v6 = vld [vmem:[#allocation2 + $0x348] sm:$0xff]  ;;  %v150_v7 = vld [vmem:[#allocation2 + $0x358] sm:$0xff]  ;;  %v192_v48 = vpack.c.bf16 %v86_v37, %v84_v35  ;;  %v193_v35 = vpack.c.bf16 %v89_v33, %v87_v22  ;;  %v95_v22 = vld [vmem:[#allocation2 + $0x1a0] sm:$0xff] }
  0xa2   :  { %v224_v46 = vpack.c.bf16 %v150_v7, %v148_v6  ;;  %v228_v7 = vpack.c.bf16 %v158_v25, %v156_v23  ;;  %v97_v33 = vld [vmem:[#allocation2 + $0x1b0] sm:$0xff]  ;;  %v164_v23 = vld [vmem:[#allocation2 + $0x3c8] sm:$0xff]  ;;  %v166_v25 = vld [vmem:[#allocation2 + $0x3d8] sm:$0xff] }
  0xa8   :  { %552 = vmatmul.mubr.bf16.gmra.mrb[32].mxu0 %v187_v32  ;;  %712 = vmatmul.mubr.bf16.gmra.mrb[32].mxu1 %v219_v30  ;;  %v147_v30 = vld [vmem:[#allocation2 + $0x340] sm:$0xff]  ;;  %v149_v32 = vld [vmem:[#allocation2 + $0x350] sm:$0xff] }
  0xa9   :  { %561 = vmatprep.mubr.bf16.mxu0 %v190_v59  ;;  %721 = vmatprep.mubr.bf16.mxu1 %v222_v9  ;;  %v90_v59 = vld [vmem:[#allocation2 + $0x178] sm:$0xff]  ;;  %v223_v9 = vpack.c.bf16 %v149_v32, %v147_v30  ;;  %v155_v30 = vld [vmem:[#allocation2 + $0x380] sm:$0xff]  ;;  %v157_v32 = vld [vmem:[#allocation2 + $0x390] sm:$0xff] }
  0xaa   :  { %v194_v61 = vpack.c.bf16 %v90_v59, %v88_v49  ;;  %v96_v49 = vld [vmem:[#allocation2 + $0x1a8] sm:$0xff]  ;;  %v98_v59 = vld [vmem:[#allocation2 + $0x1b8] sm:$0xff] }
  0xb0   :  { %562 = vmatmul.mubr.bf16.gmra.mrb[36].mxu0 %v189_v58  ;;  %722 = vmatmul.mubr.bf16.gmra.mrb[36].mxu1 %v221_v60  ;;  %v151_v58 = vld [vmem:[#allocation2 + $0x360] sm:$0xff]  ;;  %v153_v60 = vld [vmem:[#allocation2 + $0x370] sm:$0xff] }
  0xb1   :  { %571 = vmatprep.mubr.bf16.mxu0 %v192_v48  ;;  %731 = vmatprep.mubr.bf16.mxu1 %v224_v46  ;;  %v92_v48 = vld [vmem:[#allocation2 + $0x188] sm:$0xff]  ;;  %v94_v46 = vld [vmem:[#allocation2 + $0x198] sm:$0xff]  ;;  %v225_v37 = vpack.c.bf16 %v153_v60, %v151_v58  ;;  %v159_v58 = vld [vmem:[#allocation2 + $0x3a0] sm:$0xff] }
  0xb2   :  { %v196_v6 = vpack.c.bf16 %v94_v46, %v92_v48  ;;  %v161_v60 = vld [vmem:[#allocation2 + $0x3b0] sm:$0xff]  ;;  %v100_v48 = vld [vmem:[#allocation2 + $0x1c8] sm:$0xff]  ;;  %v102_v46 = vld [vmem:[#allocation2 + $0x1d8] sm:$0xff] }
  0xb8   :  { %572 = vmatmul.mubr.bf16.gmra.mrb[40].mxu0 %v191_v36  ;;  %732 = vmatmul.mubr.bf16.gmra.mrb[40].mxu1 %v223_v9  ;;  %v195_v36 = vpack.c.bf16 %v93_v47, %v91_v31  ;;  %v227_v9 = vpack.c.bf16 %v157_v32, %v155_v30  ;;  %v99_v31 = vld [vmem:[#allocation2 + $0x1c0] sm:$0xff]  ;;  %v101_v47 = vld [vmem:[#allocation2 + $0x1d0] sm:$0xff] }
  0xb9   :  { %581 = vmatprep.mubr.bf16.mxu0 %v194_v61  ;;  %741 = vmatprep.mubr.bf16.mxu1 %v226_v8  ;;  %v198_v61 = vpack.c.bf16 %v98_v59, %v96_v49  ;;  %v230_v8 = vpack.c.bf16 %v162_v34, %v160_v24  ;;  %v163_v30 = vld [vmem:[#allocation2 + $0x3c0] sm:$0xff]  ;;  %v165_v32 = vld [vmem:[#allocation2 + $0x3d0] sm:$0xff]  ;;  %v104_v49 = vld [vmem:[#allocation2 + $0x1e8] sm:$0xff] }
  0xba   :  { %v106_v59 = vld [vmem:[#allocation2 + $0x1f8] sm:$0xff]  ;;  %v168_v24 = vld [vmem:[#allocation2 + $0x3e8] sm:$0xff] }
  0xbb   :  { %v170_v34 = vld [vmem:[#allocation2 + $0x3f8] sm:$0xff] }
  0xc0   :  { %582 = vmatmul.mubr.bf16.gmra.mrb[44].mxu0 %v193_v35  ;;  %742 = vmatmul.mubr.bf16.gmra.mrb[44].mxu1 %v225_v37  ;;  %v197_v35 = vpack.c.bf16 %v97_v33, %v95_v22  ;;  %v229_v37 = vpack.c.bf16 %v161_v60, %v159_v58  ;;  %v103_v22 = vld [vmem:[#allocation2 + $0x1e0] sm:$0xff]  ;;  %v105_v33 = vld [vmem:[#allocation2 + $0x1f0] sm:$0xff] }
  0xc1   :  { %591 = vmatprep.mubr.bf16.mxu0 %v196_v6  ;;  %751 = vmatprep.mubr.bf16.mxu1 %v228_v7  ;;  %v200_v6 = vpack.c.bf16 %v102_v46, %v100_v48  ;;  %v232_v7 = vpack.c.bf16 %v166_v25, %v164_v23  ;;  %v167_v58 = vld [vmem:[#allocation2 + $0x3e0] sm:$0xff]  ;;  %v169_v60 = vld [vmem:[#allocation2 + $0x3f0] sm:$0xff]  ;;  %v201_v48 = vpack.c.bf16 %v105_v33, %v103_v22  ;;  %v269_v23 = vlaneseq }
  0xc2   :  { %v233_v46 = vpack.c.bf16 %v169_v60, %v167_v58 }
  0xc3   :  { %v270_v25 = vshrl.u32 %v269_v23, 7 }
  0xc8   :  { %592 = vmatmul.mubr.bf16.gmra.mrb[48].mxu0 %v195_v36  ;;  %752 = vmatmul.mubr.bf16.gmra.mrb[48].mxu1 %v227_v9  ;;  %v199_v36 = vpack.c.bf16 %v101_v47, %v99_v31  ;;  %v231_v9 = vpack.c.bf16 %v165_v32, %v163_v30 }
  0xc9   :  { %601 = vmatprep.mubr.bf16.mxu0 %v198_v61  ;;  %761 = vmatprep.mubr.bf16.mxu1 %v230_v8  ;;  %v202_v61 = vpack.c.bf16 %v106_v59, %v104_v49  ;;  %v234_v8 = vpack.c.bf16 %v170_v34, %v168_v24 }
  0xd0   :  { %602 = vmatmul.mubr.bf16.gmra.mrb[52].mxu0 %v197_v35  ;;  %762 = vmatmul.mubr.bf16.gmra.mrb[52].mxu1 %v229_v37  ;;  %v271_v35 = vsub.s32 0, %v270_v25  ;;  %v267_v37 = vld [vmem:[%s1974_s2] sm:$0x3]  ;;  %s1526_s2 = smov [#allocation7]  }
  0xd1   :  { %611 = vmatprep.mubr.bf16.mxu0 %v200_v6  ;;  %771 = vmatprep.mubr.bf16.mxu1 %v232_v7  ;;  %v275_v6 = vsub.s32 1, %v270_v25  ;;  %s1314_s13 = sshll.u32 %s1526_s2, 4  ;;  %s1315_s13 = int_to_ptr.vmem [resolvable:$true] %s1314_s13 }
  0xd2   :  { %v1763_v7 = vrot.slane %v267_v37, %v271_v35  ;;  %s1492_s14 = scalar_lea.vmem %s1315_s13, 16384  ;;  %p1497_p3 = scmp.lt.s32.totalorder %s1315_s13, %s1315_s13 }
  0xd3   :  { %v1765_v31 = vrot.slane %v267_v37, %v275_v6  ;;  %p1493_p2 = scmp.ne.s32.totalorder %s1315_s13, %s1492_s14  ;;  %p1498_p4 = scmp.lt.s32.totalorder %s1492_s14, %s1492_s14 }
  0xd5   :  { %p1499_p5 = por %p1498_p4, %p1497_p3 }
  0xd7   :  { %p1500_p6 = pnand %p1499_p5, %p1493_p2 }
  0xd8   :  { %612 = vmatmul.mubr.bf16.gmra.mrb[56].mxu0 %v199_v36  ;;  %772 = vmatmul.mubr.bf16.gmra.mrb[56].mxu1 %v231_v9 }
  0xd9   :  { %621 = vmatprep.mubr.bf16.mxu0 %v202_v61  ;;  %781 = vmatprep.mubr.bf16.mxu1 %v234_v8 }
  0xe0   :  { %622 = vmatmul.mubr.bf16.gmra.mrb[60].mxu0 %v201_v48  ;;  %782 = vmatmul.mubr.bf16.gmra.mrb[60].mxu1 %v233_v46 }
 0x13b   :  { %v473_v47 = vpop.f32.mrb[0].mxu0  ;;  %v633_v30 = vpop.f32.mrb[0].mxu1 }
 0x13c   :  { %v474_v32 = vadd.f32 %v473_v47, %v1763_v7  ;;  %v634_v49 = vadd.f32 %v633_v30, %v1763_v7  ;;  %v475_v59 = vpop.f32.mrb[1].mxu0  ;;  %v635_v24 = vpop.f32.mrb[1].mxu1 }
 0x13d   :  { %v476_v34 = vadd.f32 %v475_v59, %v1765_v31  ;;  %v636_v36 = vadd.f32 %v635_v24, %v1765_v31  ;;  %v477_v9 = vpop.f32.mrb[2].mxu0  ;;  %v637_v61 = vpop.f32.mrb[2].mxu1 }
 0x13e   :  { %v792_v8 = vmax.f32 %v474_v32, 0.0  ;;  %v856_v22 = vmax.f32 %v634_v49, 0.0  ;;  %v478_v33 = vadd.f32 %v477_v9, %v1763_v7  ;;  %v638_v58 = vadd.f32 %v637_v61, %v1763_v7  ;;  %v479_v60 = vpop.f32.mrb[3].mxu0  ;;  %v639_v48 = vpop.f32.mrb[3].mxu1 }
 0x13f   :  { %v793_v46 = vmax.f32 %v476_v34, 0.0  ;;  %v857_v23 = vmax.f32 %v636_v36, 0.0  ;;  %v480_v25 = vadd.f32 %v479_v60, %v1765_v31  ;;  %v640_v35 = vadd.f32 %v639_v48, %v1765_v31 }
 0x140   :  { %v1053_v37 = vadd.f32 %v792_v8, %v1586_v38  ;;  %v1117_v6 = vadd.f32 %v856_v22, %v1590_v40  ;;  %v794_v47 = vmax.f32 %v478_v33, 0.0  ;;  %v858_v30 = vmax.f32 %v638_v58, 0.0 }
 0x141   :  { %v1054_v32 = vadd.f32 %v793_v46, %v1574_v13  ;;  %v1118_v49 = vadd.f32 %v857_v23, %v1580_v16  ;;  %v795_v59 = vmax.f32 %v480_v25, 0.0  ;;  %v859_v24 = vmax.f32 %v640_v35, 0.0 }
 0x142   :  { %1181 = vst [vmem:[#allocation7] sm:$0xff] %v1053_v37  ;;  %1245 = vst [vmem:[#allocation7 + $0x200] sm:$0xff] %v1117_v6  ;;  %v1055_v34 = vadd.f32 %v794_v47, %v1588_v39  ;;  %v1119_v36 = vadd.f32 %v858_v30, %v1592_v41 }
 0x143   :  { %1182 = vst [vmem:[#allocation7 + $0x8] sm:$0xff] %v1054_v32  ;;  %1246 = vst [vmem:[#allocation7 + $0x208] sm:$0xff] %v1118_v49  ;;  %v1056_v38 = vadd.f32 %v795_v59, %v1576_v14  ;;  %v1120_v40 = vadd.f32 %v859_v24, %v1582_v17  ;;  %v483_v9 = vpop.f32.mrb[4].mxu0  ;;  %v643_v61 = vpop.f32.mrb[4].mxu1 }
 0x144   :  { %1183 = vst [vmem:[#allocation7 + $0x10] sm:$0xff] %v1055_v34  ;;  %1247 = vst [vmem:[#allocation7 + $0x210] sm:$0xff] %v1119_v36  ;;  %v484_v13 = vadd.f32 %v483_v9, %v1763_v7  ;;  %v644_v16 = vadd.f32 %v643_v61, %v1763_v7  ;;  %v485_v8 = vpop.f32.mrb[5].mxu0  ;;  %v645_v22 = vpop.f32.mrb[5].mxu1 }
 0x145   :  { %1184 = vst [vmem:[#allocation7 + $0x18] sm:$0xff] %v1056_v38  ;;  %1248 = vst [vmem:[#allocation7 + $0x218] sm:$0xff] %v1120_v40  ;;  %v486_v39 = vadd.f32 %v485_v8, %v1765_v31  ;;  %v646_v41 = vadd.f32 %v645_v22, %v1765_v31  ;;  %v487_v33 = vpop.f32.mrb[6].mxu0  ;;  %v647_v14 = vpop.f32.mrb[6].mxu1 }
 0x146   :  { %v796_v58 = vmax.f32 %v484_v13, 0.0  ;;  %v860_v17 = vmax.f32 %v644_v16, 0.0  ;;  %v488_v60 = vadd.f32 %v487_v33, %v1763_v7  ;;  %v648_v48 = vadd.f32 %v647_v14, %v1763_v7  ;;  %v489_v46 = vpop.f32.mrb[7].mxu0  ;;  %v649_v23 = vpop.f32.mrb[7].mxu1 }
 0x147   :  { %v797_v25 = vmax.f32 %v486_v39, 0.0  ;;  %v861_v35 = vmax.f32 %v646_v41, 0.0  ;;  %v490_v37 = vadd.f32 %v489_v46, %v1765_v31  ;;  %v650_v6 = vadd.f32 %v649_v23, %v1765_v31 }
 0x148   :  { %v1057_v47 = vadd.f32 %v796_v58, %v1610_v50  ;;  %v1121_v30 = vadd.f32 %v860_v17, %v1614_v52  ;;  %v798_v32 = vmax.f32 %v488_v60, 0.0  ;;  %v862_v49 = vmax.f32 %v648_v48, 0.0 }
 0x149   :  { %v1058_v59 = vadd.f32 %v797_v25, %v1594_v42  ;;  %v1122_v24 = vadd.f32 %v861_v35, %v1598_v44  ;;  %v799_v34 = vmax.f32 %v490_v37, 0.0  ;;  %v863_v36 = vmax.f32 %v650_v6, 0.0 }
 0x14a   :  { %1185 = vst [vmem:[#allocation7 + $0x20] sm:$0xff] %v1057_v47  ;;  %1249 = vst [vmem:[#allocation7 + $0x220] sm:$0xff] %v1121_v30  ;;  %v1059_v38 = vadd.f32 %v798_v32, %v1612_v51  ;;  %v1123_v40 = vadd.f32 %v862_v49, %v1616_v53 }
 0x14b   :  { %1186 = vst [vmem:[#allocation7 + $0x28] sm:$0xff] %v1058_v59  ;;  %1250 = vst [vmem:[#allocation7 + $0x228] sm:$0xff] %v1122_v24  ;;  %v1060_v50 = vadd.f32 %v799_v34, %v1596_v43  ;;  %v1124_v52 = vadd.f32 %v863_v36, %v1600_v45  ;;  %v493_v9 = vpop.f32.mrb[8].mxu0  ;;  %v653_v61 = vpop.f32.mrb[8].mxu1 }
 0x14c   :  { %1187 = vst [vmem:[#allocation7 + $0x30] sm:$0xff] %v1059_v38  ;;  %1251 = vst [vmem:[#allocation7 + $0x230] sm:$0xff] %v1123_v40  ;;  %v494_v42 = vadd.f32 %v493_v9, %v1763_v7  ;;  %v654_v44 = vadd.f32 %v653_v61, %v1763_v7  ;;  %v495_v13 = vpop.f32.mrb[9].mxu0  ;;  %v655_v16 = vpop.f32.mrb[9].mxu1 }
 0x14d   :  { %1188 = vst [vmem:[#allocation7 + $0x38] sm:$0xff] %v1060_v50  ;;  %1252 = vst [vmem:[#allocation7 + $0x238] sm:$0xff] %v1124_v52  ;;  %v496_v51 = vadd.f32 %v495_v13, %v1765_v31  ;;  %v656_v53 = vadd.f32 %v655_v16, %v1765_v31  ;;  %v497_v8 = vpop.f32.mrb[10].mxu0  ;;  %v657_v43 = vpop.f32.mrb[10].mxu1 }
 0x14e   :  { %v800_v22 = vmax.f32 %v494_v42, 0.0  ;;  %v864_v45 = vmax.f32 %v654_v44, 0.0  ;;  %v498_v39 = vadd.f32 %v497_v8, %v1763_v7  ;;  %v658_v41 = vadd.f32 %v657_v43, %v1763_v7  ;;  %v499_v33 = vpop.f32.mrb[11].mxu0  ;;  %v659_v14 = vpop.f32.mrb[11].mxu1 }
 0x14f   :  { %v801_v58 = vmax.f32 %v496_v51, 0.0  ;;  %v865_v17 = vmax.f32 %v656_v53, 0.0  ;;  %v500_v60 = vadd.f32 %v499_v33, %v1765_v31  ;;  %v660_v48 = vadd.f32 %v659_v14, %v1765_v31 }
 0x150   :  { %v1061_v46 = vadd.f32 %v800_v22, %v1634_v62  ;;  %v1125_v23 = vadd.f32 %v864_v45, %v1638_v0  ;;  %v802_v25 = vmax.f32 %v498_v39, 0.0  ;;  %v866_v35 = vmax.f32 %v658_v41, 0.0 }
 0x151   :  { %v1062_v37 = vadd.f32 %v801_v58, %v1618_v54  ;;  %v1126_v6 = vadd.f32 %v865_v17, %v1622_v56  ;;  %v803_v47 = vmax.f32 %v500_v60, 0.0  ;;  %v867_v30 = vmax.f32 %v660_v48, 0.0 }
 0x152   :  { %1189 = vst [vmem:[#allocation7 + $0x40] sm:$0xff] %v1061_v46  ;;  %1253 = vst [vmem:[#allocation7 + $0x240] sm:$0xff] %v1125_v23  ;;  %v1063_v32 = vadd.f32 %v802_v25, %v1636_v63  ;;  %v1127_v49 = vadd.f32 %v866_v35, %v1640_v1 }
 0x153   :  { %1190 = vst [vmem:[#allocation7 + $0x48] sm:$0xff] %v1062_v37  ;;  %1254 = vst [vmem:[#allocation7 + $0x248] sm:$0xff] %v1126_v6  ;;  %v1064_v62 = vadd.f32 %v803_v47, %v1620_v55  ;;  %v1128_v0 = vadd.f32 %v867_v30, %v1624_v57  ;;  %v503_v59 = vpop.f32.mrb[12].mxu0  ;;  %v663_v24 = vpop.f32.mrb[12].mxu1 }
 0x154   :  { %1191 = vst [vmem:[#allocation7 + $0x50] sm:$0xff] %v1063_v32  ;;  %1255 = vst [vmem:[#allocation7 + $0x250] sm:$0xff] %v1127_v49  ;;  %v504_v54 = vadd.f32 %v503_v59, %v1763_v7  ;;  %v664_v56 = vadd.f32 %v663_v24, %v1763_v7  ;;  %v505_v34 = vpop.f32.mrb[13].mxu0  ;;  %v665_v36 = vpop.f32.mrb[13].mxu1 }
 0x155   :  { %1192 = vst [vmem:[#allocation7 + $0x58] sm:$0xff] %v1064_v62  ;;  %1256 = vst [vmem:[#allocation7 + $0x258] sm:$0xff] %v1128_v0  ;;  %v506_v63 = vadd.f32 %v505_v34, %v1765_v31  ;;  %v666_v1 = vadd.f32 %v665_v36, %v1765_v31  ;;  %v507_v38 = vpop.f32.mrb[14].mxu0  ;;  %v667_v55 = vpop.f32.mrb[14].mxu1 }
 0x156   :  { %v804_v40 = vmax.f32 %v504_v54, 0.0  ;;  %v868_v57 = vmax.f32 %v664_v56, 0.0  ;;  %v508_v50 = vadd.f32 %v507_v38, %v1763_v7  ;;  %v668_v52 = vadd.f32 %v667_v55, %v1763_v7  ;;  %v509_v9 = vpop.f32.mrb[15].mxu0  ;;  %v669_v61 = vpop.f32.mrb[15].mxu1 }
 0x157   :  { %v805_v42 = vmax.f32 %v506_v63, 0.0  ;;  %v869_v44 = vmax.f32 %v666_v1, 0.0  ;;  %v510_v13 = vadd.f32 %v509_v9, %v1765_v31  ;;  %v670_v16 = vadd.f32 %v669_v61, %v1765_v31 }
 0x158   :  { %v1065_v51 = vadd.f32 %v804_v40, %v1658_v10  ;;  %v1129_v53 = vadd.f32 %v868_v57, %v1662_v12  ;;  %v806_v8 = vmax.f32 %v508_v50, 0.0  ;;  %v870_v43 = vmax.f32 %v668_v52, 0.0 }
 0x159   :  { %v1066_v22 = vadd.f32 %v805_v42, %v1642_v2  ;;  %v1130_v45 = vadd.f32 %v869_v44, %v1646_v4  ;;  %v807_v39 = vmax.f32 %v510_v13, 0.0  ;;  %v871_v41 = vmax.f32 %v670_v16, 0.0 }
 0x15a   :  { %1193 = vst [vmem:[#allocation7 + $0x60] sm:$0xff] %v1065_v51  ;;  %1257 = vst [vmem:[#allocation7 + $0x260] sm:$0xff] %v1129_v53  ;;  %v1067_v33 = vadd.f32 %v806_v8, %v1660_v11  ;;  %v1131_v14 = vadd.f32 %v870_v43, %v1664_v15  ;;  %v2020_v8 = vld [vmem:[#allocation15_spill] sm:$0xff] }
 0x15b   :  { %1194 = vst [vmem:[#allocation7 + $0x68] sm:$0xff] %v1066_v22  ;;  %1258 = vst [vmem:[#allocation7 + $0x268] sm:$0xff] %v1130_v45  ;;  %v1068_v10 = vadd.f32 %v807_v39, %v1644_v3  ;;  %v1132_v12 = vadd.f32 %v871_v41, %v1648_v5  ;;  %v513_v58 = vpop.f32.mrb[16].mxu0  ;;  %v673_v17 = vpop.f32.mrb[16].mxu1  ;;  %v2021_v22 = vld [vmem:[#allocation17_spill] sm:$0xff] }
 0x15c   :  { %1195 = vst [vmem:[#allocation7 + $0x70] sm:$0xff] %v1067_v33  ;;  %1259 = vst [vmem:[#allocation7 + $0x270] sm:$0xff] %v1131_v14  ;;  %v514_v2 = vadd.f32 %v513_v58, %v1763_v7  ;;  %v674_v4 = vadd.f32 %v673_v17, %v1763_v7  ;;  %v515_v60 = vpop.f32.mrb[17].mxu0  ;;  %v675_v48 = vpop.f32.mrb[17].mxu1  ;;  %v2022_v33 = vld [vmem:[#allocation11_spill] sm:$0xff] }
 0x15d   :  { %1196 = vst [vmem:[#allocation7 + $0x78] sm:$0xff] %v1068_v10  ;;  %1260 = vst [vmem:[#allocation7 + $0x278] sm:$0xff] %v1132_v12  ;;  %v516_v11 = vadd.f32 %v515_v60, %v1765_v31  ;;  %v676_v15 = vadd.f32 %v675_v48, %v1765_v31  ;;  %v517_v46 = vpop.f32.mrb[18].mxu0  ;;  %v677_v3 = vpop.f32.mrb[18].mxu1  ;;  %v2023_v10 = vld [vmem:[#allocation13_spill] sm:$0xff]  ;;  %v2025_v60 = vld [vmem:[#allocation18_spill] sm:$0xff] }
 0x15e   :  { %v808_v23 = vmax.f32 %v514_v2, 0.0  ;;  %v872_v5 = vmax.f32 %v674_v4, 0.0  ;;  %v518_v25 = vadd.f32 %v517_v46, %v1763_v7  ;;  %v678_v35 = vadd.f32 %v677_v3, %v1763_v7  ;;  %v519_v37 = vpop.f32.mrb[19].mxu0  ;;  %v679_v6 = vpop.f32.mrb[19].mxu1  ;;  %v2024_v2 = vld [vmem:[#allocation16_spill] sm:$0xff]  ;;  %v2027_v46 = vld [vmem:[#allocation14_spill] sm:$0xff] }
 0x15f   :  { %v809_v47 = vmax.f32 %v516_v11, 0.0  ;;  %v873_v30 = vmax.f32 %v676_v15, 0.0  ;;  %v520_v32 = vadd.f32 %v519_v37, %v1765_v31  ;;  %v680_v49 = vadd.f32 %v679_v6, %v1765_v31  ;;  %v2026_v11 = vld [vmem:[#allocation12_spill] sm:$0xff] }
 0x160   :  { %v1069_v62 = vadd.f32 %v808_v23, %v1682_v26  ;;  %v1133_v0 = vadd.f32 %v872_v5, %v1686_v28  ;;  %v810_v59 = vmax.f32 %v518_v25, 0.0  ;;  %v874_v24 = vmax.f32 %v678_v35, 0.0 }
 0x161   :  { %v1070_v54 = vadd.f32 %v809_v47, %v1666_v18  ;;  %v1134_v56 = vadd.f32 %v873_v30, %v1670_v20  ;;  %v811_v34 = vmax.f32 %v520_v32, 0.0  ;;  %v875_v36 = vmax.f32 %v680_v49, 0.0 }
 0x162   :  { %1197 = vst [vmem:[#allocation7 + $0x80] sm:$0xff] %v1069_v62  ;;  %1261 = vst [vmem:[#allocation7 + $0x280] sm:$0xff] %v1133_v0  ;;  %v1071_v63 = vadd.f32 %v810_v59, %v1684_v27  ;;  %v1135_v1 = vadd.f32 %v874_v24, %v1688_v29 }
 0x163   :  { %1198 = vst [vmem:[#allocation7 + $0x88] sm:$0xff] %v1070_v54  ;;  %1262 = vst [vmem:[#allocation7 + $0x288] sm:$0xff] %v1134_v56  ;;  %v1072_v26 = vadd.f32 %v811_v34, %v1668_v19  ;;  %v1136_v28 = vadd.f32 %v875_v36, %v1672_v21  ;;  %v523_v38 = vpop.f32.mrb[20].mxu0  ;;  %v683_v55 = vpop.f32.mrb[20].mxu1 }
 0x164   :  { %1199 = vst [vmem:[#allocation7 + $0x90] sm:$0xff] %v1071_v63  ;;  %1263 = vst [vmem:[#allocation7 + $0x290] sm:$0xff] %v1135_v1  ;;  %v524_v18 = vadd.f32 %v523_v38, %v1763_v7  ;;  %v684_v20 = vadd.f32 %v683_v55, %v1763_v7  ;;  %v525_v40 = vpop.f32.mrb[21].mxu0  ;;  %v685_v57 = vpop.f32.mrb[21].mxu1  ;;  %v2029_v38 = vld [vmem:[#allocation25_spill] sm:$0xff] }
 0x165   :  { %1200 = vst [vmem:[#allocation7 + $0x98] sm:$0xff] %v1072_v26  ;;  %1264 = vst [vmem:[#allocation7 + $0x298] sm:$0xff] %v1136_v28  ;;  %v526_v27 = vadd.f32 %v525_v40, %v1765_v31  ;;  %v686_v29 = vadd.f32 %v685_v57, %v1765_v31  ;;  %v527_v50 = vpop.f32.mrb[22].mxu0  ;;  %v687_v19 = vpop.f32.mrb[22].mxu1  ;;  %v2028_v26 = vld [vmem:[#allocation23_spill] sm:$0xff] }
 0x166   :  { %v812_v52 = vmax.f32 %v524_v18, 0.0  ;;  %v876_v21 = vmax.f32 %v684_v20, 0.0  ;;  %v528_v9 = vadd.f32 %v527_v50, %v1763_v7  ;;  %v688_v61 = vadd.f32 %v687_v19, %v1763_v7  ;;  %v529_v42 = vpop.f32.mrb[23].mxu0  ;;  %v689_v44 = vpop.f32.mrb[23].mxu1  ;;  %v2030_v40 = vld [vmem:[#allocation19_spill] sm:$0xff] }
 0x167   :  { %v813_v13 = vmax.f32 %v526_v27, 0.0  ;;  %v877_v16 = vmax.f32 %v686_v29, 0.0  ;;  %v530_v51 = vadd.f32 %v529_v42, %v1765_v31  ;;  %v690_v53 = vadd.f32 %v689_v44, %v1765_v31  ;;  %v2031_v27 = vld [vmem:[#allocation21_spill] sm:$0xff]  ;;  %v2034_v42 = vld [vmem:[#allocation20_spill] sm:$0xff] }
 0x168   :  { %v1073_v43 = vadd.f32 %v812_v52, %v2020_v8  ;;  %v1137_v45 = vadd.f32 %v876_v21, %v2021_v22  ;;  %v814_v39 = vmax.f32 %v528_v9, 0.0  ;;  %v878_v41 = vmax.f32 %v688_v61, 0.0  ;;  %v2032_v52 = vld [vmem:[#allocation24_spill] sm:$0xff]  ;;  %v2033_v9 = vld [vmem:[#allocation26_spill] sm:$0xff] }
 0x169   :  { %v1074_v14 = vadd.f32 %v813_v13, %v2022_v33  ;;  %v1138_v12 = vadd.f32 %v877_v16, %v2023_v10  ;;  %v815_v58 = vmax.f32 %v530_v51, 0.0  ;;  %v879_v17 = vmax.f32 %v690_v53, 0.0  ;;  %v2035_v13 = vld [vmem:[#allocation22_spill] sm:$0xff] }
 0x16a   :  { %1201 = vst [vmem:[#allocation7 + $0xa0] sm:$0xff] %v1073_v43  ;;  %1265 = vst [vmem:[#allocation7 + $0x2a0] sm:$0xff] %v1137_v45  ;;  %v1075_v4 = vadd.f32 %v814_v39, %v2024_v2  ;;  %v1139_v48 = vadd.f32 %v878_v41, %v2025_v60 }
 0x16b   :  { %1202 = vst [vmem:[#allocation7 + $0xa8] sm:$0xff] %v1074_v14  ;;  %1266 = vst [vmem:[#allocation7 + $0x2a8] sm:$0xff] %v1138_v12  ;;  %v1076_v15 = vadd.f32 %v815_v58, %v2026_v11  ;;  %v1140_v3 = vadd.f32 %v879_v17, %v2027_v46  ;;  %v533_v23 = vpop.f32.mrb[24].mxu0  ;;  %v693_v5 = vpop.f32.mrb[24].mxu1  ;;  %v2036_v46 = vld [vmem:[#allocation29_spill] sm:$0xff] }
 0x16c   :  { %1203 = vst [vmem:[#allocation7 + $0xb0] sm:$0xff] %v1075_v4  ;;  %1267 = vst [vmem:[#allocation7 + $0x2b0] sm:$0xff] %v1139_v48  ;;  %v534_v25 = vadd.f32 %v533_v23, %v1763_v7  ;;  %v694_v35 = vadd.f32 %v693_v5, %v1763_v7  ;;  %v535_v37 = vpop.f32.mrb[25].mxu0  ;;  %v695_v6 = vpop.f32.mrb[25].mxu1  ;;  %v2037_v23 = vld [vmem:[#allocation31_spill] sm:$0xff] }
 0x16d   :  { %1204 = vst [vmem:[#allocation7 + $0xb8] sm:$0xff] %v1076_v15  ;;  %1268 = vst [vmem:[#allocation7 + $0x2b8] sm:$0xff] %v1140_v3  ;;  %v536_v47 = vadd.f32 %v535_v37, %v1765_v31  ;;  %v696_v30 = vadd.f32 %v695_v6, %v1765_v31  ;;  %v537_v32 = vpop.f32.mrb[26].mxu0  ;;  %v697_v49 = vpop.f32.mrb[26].mxu1  ;;  %v956_v37 = vld [vmem:[#allocation2 + $0xf8] sm:$0xff] }
 0x16e   :  { %v816_v62 = vmax.f32 %v534_v25, 0.0  ;;  %v880_v0 = vmax.f32 %v694_v35, 0.0  ;;  %v538_v59 = vadd.f32 %v537_v32, %v1763_v7  ;;  %v698_v24 = vadd.f32 %v697_v49, %v1763_v7  ;;  %v539_v54 = vpop.f32.mrb[27].mxu0  ;;  %v699_v56 = vpop.f32.mrb[27].mxu1  ;;  %v1020_v6 = vld [vmem:[#allocation2 + $0x2f8] sm:$0xff]  ;;  %v2039_v32 = vld [vmem:[#allocation28_spill] sm:$0xff] }
 0x16f   :  { %v817_v34 = vmax.f32 %v536_v47, 0.0  ;;  %v881_v36 = vmax.f32 %v696_v30, 0.0  ;;  %v540_v63 = vadd.f32 %v539_v54, %v1765_v31  ;;  %v700_v1 = vadd.f32 %v699_v56, %v1765_v31  ;;  %v2038_v47 = vld [vmem:[#allocation27_spill] sm:$0xff]  ;;  %v2041_v54 = vld [vmem:[#allocation32_spill] sm:$0xff] }
 0x170   :  { %v1077_v28 = vadd.f32 %v816_v62, %v2028_v26  ;;  %v1141_v55 = vadd.f32 %v880_v0, %v2029_v38  ;;  %v818_v18 = vmax.f32 %v538_v59, 0.0  ;;  %v882_v20 = vmax.f32 %v698_v24, 0.0  ;;  %v2040_v59 = vld [vmem:[#allocation30_spill] sm:$0xff] }
 0x171   :  { %v1078_v57 = vadd.f32 %v817_v34, %v2030_v40  ;;  %v1142_v29 = vadd.f32 %v881_v36, %v2031_v27  ;;  %v819_v50 = vmax.f32 %v540_v63, 0.0  ;;  %v883_v19 = vmax.f32 %v700_v1, 0.0 }
 0x172   :  { %1205 = vst [vmem:[#allocation7 + $0xc0] sm:$0xff] %v1077_v28  ;;  %1269 = vst [vmem:[#allocation7 + $0x2c0] sm:$0xff] %v1141_v55  ;;  %v1079_v21 = vadd.f32 %v818_v18, %v2032_v52  ;;  %v1143_v61 = vadd.f32 %v882_v20, %v2033_v9  ;;  %v957_v18 = vld [vmem:[#allocation2 + $0x100] sm:$0xff]  ;;  %v958_v52 = vld [vmem:[#allocation2 + $0x108] sm:$0xff] }
 0x173   :  { %1206 = vst [vmem:[#allocation7 + $0xc8] sm:$0xff] %v1078_v57  ;;  %1270 = vst [vmem:[#allocation7 + $0x2c8] sm:$0xff] %v1142_v29  ;;  %v1080_v44 = vadd.f32 %v819_v50, %v2034_v42  ;;  %v1144_v16 = vadd.f32 %v883_v19, %v2035_v13  ;;  %v543_v51 = vpop.f32.mrb[28].mxu0  ;;  %v703_v53 = vpop.f32.mrb[28].mxu1  ;;  %v1021_v20 = vld [vmem:[#allocation2 + $0x300] sm:$0xff] }
 0x174   :  { %1207 = vst [vmem:[#allocation7 + $0xd0] sm:$0xff] %v1079_v21  ;;  %1271 = vst [vmem:[#allocation7 + $0x2d0] sm:$0xff] %v1143_v61  ;;  %v544_v8 = vadd.f32 %v543_v51, %v1763_v7  ;;  %v704_v43 = vadd.f32 %v703_v53, %v1763_v7  ;;  %v545_v22 = vpop.f32.mrb[29].mxu0  ;;  %v705_v45 = vpop.f32.mrb[29].mxu1  ;;  %v1022_v21 = vld [vmem:[#allocation2 + $0x308] sm:$0xff]  ;;  %v959_v51 = vld [vmem:[#allocation2 + $0x110] sm:$0xff] }
 0x175   :  { %1208 = vst [vmem:[#allocation7 + $0xd8] sm:$0xff] %v1080_v44  ;;  %1272 = vst [vmem:[#allocation7 + $0x2d8] sm:$0xff] %v1144_v16  ;;  %v546_v39 = vadd.f32 %v545_v22, %v1765_v31  ;;  %v706_v41 = vadd.f32 %v705_v45, %v1765_v31  ;;  %v547_v33 = vpop.f32.mrb[30].mxu0  ;;  %v707_v14 = vpop.f32.mrb[30].mxu1  ;;  %v1023_v53 = vld [vmem:[#allocation2 + $0x310] sm:$0xff] }
 0x176   :  { %v820_v10 = vmax.f32 %v544_v8, 0.0  ;;  %v884_v12 = vmax.f32 %v704_v43, 0.0  ;;  %v548_v58 = vadd.f32 %v547_v33, %v1763_v7  ;;  %v708_v17 = vadd.f32 %v707_v14, %v1763_v7  ;;  %v549_v2 = vpop.f32.mrb[31].mxu0  ;;  %v709_v4 = vpop.f32.mrb[31].mxu1  ;;  %v960_v33 = vld [vmem:[#allocation2 + $0x118] sm:$0xff] }
 0x177   :  { %v821_v60 = vmax.f32 %v546_v39, 0.0  ;;  %v885_v48 = vmax.f32 %v706_v41, 0.0  ;;  %v550_v11 = vadd.f32 %v549_v2, %v1765_v31  ;;  %v710_v15 = vadd.f32 %v709_v4, %v1765_v31  ;;  %v1024_v14 = vld [vmem:[#allocation2 + $0x318] sm:$0xff] }
 0x178   :  { %v1081_v3 = vadd.f32 %v820_v10, %v2036_v46  ;;  %v1145_v5 = vadd.f32 %v884_v12, %v2037_v23  ;;  %v822_v25 = vmax.f32 %v548_v58, 0.0  ;;  %v886_v35 = vmax.f32 %v708_v17, 0.0 }
 0x179   :  { %v1082_v30 = vadd.f32 %v821_v60, %v2038_v47  ;;  %v1146_v49 = vadd.f32 %v885_v48, %v2039_v32  ;;  %v823_v62 = vmax.f32 %v550_v11, 0.0  ;;  %v887_v0 = vmax.f32 %v710_v15, 0.0 }
 0x17a   :  { %1209 = vst [vmem:[#allocation7 + $0xe0] sm:$0xff] %v1081_v3  ;;  %1273 = vst [vmem:[#allocation7 + $0x2e0] sm:$0xff] %v1145_v5  ;;  %v1083_v24 = vadd.f32 %v822_v25, %v2040_v59  ;;  %v1147_v56 = vadd.f32 %v886_v35, %v2041_v54  ;;  %v961_v25 = vld [vmem:[#allocation2 + $0x120] sm:$0xff] }
 0x17b   :  { %1210 = vst [vmem:[#allocation7 + $0xe8] sm:$0xff] %v1082_v30  ;;  %1274 = vst [vmem:[#allocation7 + $0x2e8] sm:$0xff] %v1146_v49  ;;  %v1084_v34 = vadd.f32 %v956_v37, %v823_v62  ;;  %v1148_v36 = vadd.f32 %v1020_v6, %v887_v0  ;;  %v553_v63 = vpop.f32.mrb[32].mxu0  ;;  %v713_v1 = vpop.f32.mrb[32].mxu1  ;;  %v1025_v35 = vld [vmem:[#allocation2 + $0x320] sm:$0xff]  ;;  %v962_v62 = vld [vmem:[#allocation2 + $0x128] sm:$0xff] }
 0x17c   :  { %1211 = vst [vmem:[#allocation7 + $0xf0] sm:$0xff] %v1083_v24  ;;  %1275 = vst [vmem:[#allocation7 + $0x2f0] sm:$0xff] %v1147_v56  ;;  %v554_v26 = vadd.f32 %v553_v63, %v1763_v7  ;;  %v714_v28 = vadd.f32 %v713_v1, %v1763_v7  ;;  %v555_v38 = vpop.f32.mrb[33].mxu0  ;;  %v715_v55 = vpop.f32.mrb[33].mxu1  ;;  %v1026_v0 = vld [vmem:[#allocation2 + $0x328] sm:$0xff]  ;;  %v963_v63 = vld [vmem:[#allocation2 + $0x130] sm:$0xff] }
 0x17d   :  { %1212 = vst [vmem:[#allocation7 + $0xf8] sm:$0xff] %v1084_v34  ;;  %1276 = vst [vmem:[#allocation7 + $0x2f8] sm:$0xff] %v1148_v36  ;;  %v556_v40 = vadd.f32 %v555_v38, %v1765_v31  ;;  %v716_v57 = vadd.f32 %v715_v55, %v1765_v31  ;;  %v557_v27 = vpop.f32.mrb[34].mxu0  ;;  %v717_v29 = vpop.f32.mrb[34].mxu1  ;;  %v1027_v1 = vld [vmem:[#allocation2 + $0x330] sm:$0xff] }
 0x17e   :  { %v824_v50 = vmax.f32 %v554_v26, 0.0  ;;  %v888_v19 = vmax.f32 %v714_v28, 0.0  ;;  %v558_v9 = vadd.f32 %v557_v27, %v1763_v7  ;;  %v718_v61 = vadd.f32 %v717_v29, %v1763_v7  ;;  %v559_v42 = vpop.f32.mrb[35].mxu0  ;;  %v719_v44 = vpop.f32.mrb[35].mxu1 }
 0x17f   :  { %v825_v13 = vmax.f32 %v556_v40, 0.0  ;;  %v889_v16 = vmax.f32 %v716_v57, 0.0  ;;  %v560_v8 = vadd.f32 %v559_v42, %v1765_v31  ;;  %v720_v43 = vadd.f32 %v719_v44, %v1765_v31  ;;  %v964_v40 = vld [vmem:[#allocation2 + $0x138] sm:$0xff] }
 0x180   :  { %v1085_v22 = vadd.f32 %v957_v18, %v824_v50  ;;  %v1149_v45 = vadd.f32 %v1021_v20, %v888_v19  ;;  %v826_v39 = vmax.f32 %v558_v9, 0.0  ;;  %v890_v41 = vmax.f32 %v718_v61, 0.0  ;;  %v1028_v57 = vld [vmem:[#allocation2 + $0x338] sm:$0xff] }
 0x181   :  { %v1086_v10 = vadd.f32 %v958_v52, %v825_v13  ;;  %v1150_v12 = vadd.f32 %v1022_v21, %v889_v16  ;;  %v827_v58 = vmax.f32 %v560_v8, 0.0  ;;  %v891_v17 = vmax.f32 %v720_v43, 0.0  ;;  %v965_v8 = vld [vmem:[#allocation2 + $0x140] sm:$0xff] }
 0x182   :  { %1213 = vst [vmem:[#allocation7 + $0x100] sm:$0xff] %v1085_v22  ;;  %1277 = vst [vmem:[#allocation7 + $0x300] sm:$0xff] %v1149_v45  ;;  %v1087_v2 = vadd.f32 %v959_v51, %v826_v39  ;;  %v1151_v4 = vadd.f32 %v1023_v53, %v890_v41  ;;  %v1029_v43 = vld [vmem:[#allocation2 + $0x340] sm:$0xff] }
 0x183   :  { %1214 = vst [vmem:[#allocation7 + $0x108] sm:$0xff] %v1086_v10  ;;  %1278 = vst [vmem:[#allocation7 + $0x308] sm:$0xff] %v1150_v12  ;;  %v1088_v60 = vadd.f32 %v960_v33, %v827_v58  ;;  %v1152_v48 = vadd.f32 %v1024_v14, %v891_v17  ;;  %v563_v11 = vpop.f32.mrb[36].mxu0  ;;  %v723_v15 = vpop.f32.mrb[36].mxu1  ;;  %v966_v10 = vld [vmem:[#allocation2 + $0x148] sm:$0xff] }
 0x184   :  { %1215 = vst [vmem:[#allocation7 + $0x110] sm:$0xff] %v1087_v2  ;;  %1279 = vst [vmem:[#allocation7 + $0x310] sm:$0xff] %v1151_v4  ;;  %v564_v46 = vadd.f32 %v563_v11, %v1763_v7  ;;  %v724_v3 = vadd.f32 %v723_v15, %v1763_v7  ;;  %v565_v23 = vpop.f32.mrb[37].mxu0  ;;  %v725_v5 = vpop.f32.mrb[37].mxu1  ;;  %v1030_v12 = vld [vmem:[#allocation2 + $0x348] sm:$0xff]  ;;  %v967_v11 = vld [vmem:[#allocation2 + $0x150] sm:$0xff] }
 0x185   :  { %1216 = vst [vmem:[#allocation7 + $0x118] sm:$0xff] %v1088_v60  ;;  %1280 = vst [vmem:[#allocation7 + $0x318] sm:$0xff] %v1152_v48  ;;  %v566_v37 = vadd.f32 %v565_v23, %v1765_v31  ;;  %v726_v6 = vadd.f32 %v725_v5, %v1765_v31  ;;  %v567_v47 = vpop.f32.mrb[38].mxu0  ;;  %v727_v30 = vpop.f32.mrb[38].mxu1  ;;  %v1031_v15 = vld [vmem:[#allocation2 + $0x350] sm:$0xff] }
 0x186   :  { %v828_v32 = vmax.f32 %v564_v46, 0.0  ;;  %v892_v49 = vmax.f32 %v724_v3, 0.0  ;;  %v568_v59 = vadd.f32 %v567_v47, %v1763_v7  ;;  %v728_v24 = vadd.f32 %v727_v30, %v1763_v7  ;;  %v569_v54 = vpop.f32.mrb[39].mxu0  ;;  %v729_v56 = vpop.f32.mrb[39].mxu1 }
 0x187   :  { %v829_v34 = vmax.f32 %v566_v37, 0.0  ;;  %v893_v36 = vmax.f32 %v726_v6, 0.0  ;;  %v570_v26 = vadd.f32 %v569_v54, %v1765_v31  ;;  %v730_v28 = vadd.f32 %v729_v56, %v1765_v31  ;;  %v968_v37 = vld [vmem:[#allocation2 + $0x158] sm:$0xff] }
 0x188   :  { %v1089_v38 = vadd.f32 %v961_v25, %v828_v32  ;;  %v1153_v55 = vadd.f32 %v1025_v35, %v892_v49  ;;  %v830_v18 = vmax.f32 %v568_v59, 0.0  ;;  %v894_v20 = vmax.f32 %v728_v24, 0.0  ;;  %v1032_v6 = vld [vmem:[#allocation2 + $0x358] sm:$0xff] }
 0x189   :  { %v1090_v27 = vadd.f32 %v962_v62, %v829_v34  ;;  %v1154_v29 = vadd.f32 %v1026_v0, %v893_v36  ;;  %v831_v50 = vmax.f32 %v570_v26, 0.0  ;;  %v895_v19 = vmax.f32 %v730_v28, 0.0  ;;  %v969_v26 = vld [vmem:[#allocation2 + $0x160] sm:$0xff] }
 0x18a   :  { %1217 = vst [vmem:[#allocation7 + $0x120] sm:$0xff] %v1089_v38  ;;  %1281 = vst [vmem:[#allocation7 + $0x320] sm:$0xff] %v1153_v55  ;;  %v1091_v52 = vadd.f32 %v963_v63, %v830_v18  ;;  %v1155_v21 = vadd.f32 %v1027_v1, %v894_v20  ;;  %v1033_v28 = vld [vmem:[#allocation2 + $0x360] sm:$0xff] }
 0x18b   :  { %1218 = vst [vmem:[#allocation7 + $0x128] sm:$0xff] %v1090_v27  ;;  %1282 = vst [vmem:[#allocation7 + $0x328] sm:$0xff] %v1154_v29  ;;  %v1092_v9 = vadd.f32 %v964_v40, %v831_v50  ;;  %v1156_v61 = vadd.f32 %v1028_v57, %v895_v19  ;;  %v573_v42 = vpop.f32.mrb[40].mxu0  ;;  %v733_v44 = vpop.f32.mrb[40].mxu1  ;;  %v970_v27 = vld [vmem:[#allocation2 + $0x168] sm:$0xff] }
 0x18c   :  { %1219 = vst [vmem:[#allocation7 + $0x130] sm:$0xff] %v1091_v52  ;;  %1283 = vst [vmem:[#allocation7 + $0x330] sm:$0xff] %v1155_v21  ;;  %v574_v13 = vadd.f32 %v573_v42, %v1763_v7  ;;  %v734_v16 = vadd.f32 %v733_v44, %v1763_v7  ;;  %v575_v51 = vpop.f32.mrb[41].mxu0  ;;  %v735_v53 = vpop.f32.mrb[41].mxu1  ;;  %v1034_v29 = vld [vmem:[#allocation2 + $0x368] sm:$0xff]  ;;  %v971_v42 = vld [vmem:[#allocation2 + $0x170] sm:$0xff] }
 0x18d   :  { %1220 = vst [vmem:[#allocation7 + $0x138] sm:$0xff] %v1092_v9  ;;  %1284 = vst [vmem:[#allocation7 + $0x338] sm:$0xff] %v1156_v61  ;;  %v576_v22 = vadd.f32 %v575_v51, %v1765_v31  ;;  %v736_v45 = vadd.f32 %v735_v53, %v1765_v31  ;;  %v577_v39 = vpop.f32.mrb[42].mxu0  ;;  %v737_v41 = vpop.f32.mrb[42].mxu1  ;;  %v1035_v44 = vld [vmem:[#allocation2 + $0x370] sm:$0xff] }
 0x18e   :  { %v832_v33 = vmax.f32 %v574_v13, 0.0  ;;  %v896_v14 = vmax.f32 %v734_v16, 0.0  ;;  %v578_v58 = vadd.f32 %v577_v39, %v1763_v7  ;;  %v738_v17 = vadd.f32 %v737_v41, %v1763_v7  ;;  %v579_v2 = vpop.f32.mrb[43].mxu0  ;;  %v739_v4 = vpop.f32.mrb[43].mxu1 }
 0x18f   :  { %v833_v60 = vmax.f32 %v576_v22, 0.0  ;;  %v897_v48 = vmax.f32 %v736_v45, 0.0  ;;  %v580_v46 = vadd.f32 %v579_v2, %v1765_v31  ;;  %v740_v3 = vadd.f32 %v739_v4, %v1765_v31  ;;  %v972_v22 = vld [vmem:[#allocation2 + $0x178] sm:$0xff] }
 0x190   :  { %v1093_v23 = vadd.f32 %v965_v8, %v832_v33  ;;  %v1157_v5 = vadd.f32 %v1029_v43, %v896_v14  ;;  %v834_v25 = vmax.f32 %v578_v58, 0.0  ;;  %v898_v35 = vmax.f32 %v738_v17, 0.0  ;;  %v1036_v45 = vld [vmem:[#allocation2 + $0x378] sm:$0xff] }
 0x191   :  { %v1094_v47 = vadd.f32 %v966_v10, %v833_v60  ;;  %v1158_v30 = vadd.f32 %v1030_v12, %v897_v48  ;;  %v835_v32 = vmax.f32 %v580_v46, 0.0  ;;  %v899_v49 = vmax.f32 %v740_v3, 0.0  ;;  %v973_v46 = vld [vmem:[#allocation2 + $0x180] sm:$0xff] }
 0x192   :  { %1221 = vst [vmem:[#allocation7 + $0x140] sm:$0xff] %v1093_v23  ;;  %1285 = vst [vmem:[#allocation7 + $0x340] sm:$0xff] %v1157_v5  ;;  %v1095_v62 = vadd.f32 %v967_v11, %v834_v25  ;;  %v1159_v0 = vadd.f32 %v1031_v15, %v898_v35  ;;  %v1037_v3 = vld [vmem:[#allocation2 + $0x380] sm:$0xff] }
 0x193   :  { %1222 = vst [vmem:[#allocation7 + $0x148] sm:$0xff] %v1094_v47  ;;  %1286 = vst [vmem:[#allocation7 + $0x348] sm:$0xff] %v1158_v30  ;;  %v1096_v59 = vadd.f32 %v968_v37, %v835_v32  ;;  %v1160_v24 = vadd.f32 %v1032_v6, %v899_v49  ;;  %v583_v54 = vpop.f32.mrb[44].mxu0  ;;  %v743_v56 = vpop.f32.mrb[44].mxu1  ;;  %v974_v47 = vld [vmem:[#allocation2 + $0x188] sm:$0xff] }
 0x194   :  { %1223 = vst [vmem:[#allocation7 + $0x150] sm:$0xff] %v1095_v62  ;;  %1287 = vst [vmem:[#allocation7 + $0x350] sm:$0xff] %v1159_v0  ;;  %v584_v34 = vadd.f32 %v583_v54, %v1763_v7  ;;  %v744_v36 = vadd.f32 %v743_v56, %v1763_v7  ;;  %v585_v63 = vpop.f32.mrb[45].mxu0  ;;  %v745_v1 = vpop.f32.mrb[45].mxu1  ;;  %v1038_v30 = vld [vmem:[#allocation2 + $0x388] sm:$0xff]  ;;  %v975_v54 = vld [vmem:[#allocation2 + $0x190] sm:$0xff] }
 0x195   :  { %1224 = vst [vmem:[#allocation7 + $0x158] sm:$0xff] %v1096_v59  ;;  %1288 = vst [vmem:[#allocation7 + $0x358] sm:$0xff] %v1160_v24  ;;  %v586_v38 = vadd.f32 %v585_v63, %v1765_v31  ;;  %v746_v55 = vadd.f32 %v745_v1, %v1765_v31  ;;  %v587_v18 = vpop.f32.mrb[46].mxu0  ;;  %v747_v20 = vpop.f32.mrb[46].mxu1  ;;  %v1039_v56 = vld [vmem:[#allocation2 + $0x390] sm:$0xff] }
 0x196   :  { %v836_v40 = vmax.f32 %v584_v34, 0.0  ;;  %v900_v57 = vmax.f32 %v744_v36, 0.0  ;;  %v588_v50 = vadd.f32 %v587_v18, %v1763_v7  ;;  %v748_v19 = vadd.f32 %v747_v20, %v1763_v7  ;;  %v589_v52 = vpop.f32.mrb[47].mxu0  ;;  %v749_v21 = vpop.f32.mrb[47].mxu1 }
 0x197   :  { %v837_v9 = vmax.f32 %v586_v38, 0.0  ;;  %v901_v61 = vmax.f32 %v746_v55, 0.0  ;;  %v590_v13 = vadd.f32 %v589_v52, %v1765_v31  ;;  %v750_v16 = vadd.f32 %v749_v21, %v1765_v31  ;;  %v976_v38 = vld [vmem:[#allocation2 + $0x198] sm:$0xff] }
 0x198   :  { %v1097_v51 = vadd.f32 %v969_v26, %v836_v40  ;;  %v1161_v53 = vadd.f32 %v1033_v28, %v900_v57  ;;  %v838_v8 = vmax.f32 %v588_v50, 0.0  ;;  %v902_v43 = vmax.f32 %v748_v19, 0.0  ;;  %v1040_v55 = vld [vmem:[#allocation2 + $0x398] sm:$0xff] }
 0x199   :  { %v1098_v39 = vadd.f32 %v970_v27, %v837_v9  ;;  %v1162_v41 = vadd.f32 %v1034_v29, %v901_v61  ;;  %v839_v33 = vmax.f32 %v590_v13, 0.0  ;;  %v903_v14 = vmax.f32 %v750_v16, 0.0  ;;  %v977_v13 = vld [vmem:[#allocation2 + $0x1a0] sm:$0xff] }
 0x19a   :  { %1225 = vst [vmem:[#allocation7 + $0x160] sm:$0xff] %v1097_v51  ;;  %1289 = vst [vmem:[#allocation7 + $0x360] sm:$0xff] %v1161_v53  ;;  %v1099_v10 = vadd.f32 %v971_v42, %v838_v8  ;;  %v1163_v12 = vadd.f32 %v1035_v44, %v902_v43  ;;  %v1041_v16 = vld [vmem:[#allocation2 + $0x3a0] sm:$0xff] }
 0x19b   :  { %1226 = vst [vmem:[#allocation7 + $0x168] sm:$0xff] %v1098_v39  ;;  %1290 = vst [vmem:[#allocation7 + $0x368] sm:$0xff] %v1162_v41  ;;  %v1100_v58 = vadd.f32 %v972_v22, %v839_v33  ;;  %v1164_v17 = vadd.f32 %v1036_v45, %v903_v14  ;;  %v593_v2 = vpop.f32.mrb[48].mxu0  ;;  %v753_v4 = vpop.f32.mrb[48].mxu1  ;;  %v978_v39 = vld [vmem:[#allocation2 + $0x1a8] sm:$0xff] }
 0x19c   :  { %1227 = vst [vmem:[#allocation7 + $0x170] sm:$0xff] %v1099_v10  ;;  %1291 = vst [vmem:[#allocation7 + $0x370] sm:$0xff] %v1163_v12  ;;  %v594_v60 = vadd.f32 %v593_v2, %v1763_v7  ;;  %v754_v48 = vadd.f32 %v753_v4, %v1763_v7  ;;  %v595_v11 = vpop.f32.mrb[49].mxu0  ;;  %v755_v15 = vpop.f32.mrb[49].mxu1  ;;  %v1042_v41 = vld [vmem:[#allocation2 + $0x3a8] sm:$0xff]  ;;  %v979_v2 = vld [vmem:[#allocation2 + $0x1b0] sm:$0xff] }
 0x19d   :  { %1228 = vst [vmem:[#allocation7 + $0x178] sm:$0xff] %v1100_v58  ;;  %1292 = vst [vmem:[#allocation7 + $0x378] sm:$0xff] %v1164_v17  ;;  %v596_v23 = vadd.f32 %v595_v11, %v1765_v31  ;;  %v756_v5 = vadd.f32 %v755_v15, %v1765_v31  ;;  %v597_v25 = vpop.f32.mrb[50].mxu0  ;;  %v757_v35 = vpop.f32.mrb[50].mxu1  ;;  %v1043_v4 = vld [vmem:[#allocation2 + $0x3b0] sm:$0xff] }
 0x19e   :  { %v840_v37 = vmax.f32 %v594_v60, 0.0  ;;  %v904_v6 = vmax.f32 %v754_v48, 0.0  ;;  %v598_v32 = vadd.f32 %v597_v25, %v1763_v7  ;;  %v758_v49 = vadd.f32 %v757_v35, %v1763_v7  ;;  %v599_v62 = vpop.f32.mrb[51].mxu0  ;;  %v759_v0 = vpop.f32.mrb[51].mxu1 }
 0x19f   :  { %v841_v59 = vmax.f32 %v596_v23, 0.0  ;;  %v905_v24 = vmax.f32 %v756_v5, 0.0  ;;  %v600_v34 = vadd.f32 %v599_v62, %v1765_v31  ;;  %v760_v36 = vadd.f32 %v759_v0, %v1765_v31  ;;  %v980_v23 = vld [vmem:[#allocation2 + $0x1b8] sm:$0xff] }
 0x1a0   :  { %v1101_v63 = vadd.f32 %v973_v46, %v840_v37  ;;  %v1165_v1 = vadd.f32 %v1037_v3, %v904_v6  ;;  %v842_v26 = vmax.f32 %v598_v32, 0.0  ;;  %v906_v28 = vmax.f32 %v758_v49, 0.0  ;;  %v1044_v5 = vld [vmem:[#allocation2 + $0x3b8] sm:$0xff] }
 0x1a1   :  { %v1102_v18 = vadd.f32 %v974_v47, %v841_v59  ;;  %v1166_v20 = vadd.f32 %v1038_v30, %v905_v24  ;;  %v843_v40 = vmax.f32 %v600_v34, 0.0  ;;  %v907_v57 = vmax.f32 %v760_v36, 0.0  ;;  %v981_v34 = vld [vmem:[#allocation2 + $0x1c0] sm:$0xff] }
 0x1a2   :  { %1229 = vst [vmem:[#allocation7 + $0x180] sm:$0xff] %v1101_v63  ;;  %1293 = vst [vmem:[#allocation7 + $0x380] sm:$0xff] %v1165_v1  ;;  %v1103_v27 = vadd.f32 %v975_v54, %v842_v26  ;;  %v1167_v29 = vadd.f32 %v1039_v56, %v906_v28  ;;  %v1045_v36 = vld [vmem:[#allocation2 + $0x3c0] sm:$0xff] }
 0x1a3   :  { %1230 = vst [vmem:[#allocation7 + $0x188] sm:$0xff] %v1102_v18  ;;  %1294 = vst [vmem:[#allocation7 + $0x388] sm:$0xff] %v1166_v20  ;;  %v1104_v50 = vadd.f32 %v976_v38, %v843_v40  ;;  %v1168_v19 = vadd.f32 %v1040_v55, %v907_v57  ;;  %v603_v52 = vpop.f32.mrb[52].mxu0  ;;  %v763_v21 = vpop.f32.mrb[52].mxu1  ;;  %v982_v18 = vld [vmem:[#allocation2 + $0x1c8] sm:$0xff] }
 0x1a4   :  { %1231 = vst [vmem:[#allocation7 + $0x190] sm:$0xff] %v1103_v27  ;;  %1295 = vst [vmem:[#allocation7 + $0x390] sm:$0xff] %v1167_v29  ;;  %v604_v9 = vadd.f32 %v603_v52, %v1763_v7  ;;  %v764_v61 = vadd.f32 %v763_v21, %v1763_v7  ;;  %v605_v42 = vpop.f32.mrb[53].mxu0  ;;  %v765_v44 = vpop.f32.mrb[53].mxu1  ;;  %v1046_v20 = vld [vmem:[#allocation2 + $0x3c8] sm:$0xff]  ;;  %v983_v52 = vld [vmem:[#allocation2 + $0x1d0] sm:$0xff] }
 0x1a5   :  { %1232 = vst [vmem:[#allocation7 + $0x198] sm:$0xff] %v1104_v50  ;;  %1296 = vst [vmem:[#allocation7 + $0x398] sm:$0xff] %v1168_v19  ;;  %v606_v51 = vadd.f32 %v605_v42, %v1765_v31  ;;  %v766_v53 = vadd.f32 %v765_v44, %v1765_v31  ;;  %v607_v8 = vpop.f32.mrb[54].mxu0  ;;  %v767_v43 = vpop.f32.mrb[54].mxu1  ;;  %v1047_v21 = vld [vmem:[#allocation2 + $0x3d0] sm:$0xff] }
 0x1a6   :  { %v844_v22 = vmax.f32 %v604_v9, 0.0  ;;  %v908_v45 = vmax.f32 %v764_v61, 0.0  ;;  %v608_v33 = vadd.f32 %v607_v8, %v1763_v7  ;;  %v768_v14 = vadd.f32 %v767_v43, %v1763_v7  ;;  %v609_v10 = vpop.f32.mrb[55].mxu0  ;;  %v769_v12 = vpop.f32.mrb[55].mxu1 }
 0x1a7   :  { %v845_v58 = vmax.f32 %v606_v51, 0.0  ;;  %v909_v17 = vmax.f32 %v766_v53, 0.0  ;;  %v610_v60 = vadd.f32 %v609_v10, %v1765_v31  ;;  %v770_v48 = vadd.f32 %v769_v12, %v1765_v31  ;;  %v984_v51 = vld [vmem:[#allocation2 + $0x1d8] sm:$0xff] }
 0x1a8   :  { %v1105_v11 = vadd.f32 %v977_v13, %v844_v22  ;;  %v1169_v15 = vadd.f32 %v1041_v16, %v908_v45  ;;  %v846_v46 = vmax.f32 %v608_v33, 0.0  ;;  %v910_v3 = vmax.f32 %v768_v14, 0.0  ;;  %v1048_v53 = vld [vmem:[#allocation2 + $0x3d8] sm:$0xff] }
 0x1a9   :  { %v1106_v25 = vadd.f32 %v978_v39, %v845_v58  ;;  %v1170_v35 = vadd.f32 %v1042_v41, %v909_v17  ;;  %v847_v37 = vmax.f32 %v610_v60, 0.0  ;;  %v911_v6 = vmax.f32 %v770_v48, 0.0  ;;  %v985_v60 = vld [vmem:[#allocation2 + $0x1e0] sm:$0xff] }
 0x1aa   :  { %1233 = vst [vmem:[#allocation7 + $0x1a0] sm:$0xff] %v1105_v11  ;;  %1297 = vst [vmem:[#allocation7 + $0x3a0] sm:$0xff] %v1169_v15  ;;  %v1107_v47 = vadd.f32 %v979_v2, %v846_v46  ;;  %v1171_v30 = vadd.f32 %v1043_v4, %v910_v3  ;;  %v1049_v48 = vld [vmem:[#allocation2 + $0x3e0] sm:$0xff] }
 0x1ab   :  { %1234 = vst [vmem:[#allocation7 + $0x1a8] sm:$0xff] %v1106_v25  ;;  %1298 = vst [vmem:[#allocation7 + $0x3a8] sm:$0xff] %v1170_v35  ;;  %v1108_v32 = vadd.f32 %v980_v23, %v847_v37  ;;  %v1172_v49 = vadd.f32 %v1044_v5, %v911_v6  ;;  %v613_v62 = vpop.f32.mrb[56].mxu0  ;;  %v773_v0 = vpop.f32.mrb[56].mxu1  ;;  %v986_v25 = vld [vmem:[#allocation2 + $0x1e8] sm:$0xff] }
 0x1ac   :  { %1235 = vst [vmem:[#allocation7 + $0x1b0] sm:$0xff] %v1107_v47  ;;  %1299 = vst [vmem:[#allocation7 + $0x3b0] sm:$0xff] %v1171_v30  ;;  %v614_v59 = vadd.f32 %v613_v62, %v1763_v7  ;;  %v774_v24 = vadd.f32 %v773_v0, %v1763_v7  ;;  %v615_v54 = vpop.f32.mrb[57].mxu0  ;;  %v775_v56 = vpop.f32.mrb[57].mxu1  ;;  %v1050_v35 = vld [vmem:[#allocation2 + $0x3e8] sm:$0xff]  ;;  %v987_v62 = vld [vmem:[#allocation2 + $0x1f0] sm:$0xff] }
 0x1ad   :  { %1236 = vst [vmem:[#allocation7 + $0x1b8] sm:$0xff] %v1108_v32  ;;  %1300 = vst [vmem:[#allocation7 + $0x3b8] sm:$0xff] %v1172_v49  ;;  %v616_v63 = vadd.f32 %v615_v54, %v1765_v31  ;;  %v776_v1 = vadd.f32 %v775_v56, %v1765_v31  ;;  %v617_v26 = vpop.f32.mrb[58].mxu0  ;;  %v777_v28 = vpop.f32.mrb[58].mxu1  ;;  %v1051_v0 = vld [vmem:[#allocation2 + $0x3f0] sm:$0xff] }
 0x1ae   :  { %v848_v38 = vmax.f32 %v614_v59, 0.0  ;;  %v912_v55 = vmax.f32 %v774_v24, 0.0  ;;  %v618_v40 = vadd.f32 %v617_v26, %v1763_v7  ;;  %v778_v57 = vadd.f32 %v777_v28, %v1763_v7  ;;  %v619_v27 = vpop.f32.mrb[59].mxu0  ;;  %v779_v29 = vpop.f32.mrb[59].mxu1 }
 0x1af   :  { %v849_v50 = vmax.f32 %v616_v63, 0.0  ;;  %v913_v19 = vmax.f32 %v776_v1, 0.0  ;;  %v620_v9 = vadd.f32 %v619_v27, %v1765_v31  ;;  %v780_v61 = vadd.f32 %v779_v29, %v1765_v31  ;;  %v988_v63 = vld [vmem:[#allocation2 + $0x1f8] sm:$0xff] }
 0x1b0   :  { %v1109_v42 = vadd.f32 %v981_v34, %v848_v38  ;;  %v1173_v44 = vadd.f32 %v1045_v36, %v912_v55  ;;  %v850_v13 = vmax.f32 %v618_v40, 0.0  ;;  %v914_v16 = vmax.f32 %v778_v57, 0.0  ;;  %v1052_v1 = vld [vmem:[#allocation2 + $0x3f8] sm:$0xff] }
 0x1b1   :  { %v1110_v8 = vadd.f32 %v982_v18, %v849_v50  ;;  %v1174_v43 = vadd.f32 %v1046_v20, %v913_v19  ;;  %v851_v22 = vmax.f32 %v620_v9, 0.0  ;;  %v915_v45 = vmax.f32 %v780_v61, 0.0 }
 0x1b2   :  { %1237 = vst [vmem:[#allocation7 + $0x1c0] sm:$0xff] %v1109_v42  ;;  %1301 = vst [vmem:[#allocation7 + $0x3c0] sm:$0xff] %v1173_v44  ;;  %v1111_v39 = vadd.f32 %v983_v52, %v850_v13  ;;  %v1175_v41 = vadd.f32 %v1047_v21, %v914_v16 }
 0x1b3   :  { %1238 = vst [vmem:[#allocation7 + $0x1c8] sm:$0xff] %v1110_v8  ;;  %1302 = vst [vmem:[#allocation7 + $0x3c8] sm:$0xff] %v1174_v43  ;;  %v1112_v33 = vadd.f32 %v984_v51, %v851_v22  ;;  %v1176_v14 = vadd.f32 %v1048_v53, %v915_v45  ;;  %v623_v10 = vpop.f32.mrb[60].mxu0  ;;  %v783_v12 = vpop.f32.mrb[60].mxu1 }
 0x1b4   :  { %1239 = vst [vmem:[#allocation7 + $0x1d0] sm:$0xff] %v1111_v39  ;;  %1303 = vst [vmem:[#allocation7 + $0x3d0] sm:$0xff] %v1175_v41  ;;  %v624_v58 = vadd.f32 %v623_v10, %v1763_v7  ;;  %v784_v17 = vadd.f32 %v783_v12, %v1763_v7  ;;  %v625_v2 = vpop.f32.mrb[61].mxu0  ;;  %v785_v4 = vpop.f32.mrb[61].mxu1 }
 0x1b5   :  { %1240 = vst [vmem:[#allocation7 + $0x1d8] sm:$0xff] %v1112_v33  ;;  %1304 = vst [vmem:[#allocation7 + $0x3d8] sm:$0xff] %v1176_v14  ;;  %v626_v11 = vadd.f32 %v625_v2, %v1765_v31  ;;  %v786_v15 = vadd.f32 %v785_v4, %v1765_v31  ;;  %v627_v46 = vpop.f32.mrb[62].mxu0  ;;  %v787_v3 = vpop.f32.mrb[62].mxu1 }
 0x1b6   :  { %v852_v23 = vmax.f32 %v624_v58, 0.0  ;;  %v916_v5 = vmax.f32 %v784_v17, 0.0  ;;  %v628_v37 = vadd.f32 %v627_v46, %v1763_v7  ;;  %v788_v6 = vadd.f32 %v787_v3, %v1763_v7  ;;  %v629_v47 = vpop.f32.mrb[63].mxu0  ;;  %v789_v30 = vpop.f32.mrb[63].mxu1 }
 0x1b7   :  { %v853_v32 = vmax.f32 %v626_v11, 0.0  ;;  %v917_v49 = vmax.f32 %v786_v15, 0.0  ;;  %v630_v59 = vadd.f32 %v629_v47, %v1765_v31  ;;  %v790_v24 = vadd.f32 %v789_v30, %v1765_v31 }
 0x1b8   :  { %v1113_v54 = vadd.f32 %v985_v60, %v852_v23  ;;  %v1177_v56 = vadd.f32 %v1049_v48, %v916_v5  ;;  %v854_v34 = vmax.f32 %v628_v37, 0.0  ;;  %v918_v36 = vmax.f32 %v788_v6, 0.0 }
 0x1b9   :  { %v1114_v26 = vadd.f32 %v986_v25, %v853_v32  ;;  %v1178_v7 = vadd.f32 %v1050_v35, %v917_v49  ;;  %v855_v28 = vmax.f32 %v630_v59, 0.0  ;;  %v919_v38 = vmax.f32 %v790_v24, 0.0 }
 0x1ba   :  { %1241 = vst [vmem:[#allocation7 + $0x1e0] sm:$0xff] %v1113_v54  ;;  %1305 = vst [vmem:[#allocation7 + $0x3e0] sm:$0xff] %v1177_v56  ;;  %v1115_v55 = vadd.f32 %v987_v62, %v854_v34  ;;  %v1179_v18 = vadd.f32 %v1051_v0, %v918_v36 }
 0x1bb   :  { %1242 = vst [vmem:[#allocation7 + $0x1e8] sm:$0xff] %v1114_v26  ;;  %1306 = vst [vmem:[#allocation7 + $0x3e8] sm:$0xff] %v1178_v7  ;;  %v1116_v20 = vadd.f32 %v988_v63, %v855_v28  ;;  %v1180_v31 = vadd.f32 %v1052_v1, %v919_v38 }
 0x1bc   :  { %1243 = vst [vmem:[#allocation7 + $0x1f0] sm:$0xff] %v1115_v55  ;;  %1307 = vst [vmem:[#allocation7 + $0x3f0] sm:$0xff] %v1179_v18 }
 0x1bd   :  { %1244 = vst [vmem:[#allocation7 + $0x1f8] sm:$0xff] %v1116_v20  ;;  %1308 = vst [vmem:[#allocation7 + $0x3f8] sm:$0xff] %v1180_v31 }
 0x1be   :  { %1503 = shalt.err (!%p1500_p6)
}
 0x1bf   :  { %s1504_s17 = scalar_lea.hbm %s1975_s3, 16384 }
 0x1c0   :  { %p1505_p7 = scmp.ne.s32.totalorder %s1975_s3, %s1504_s17  ;;  %p1508_p8 = scmp.lt.u32.totalorder %s1504_s17, %s1975_s3 }
 0x1c2   :  { %p1510_p9 = pnand %p1508_p8, %p1505_p7 }
 0x1c4   :  { %1513 = shalt.err (!%p1510_p9)
}
 0x1c5   :  { %1320 = dma.vmem_to_hbm [thread:$0]  %s1315_s13, 16384, %s1975_s3, [#allocation4], %s1521_s22, %s1521_s22, %s1522_s23  }
 0x1c6   :  { %1518 = dma.done.wait [#allocation4], 16384  }
 0x1c7   :  { %1519 = vsyncadd [#allocation4], 4294950912 }
 0x1c8   :  { %1324 = vsyncpa [#allocation3], 1 }
 0x1c9   :  { %1325 = vsyncpa [#allocation6], 1 }
 0x1ca   :  { %1326 = vsyncpa [#allocation4], 1 }

// kernel: tpu_custom_call.1
= control target key start
LH: loop header
LB: loop body
LE: loop exit
PB: predicated region body
PF: predicated region fallthrough
CT: control target
= control target key end

     0   :  { %8 = vsyncpa [#allocation3], 0  ;;  %s1972_s0 = inlined_call_operand.hbm [shape: f32[512,256], index: 0, kind: input, shape index: {}]   ;;  %s1973_s1 = inlined_call_operand.hbm [shape: bf16[256,256], index: 1, kind: input, shape index: {}]   ;;  %s1974_s2 = inlined_call_operand.vmem [shape: f32[1,256], index: 2, kind: input, shape index: {}]   ;;  %s1975_s3 = inlined_call_operand.hbm [shape: f32[512,256], index: 3, kind: output, shape index: {}]  }
   0x1   :  { %9 = vsyncpa [#allocation6], 0 }
   0x2   :  { %10 = vsyncpa [#allocation4], 0  ;;  %s1520_s12 = smov [#allocation2]   ;;  %s1448_s16 = scalar_lea.hbm %s1972_s0, 16384 }
   0x3   :  { %s16_s13 = sshll.u32 %s1520_s12, 4  ;;  %p1449_p0 = scmp.ne.s32.totalorder %s1972_s0, %s1448_s16  ;;  %s17_s13 = int_to_ptr.vmem [resolvable:$true] %s16_s13 }
   0x4   :  { %p1452_p1 = scmp.lt.u32.totalorder %s1448_s16, %s1972_s0 }
   0x6   :  { %p1454_p2 = pnand %p1452_p1, %p1449_p0 }
   0x8   :  { %1457 = shalt.err (!%p1454_p2)
}
   0x9   :  { %s1458_s21 = scalar_lea.vmem %s17_s13, 16384  ;;  %p1463_p4 = scmp.lt.s32.totalorder %s17_s13, %s17_s13 }
   0xa   :  { %p1459_p3 = scmp.ne.s32.totalorder %s17_s13, %s1458_s21  ;;  %p1464_p5 = scmp.lt.s32.totalorder %s1458_s21, %s1458_s21 }
   0xc   :  { %p1465_p6 = por %p1464_p5, %p1463_p4 }
   0xe   :  { %p1466_p7 = pnand %p1465_p6, %p1459_p3 }
  0x10   :  { %1469 = shalt.err (!%p1466_p7)
}
  0x11   :  { %s1521_s22 = smov 256   ;;  %s1522_s23 = smov 16  }
  0x12   :  { %22 = dma.hbm_to_vmem [thread:$0]  %s1972_s0, 16384, %s17_s13, [#allocation3], %s1521_s22, %s1521_s22, %s1522_s23  }
  0x13   :  { %s1523_s26 = smov [#allocation5]   ;;  %s1470_s30 = scalar_lea.hbm %s1973_s1, 4096 }
  0x14   :  { %s28_s27 = sshll.u32 %s1523_s26, 4  ;;  %p1471_p8 = scmp.ne.s32.totalorder %s1973_s1, %s1470_s30  ;;  %s29_s27 = int_to_ptr.vmem [resolvable:$true] %s28_s27 }
  0x15   :  { %p1474_p9 = scmp.lt.u32.totalorder %s1470_s30, %s1973_s1 }
  0x17   :  { %p1476_p10 = pnand %p1474_p9, %p1471_p8 }
  0x19   :  { %1479 = shalt.err (!%p1476_p10)
}
  0x1a   :  { %s1480_s8 = scalar_lea.vmem %s29_s27, 4096  ;;  %p1485_p12 = scmp.lt.s32.totalorder %s29_s27, %s29_s27 }
  0x1b   :  { %p1481_p11 = scmp.ne.s32.totalorder %s29_s27, %s1480_s8  ;;  %p1486_p13 = scmp.lt.s32.totalorder %s1480_s8, %s1480_s8 }
  0x1d   :  { %p1487_p0 = por %p1486_p13, %p1485_p12 }
  0x1f   :  { %p1488_p1 = pnand %p1487_p0, %p1481_p11 }
  0x21   :  { %1491 = shalt.err (!%p1488_p1)
}
  0x22   :  { %s1524_s0 = smov 128   ;;  %s1525_s9 = smov 8  }
  0x23   :  { %34 = dma.hbm_to_vmem [thread:$0]  %s1973_s1, 4096, %s29_s27, [#allocation6], %s1524_s0, %s1524_s0, %s1525_s9  }
  0x24   :  { %1514 = dma.done.wait [#allocation3], 16384  }
  0x25   :  { %1515 = vsyncadd [#allocation3], 4294950912 }
  0x26   :  { %1516 = dma.done.wait [#allocation6], 4096  }
  0x27   :  { %1517 = vsyncadd [#allocation6], 4294963200  ;;  %v1400_v0 = vld [vmem:[#allocation5 + $0x4] ss:$8 sps:$4 sm:$0xff]   ;;  %v1402_v1 = vld [vmem:[#allocation5] ss:$8 sps:$4 sm:$0xff]  }
  0x28   :  { %439 = vmatprep.subr.bf16.mxu0 %v1400_v0  ;;  %1361 = vmatprep.subr.bf16.mxu1 %v1400_v0  ;;  %v1403_v2 = vld [vmem:[#allocation5 + $0x14] ss:$8 sps:$4 sm:$0xff]   ;;  %v1405_v3 = vld [vmem:[#allocation5 + $0x10] ss:$8 sps:$4 sm:$0xff]   ;;  %v1406_v4 = vld [vmem:[#allocation5 + $0x24] ss:$8 sps:$4 sm:$0xff]  }
  0x29   :  { %440 = vmatpush1.bf16.msra.mxu0 %v1402_v1  ;;  %1377 = vmatpush1.bf16.msra.mxu1 %v1402_v1  ;;  %v1408_v5 = vld [vmem:[#allocation5 + $0x20] ss:$8 sps:$4 sm:$0xff]   ;;  %v1409_v6 = vld [vmem:[#allocation5 + $0x34] ss:$8 sps:$4 sm:$0xff]   ;;  %v1411_v7 = vld [vmem:[#allocation5 + $0x30] ss:$8 sps:$4 sm:$0xff]  }
  0x2a   :  { %441 = vmatprep.subr.bf16.mxu0 %v1403_v2  ;;  %1362 = vmatprep.subr.bf16.mxu1 %v1403_v2  ;;  %v1412_v8 = vld [vmem:[#allocation5 + $0x44] ss:$8 sps:$4 sm:$0xff]   ;;  %v1414_v9 = vld [vmem:[#allocation5 + $0x40] ss:$8 sps:$4 sm:$0xff]   ;;  %v1415_v10 = vld [vmem:[#allocation5 + $0x54] ss:$8 sps:$4 sm:$0xff]  }
  0x2b   :  { %v1417_v11 = vld [vmem:[#allocation5 + $0x50] ss:$8 sps:$4 sm:$0xff]   ;;  %v1418_v12 = vld [vmem:[#allocation5 + $0x64] ss:$8 sps:$4 sm:$0xff]   ;;  %v1420_v18 = vld [vmem:[#allocation5 + $0x60] ss:$8 sps:$4 sm:$0xff]  }
  0x2c   :  { %v1574_v13 = vld [vmem:[#allocation2 + $0x8] sm:$0xff]  ;;  %v1576_v14 = vld [vmem:[#allocation2 + $0x18] sm:$0xff]  ;;  %v1586_v38 = vld [vmem:[#allocation2] sm:$0xff] }
  0x2d   :  { %442 = vmatpush1.bf16.msra.mxu0 %v1405_v3  ;;  %1378 = vmatpush1.bf16.msra.mxu1 %v1405_v3  ;;  %v172_v15 = vpack.c.bf16 %v1576_v14, %v1574_v13  ;;  %v1580_v16 = vld [vmem:[#allocation2 + $0x208] sm:$0xff]  ;;  %v1582_v17 = vld [vmem:[#allocation2 + $0x218] sm:$0xff]  ;;  %v1588_v39 = vld [vmem:[#allocation2 + $0x10] sm:$0xff] }
  0x2e   :  { %443 = vmatprep.subr.bf16.mxu0 %v1406_v4  ;;  %1363 = vmatprep.subr.bf16.mxu1 %v1406_v4  ;;  %v204_v19 = vpack.c.bf16 %v1582_v17, %v1580_v16  ;;  %v1421_v20 = vld [vmem:[#allocation5 + $0x74] ss:$8 sps:$4 sm:$0xff]   ;;  %v1423_v21 = vld [vmem:[#allocation5 + $0x70] ss:$8 sps:$4 sm:$0xff]   ;;  %v1424_v22 = vld [vmem:[#allocation5 + $0x84] ss:$8 sps:$4 sm:$0xff]   ;;  %v171_v46 = vpack.c.bf16 %v1588_v39, %v1586_v38 }
  0x2f   :  { %471 = vmatprep.mubr.bf16.mxu0 %v172_v15  ;;  %v1426_v23 = vld [vmem:[#allocation5 + $0x80] ss:$8 sps:$4 sm:$0xff]   ;;  %v1427_v24 = vld [vmem:[#allocation5 + $0x94] ss:$8 sps:$4 sm:$0xff]   ;;  %v1429_v25 = vld [vmem:[#allocation5 + $0x90] ss:$8 sps:$4 sm:$0xff]  }
  0x30   :  { %631 = vmatprep.mubr.bf16.mxu1 %v204_v19  ;;  %v1430_v26 = vld [vmem:[#allocation5 + $0xa4] ss:$8 sps:$4 sm:$0xff]   ;;  %v1432_v27 = vld [vmem:[#allocation5 + $0xa0] ss:$8 sps:$4 sm:$0xff]   ;;  %v1433_v28 = vld [vmem:[#allocation5 + $0xb4] ss:$8 sps:$4 sm:$0xff]  }
  0x31   :  { %444 = vmatpush1.bf16.msra.mxu0 %v1408_v5  ;;  %1379 = vmatpush1.bf16.msra.mxu1 %v1408_v5  ;;  %v1435_v29 = vld [vmem:[#allocation5 + $0xb0] ss:$8 sps:$4 sm:$0xff]   ;;  %v1436_v30 = vld [vmem:[#allocation5 + $0xc4] ss:$8 sps:$4 sm:$0xff]   ;;  %v1438_v31 = vld [vmem:[#allocation5 + $0xc0] ss:$8 sps:$4 sm:$0xff]  }
  0x32   :  { %445 = vmatprep.subr.bf16.mxu0 %v1409_v6  ;;  %1364 = vmatprep.subr.bf16.mxu1 %v1409_v6  ;;  %v1439_v32 = vld [vmem:[#allocation5 + $0xd4] ss:$8 sps:$4 sm:$0xff]   ;;  %v1441_v33 = vld [vmem:[#allocation5 + $0xd0] ss:$8 sps:$4 sm:$0xff]   ;;  %v1442_v34 = vld [vmem:[#allocation5 + $0xe4] ss:$8 sps:$4 sm:$0xff]  }
  0x33   :  { %v1444_v35 = vld [vmem:[#allocation5 + $0xe0] ss:$8 sps:$4 sm:$0xff]   ;;  %v1445_v36 = vld [vmem:[#allocation5 + $0xf4] ss:$8 sps:$4 sm:$0xff]   ;;  %v1447_v37 = vld [vmem:[#allocation5 + $0xf0] ss:$8 sps:$4 sm:$0xff]  }
  0x34   :  { %v1590_v40 = vld [vmem:[#allocation2 + $0x200] sm:$0xff]  ;;  %v1592_v41 = vld [vmem:[#allocation2 + $0x210] sm:$0xff]  ;;  %v1594_v42 = vld [vmem:[#allocation2 + $0x28] sm:$0xff] }
  0x35   :  { %446 = vmatpush1.bf16.msra.mxu0 %v1411_v7  ;;  %1380 = vmatpush1.bf16.msra.mxu1 %v1411_v7  ;;  %v1596_v43 = vld [vmem:[#allocation2 + $0x38] sm:$0xff]  ;;  %v1598_v44 = vld [vmem:[#allocation2 + $0x228] sm:$0xff]  ;;  %v203_v47 = vpack.c.bf16 %v1592_v41, %v1590_v40  ;;  %v1610_v50 = vld [vmem:[#allocation2 + $0x20] sm:$0xff] }
  0x36   :  { %447 = vmatprep.subr.bf16.mxu0 %v1412_v8  ;;  %1365 = vmatprep.subr.bf16.mxu1 %v1412_v8  ;;  %v1600_v45 = vld [vmem:[#allocation2 + $0x238] sm:$0xff]  ;;  %v174_v48 = vpack.c.bf16 %v1596_v43, %v1594_v42  ;;  %v1612_v51 = vld [vmem:[#allocation2 + $0x30] sm:$0xff]  ;;  %v1614_v52 = vld [vmem:[#allocation2 + $0x220] sm:$0xff] }
  0x37   :  { %v206_v49 = vpack.c.bf16 %v1600_v45, %v1598_v44  ;;  %v1616_v53 = vld [vmem:[#allocation2 + $0x230] sm:$0xff]  ;;  %v1618_v54 = vld [vmem:[#allocation2 + $0x48] sm:$0xff]  ;;  %v1620_v55 = vld [vmem:[#allocation2 + $0x58] sm:$0xff]  ;;  %v173_v58 = vpack.c.bf16 %v1612_v51, %v1610_v50 }
  0x38   :  { %v1622_v56 = vld [vmem:[#allocation2 + $0x248] sm:$0xff]  ;;  %v1624_v57 = vld [vmem:[#allocation2 + $0x258] sm:$0xff]  ;;  %v205_v59 = vpack.c.bf16 %v1616_v53, %v1614_v52  ;;  %v176_v60 = vpack.c.bf16 %v1620_v55, %v1618_v54  ;;  %v1634_v62 = vld [vmem:[#allocation2 + $0x40] sm:$0xff] }
  0x39   :  { %448 = vmatpush1.bf16.msra.mxu0 %v1414_v9  ;;  %1381 = vmatpush1.bf16.msra.mxu1 %v1414_v9  ;;  %v208_v61 = vpack.c.bf16 %v1624_v57, %v1622_v56  ;;  %v1636_v63 = vld [vmem:[#allocation2 + $0x50] sm:$0xff]  ;;  %v1638_v0 = vld [vmem:[#allocation2 + $0x240] sm:$0xff]  ;;  %v1642_v2 = vld [vmem:[#allocation2 + $0x68] sm:$0xff] }
  0x3a   :  { %449 = vmatprep.subr.bf16.mxu0 %v1415_v10  ;;  %1366 = vmatprep.subr.bf16.mxu1 %v1415_v10  ;;  %v1640_v1 = vld [vmem:[#allocation2 + $0x250] sm:$0xff]  ;;  %v1644_v3 = vld [vmem:[#allocation2 + $0x78] sm:$0xff]  ;;  %v1646_v4 = vld [vmem:[#allocation2 + $0x268] sm:$0xff]  ;;  %v175_v6 = vpack.c.bf16 %v1636_v63, %v1634_v62 }
  0x3b   :  { %v1648_v5 = vld [vmem:[#allocation2 + $0x278] sm:$0xff]  ;;  %v207_v7 = vpack.c.bf16 %v1640_v1, %v1638_v0  ;;  %v178_v8 = vpack.c.bf16 %v1644_v3, %v1642_v2  ;;  %v1658_v10 = vld [vmem:[#allocation2 + $0x60] sm:$0xff]  ;;  %v1664_v15 = vld [vmem:[#allocation2 + $0x270] sm:$0xff] }
  0x3c   :  { %v210_v9 = vpack.c.bf16 %v1648_v5, %v1646_v4  ;;  %v1668_v19 = vld [vmem:[#allocation2 + $0x98] sm:$0xff] }
  0x3d   :  { %450 = vmatpush1.bf16.msra.mxu0 %v1417_v11  ;;  %1382 = vmatpush1.bf16.msra.mxu1 %v1417_v11  ;;  %v1660_v11 = vld [vmem:[#allocation2 + $0x70] sm:$0xff] }
  0x3e   :  { %451 = vmatprep.subr.bf16.mxu0 %v1418_v12  ;;  %1367 = vmatprep.subr.bf16.mxu1 %v1418_v12  ;;  %v1662_v12 = vld [vmem:[#allocation2 + $0x260] sm:$0xff] }
  0x41   :  { %452 = vmatpush1.bf16.msra.mxu0 %v1420_v18  ;;  %1383 = vmatpush1.bf16.msra.mxu1 %v1420_v18  ;;  %v1666_v18 = vld [vmem:[#allocation2 + $0x88] sm:$0xff] }
  0x42   :  { %453 = vmatprep.subr.bf16.mxu0 %v1421_v20  ;;  %1368 = vmatprep.subr.bf16.mxu1 %v1421_v20  ;;  %v1670_v20 = vld [vmem:[#allocation2 + $0x288] sm:$0xff] }
  0x45   :  { %454 = vmatpush1.bf16.msra.mxu0 %v1423_v21  ;;  %1384 = vmatpush1.bf16.msra.mxu1 %v1423_v21  ;;  %v1672_v21 = vld [vmem:[#allocation2 + $0x298] sm:$0xff] }
  0x46   :  { %455 = vmatprep.subr.bf16.mxu0 %v1424_v22  ;;  %1369 = vmatprep.subr.bf16.mxu1 %v1424_v22  ;;  %v177_v22 = vpack.c.bf16 %v1660_v11, %v1658_v10 }
  0x49   :  { %456 = vmatpush1.bf16.msra.mxu0 %v1426_v23  ;;  %1385 = vmatpush1.bf16.msra.mxu1 %v1426_v23  ;;  %v209_v23 = vpack.c.bf16 %v1664_v15, %v1662_v12 }
  0x4a   :  { %457 = vmatprep.subr.bf16.mxu0 %v1427_v24  ;;  %1370 = vmatprep.subr.bf16.mxu1 %v1427_v24  ;;  %v180_v24 = vpack.c.bf16 %v1668_v19, %v1666_v18 }
  0x4d   :  { %458 = vmatpush1.bf16.msra.mxu0 %v1429_v25  ;;  %1386 = vmatpush1.bf16.msra.mxu1 %v1429_v25  ;;  %v212_v25 = vpack.c.bf16 %v1672_v21, %v1670_v20 }
  0x4e   :  { %459 = vmatprep.subr.bf16.mxu0 %v1430_v26  ;;  %1371 = vmatprep.subr.bf16.mxu1 %v1430_v26  ;;  %v1682_v26 = vld [vmem:[#allocation2 + $0x80] sm:$0xff] }
  0x51   :  { %460 = vmatpush1.bf16.msra.mxu0 %v1432_v27  ;;  %1387 = vmatpush1.bf16.msra.mxu1 %v1432_v27  ;;  %v1684_v27 = vld [vmem:[#allocation2 + $0x90] sm:$0xff] }
  0x52   :  { %461 = vmatprep.subr.bf16.mxu0 %v1433_v28  ;;  %1372 = vmatprep.subr.bf16.mxu1 %v1433_v28  ;;  %v1686_v28 = vld [vmem:[#allocation2 + $0x280] sm:$0xff] }
  0x55   :  { %462 = vmatpush1.bf16.msra.mxu0 %v1435_v29  ;;  %1388 = vmatpush1.bf16.msra.mxu1 %v1435_v29  ;;  %v1688_v29 = vld [vmem:[#allocation2 + $0x290] sm:$0xff] }
  0x56   :  { %463 = vmatprep.subr.bf16.mxu0 %v1436_v30  ;;  %1373 = vmatprep.subr.bf16.mxu1 %v1436_v30  ;;  %v1690_v30 = vld [vmem:[#allocation2 + $0xa8] sm:$0xff] }
  0x57   :  { %1998 = vst [vmem:[#allocation11_spill] sm:$0xff] %v1690_v30 }
  0x59   :  { %464 = vmatpush1.bf16.msra.mxu0 %v1438_v31  ;;  %1389 = vmatpush1.bf16.msra.mxu1 %v1438_v31  ;;  %v1692_v31 = vld [vmem:[#allocation2 + $0xb8] sm:$0xff] }
  0x5a   :  { %465 = vmatprep.subr.bf16.mxu0 %v1439_v32  ;;  %1374 = vmatprep.subr.bf16.mxu1 %v1439_v32  ;;  %1999 = vst [vmem:[#allocation12_spill] sm:$0xff] %v1692_v31  ;;  %v1694_v32 = vld [vmem:[#allocation2 + $0x2a8] sm:$0xff] }
  0x5b   :  { %2000 = vst [vmem:[#allocation13_spill] sm:$0xff] %v1694_v32 }
  0x5d   :  { %466 = vmatpush1.bf16.msra.mxu0 %v1441_v33  ;;  %1390 = vmatpush1.bf16.msra.mxu1 %v1441_v33  ;;  %v1696_v33 = vld [vmem:[#allocation2 + $0x2b8] sm:$0xff] }
  0x5e   :  { %467 = vmatprep.subr.bf16.mxu0 %v1442_v34  ;;  %1375 = vmatprep.subr.bf16.mxu1 %v1442_v34  ;;  %2001 = vst [vmem:[#allocation14_spill] sm:$0xff] %v1696_v33  ;;  %v179_v34 = vpack.c.bf16 %v1684_v27, %v1682_v26 }
  0x61   :  { %468 = vmatpush1.bf16.msra.mxu0 %v1444_v35  ;;  %1391 = vmatpush1.bf16.msra.mxu1 %v1444_v35  ;;  %v211_v35 = vpack.c.bf16 %v1688_v29, %v1686_v28 }
  0x62   :  { %469 = vmatprep.subr.bf16.mxu0 %v1445_v36  ;;  %1376 = vmatprep.subr.bf16.mxu1 %v1445_v36  ;;  %v182_v36 = vpack.c.bf16 %v1692_v31, %v1690_v30  ;;  %v82_v31 = vld [vmem:[#allocation2 + $0x138] sm:$0xff] }
  0x65   :  { %470 = vmatpush1.bf16.msra.mxu0 %v1447_v37  ;;  %1392 = vmatpush1.bf16.msra.mxu1 %v1447_v37  ;;  %v214_v37 = vpack.c.bf16 %v1696_v33, %v1694_v32  ;;  %v140_v33 = vld [vmem:[#allocation2 + $0x308] sm:$0xff] }
  0x68   :  { %472 = vmatmul.mubr.bf16.vlgmr.msra.gmra.mrb[0].mxu0 %v171_v46  ;;  %632 = vmatmul.mubr.bf16.vlgmr.msra.gmra.mrb[0].mxu1 %v203_v47  ;;  %v1706_v46 = vld [vmem:[#allocation2 + $0xa0] sm:$0xff]  ;;  %v1708_v47 = vld [vmem:[#allocation2 + $0xb0] sm:$0xff] }
  0x69   :  { %481 = vmatprep.mubr.bf16.mxu0 %v174_v48  ;;  %641 = vmatprep.mubr.bf16.mxu1 %v206_v49  ;;  %2002 = vst [vmem:[#allocation15_spill] sm:$0xff] %v1706_v46  ;;  %2003 = vst [vmem:[#allocation16_spill] sm:$0xff] %v1708_v47  ;;  %v1710_v48 = vld [vmem:[#allocation2 + $0x2a0] sm:$0xff]  ;;  %v1712_v49 = vld [vmem:[#allocation2 + $0x2b0] sm:$0xff] }
  0x6a   :  { %2004 = vst [vmem:[#allocation17_spill] sm:$0xff] %v1710_v48  ;;  %2005 = vst [vmem:[#allocation18_spill] sm:$0xff] %v1712_v49 }
  0x70   :  { %482 = vmatmul.mubr.bf16.gmra.mrb[4].mxu0 %v173_v58  ;;  %642 = vmatmul.mubr.bf16.gmra.mrb[4].mxu1 %v205_v59  ;;  %v1714_v58 = vld [vmem:[#allocation2 + $0xc8] sm:$0xff]  ;;  %v1716_v59 = vld [vmem:[#allocation2 + $0xd8] sm:$0xff] }
  0x71   :  { %491 = vmatprep.mubr.bf16.mxu0 %v176_v60  ;;  %651 = vmatprep.mubr.bf16.mxu1 %v208_v61  ;;  %2006 = vst [vmem:[#allocation19_spill] sm:$0xff] %v1714_v58  ;;  %2007 = vst [vmem:[#allocation20_spill] sm:$0xff] %v1716_v59  ;;  %v1718_v60 = vld [vmem:[#allocation2 + $0x2c8] sm:$0xff]  ;;  %v1720_v61 = vld [vmem:[#allocation2 + $0x2d8] sm:$0xff] }
  0x72   :  { %2008 = vst [vmem:[#allocation21_spill] sm:$0xff] %v1718_v60  ;;  %2009 = vst [vmem:[#allocation22_spill] sm:$0xff] %v1720_v61 }
  0x78   :  { %492 = vmatmul.mubr.bf16.gmra.mrb[8].mxu0 %v175_v6  ;;  %652 = vmatmul.mubr.bf16.gmra.mrb[8].mxu1 %v207_v7  ;;  %v181_v6 = vpack.c.bf16 %v1708_v47, %v1706_v46  ;;  %v213_v7 = vpack.c.bf16 %v1712_v49, %v1710_v48  ;;  %v144_v49 = vld [vmem:[#allocation2 + $0x328] sm:$0xff]  ;;  %v146_v47 = vld [vmem:[#allocation2 + $0x338] sm:$0xff] }
  0x79   :  { %501 = vmatprep.mubr.bf16.mxu0 %v178_v8  ;;  %661 = vmatprep.mubr.bf16.mxu1 %v210_v9  ;;  %v184_v8 = vpack.c.bf16 %v1716_v59, %v1714_v58  ;;  %v216_v9 = vpack.c.bf16 %v1720_v61, %v1718_v60  ;;  %v1750_v59 = vld [vmem:[#allocation2 + $0xf0] sm:$0xff]  ;;  %v1752_v60 = vld [vmem:[#allocation2 + $0x2e0] sm:$0xff] }
  0x7a   :  { %2017 = vst [vmem:[#allocation30_spill] sm:$0xff] %v1750_v59  ;;  %2018 = vst [vmem:[#allocation31_spill] sm:$0xff] %v1752_v60  ;;  %v1754_v58 = vld [vmem:[#allocation2 + $0x2f0] sm:$0xff] }
  0x7b   :  { %2019 = vst [vmem:[#allocation32_spill] sm:$0xff] %v1754_v58 }
  0x80   :  { %502 = vmatmul.mubr.bf16.gmra.mrb[12].mxu0 %v177_v22  ;;  %662 = vmatmul.mubr.bf16.gmra.mrb[12].mxu1 %v209_v23  ;;  %v1730_v22 = vld [vmem:[#allocation2 + $0xc0] sm:$0xff]  ;;  %v1732_v23 = vld [vmem:[#allocation2 + $0xd0] sm:$0xff] }
  0x81   :  { %511 = vmatprep.mubr.bf16.mxu0 %v180_v24  ;;  %671 = vmatprep.mubr.bf16.mxu1 %v212_v25  ;;  %2010 = vst [vmem:[#allocation23_spill] sm:$0xff] %v1730_v22  ;;  %2011 = vst [vmem:[#allocation24_spill] sm:$0xff] %v1732_v23  ;;  %v1734_v24 = vld [vmem:[#allocation2 + $0x2c0] sm:$0xff]  ;;  %v1736_v25 = vld [vmem:[#allocation2 + $0x2d0] sm:$0xff] }
  0x82   :  { %2012 = vst [vmem:[#allocation25_spill] sm:$0xff] %v1734_v24  ;;  %2013 = vst [vmem:[#allocation26_spill] sm:$0xff] %v1736_v25 }
  0x88   :  { %512 = vmatmul.mubr.bf16.gmra.mrb[16].mxu0 %v179_v34  ;;  %672 = vmatmul.mubr.bf16.gmra.mrb[16].mxu1 %v211_v35  ;;  %v1738_v34 = vld [vmem:[#allocation2 + $0xe8] sm:$0xff]  ;;  %v74_v35 = vld [vmem:[#allocation2 + $0xf8] sm:$0xff] }
  0x89   :  { %521 = vmatprep.mubr.bf16.mxu0 %v182_v36  ;;  %681 = vmatprep.mubr.bf16.mxu1 %v214_v37  ;;  %2014 = vst [vmem:[#allocation27_spill] sm:$0xff] %v1738_v34  ;;  %v1740_v36 = vld [vmem:[#allocation2 + $0x2e8] sm:$0xff]  ;;  %v138_v37 = vld [vmem:[#allocation2 + $0x2f8] sm:$0xff]  ;;  %v186_v61 = vpack.c.bf16 %v74_v35, %v1738_v34  ;;  %v141_v34 = vld [vmem:[#allocation2 + $0x310] sm:$0xff] }
  0x8a   :  { %2015 = vst [vmem:[#allocation28_spill] sm:$0xff] %v1740_v36 }
  0x90   :  { %522 = vmatmul.mubr.bf16.gmra.mrb[20].mxu0 %v181_v6  ;;  %682 = vmatmul.mubr.bf16.gmra.mrb[20].mxu1 %v213_v7  ;;  %v183_v6 = vpack.c.bf16 %v1732_v23, %v1730_v22  ;;  %v215_v7 = vpack.c.bf16 %v1736_v25, %v1734_v24  ;;  %v76_v23 = vld [vmem:[#allocation2 + $0x108] sm:$0xff]  ;;  %v78_v22 = vld [vmem:[#allocation2 + $0x118] sm:$0xff] }
  0x91   :  { %531 = vmatprep.mubr.bf16.mxu0 %v184_v8  ;;  %691 = vmatprep.mubr.bf16.mxu1 %v216_v9  ;;  %v218_v8 = vpack.c.bf16 %v138_v37, %v1740_v36  ;;  %v1748_v9 = vld [vmem:[#allocation2 + $0xe0] sm:$0xff]  ;;  %v142_v25 = vld [vmem:[#allocation2 + $0x318] sm:$0xff]  ;;  %v217_v37 = vpack.c.bf16 %v1754_v58, %v1752_v60  ;;  %v80_v24 = vld [vmem:[#allocation2 + $0x128] sm:$0xff] }
  0x92   :  { %2016 = vst [vmem:[#allocation29_spill] sm:$0xff] %v1748_v9  ;;  %v185_v35 = vpack.c.bf16 %v1750_v59, %v1748_v9  ;;  %v139_v36 = vld [vmem:[#allocation2 + $0x300] sm:$0xff]  ;;  %v190_v59 = vpack.c.bf16 %v82_v31, %v80_v24  ;;  %v222_v9 = vpack.c.bf16 %v146_v47, %v144_v49  ;;  %v85_v47 = vld [vmem:[#allocation2 + $0x150] sm:$0xff]  ;;  %v88_v49 = vld [vmem:[#allocation2 + $0x168] sm:$0xff] }
  0x93   :  { %v219_v30 = vpack.c.bf16 %v141_v34, %v139_v36  ;;  %v83_v31 = vld [vmem:[#allocation2 + $0x140] sm:$0xff]  ;;  %v152_v24 = vld [vmem:[#allocation2 + $0x368] sm:$0xff]  ;;  %v154_v34 = vld [vmem:[#allocation2 + $0x378] sm:$0xff] }
  0x94   :  { %v191_v36 = vpack.c.bf16 %v85_v47, %v83_v31  ;;  %v91_v31 = vld [vmem:[#allocation2 + $0x180] sm:$0xff]  ;;  %v93_v47 = vld [vmem:[#allocation2 + $0x190] sm:$0xff] }
  0x98   :  { %532 = vmatmul.mubr.bf16.gmra.mrb[24].mxu0 %v183_v6  ;;  %692 = vmatmul.mubr.bf16.gmra.mrb[24].mxu1 %v215_v7  ;;  %v188_v6 = vpack.c.bf16 %v78_v22, %v76_v23  ;;  %v220_v7 = vpack.c.bf16 %v142_v25, %v140_v33  ;;  %v79_v22 = vld [vmem:[#allocation2 + $0x120] sm:$0xff]  ;;  %v81_v33 = vld [vmem:[#allocation2 + $0x130] sm:$0xff] }
  0x99   :  { %541 = vmatprep.mubr.bf16.mxu0 %v186_v61  ;;  %701 = vmatprep.mubr.bf16.mxu1 %v218_v8  ;;  %v75_v61 = vld [vmem:[#allocation2 + $0x100] sm:$0xff]  ;;  %v77_v8 = vld [vmem:[#allocation2 + $0x110] sm:$0xff]  ;;  %v189_v58 = vpack.c.bf16 %v81_v33, %v79_v22 }
  0x9a   :  { %v187_v32 = vpack.c.bf16 %v77_v8, %v75_v61  ;;  %v143_v23 = vld [vmem:[#allocation2 + $0x320] sm:$0xff]  ;;  %v145_v25 = vld [vmem:[#allocation2 + $0x330] sm:$0xff]  ;;  %v226_v8 = vpack.c.bf16 %v154_v34, %v152_v24  ;;  %v160_v24 = vld [vmem:[#allocation2 + $0x3a8] sm:$0xff] }
  0x9b   :  { %v221_v60 = vpack.c.bf16 %v145_v25, %v143_v23  ;;  %v87_v22 = vld [vmem:[#allocation2 + $0x160] sm:$0xff]  ;;  %v89_v33 = vld [vmem:[#allocation2 + $0x170] sm:$0xff]  ;;  %v156_v23 = vld [vmem:[#allocation2 + $0x388] sm:$0xff] }
  0x9c   :  { %v158_v25 = vld [vmem:[#allocation2 + $0x398] sm:$0xff] }
  0x9d   :  { %v162_v34 = vld [vmem:[#allocation2 + $0x3b8] sm:$0xff] }
  0xa0   :  { %542 = vmatmul.mubr.bf16.gmra.mrb[28].mxu0 %v185_v35  ;;  %702 = vmatmul.mubr.bf16.gmra.mrb[28].mxu1 %v217_v37  ;;  %v84_v35 = vld [vmem:[#allocation2 + $0x148] sm:$0xff]  ;;  %v86_v37 = vld [vmem:[#allocation2 + $0x158] sm:$0xff] }
  0xa1   :  { %551 = vmatprep.mubr.bf16.mxu0 %v188_v6  ;;  %711 = vmatprep.mubr.bf16.mxu1 %v220_v7  ;;  %v148_v6 = vld [vmem:[#allocation2 + $0x348] sm:$0xff]  ;;  %v150_v7 = vld [vmem:[#allocation2 + $0x358] sm:$0xff]  ;;  %v192_v48 = vpack.c.bf16 %v86_v37, %v84_v35  ;;  %v193_v35 = vpack.c.bf16 %v89_v33, %v87_v22  ;;  %v95_v22 = vld [vmem:[#allocation2 + $0x1a0] sm:$0xff] }
  0xa2   :  { %v224_v46 = vpack.c.bf16 %v150_v7, %v148_v6  ;;  %v228_v7 = vpack.c.bf16 %v158_v25, %v156_v23  ;;  %v97_v33 = vld [vmem:[#allocation2 + $0x1b0] sm:$0xff]  ;;  %v164_v23 = vld [vmem:[#allocation2 + $0x3c8] sm:$0xff]  ;;  %v166_v25 = vld [vmem:[#allocation2 + $0x3d8] sm:$0xff] }
  0xa8   :  { %552 = vmatmul.mubr.bf16.gmra.mrb[32].mxu0 %v187_v32  ;;  %712 = vmatmul.mubr.bf16.gmra.mrb[32].mxu1 %v219_v30  ;;  %v147_v30 = vld [vmem:[#allocation2 + $0x340] sm:$0xff]  ;;  %v149_v32 = vld [vmem:[#allocation2 + $0x350] sm:$0xff] }
  0xa9   :  { %561 = vmatprep.mubr.bf16.mxu0 %v190_v59  ;;  %721 = vmatprep.mubr.bf16.mxu1 %v222_v9  ;;  %v90_v59 = vld [vmem:[#allocation2 + $0x178] sm:$0xff]  ;;  %v223_v9 = vpack.c.bf16 %v149_v32, %v147_v30  ;;  %v155_v30 = vld [vmem:[#allocation2 + $0x380] sm:$0xff]  ;;  %v157_v32 = vld [vmem:[#allocation2 + $0x390] sm:$0xff] }
  0xaa   :  { %v194_v61 = vpack.c.bf16 %v90_v59, %v88_v49  ;;  %v96_v49 = vld [vmem:[#allocation2 + $0x1a8] sm:$0xff]  ;;  %v98_v59 = vld [vmem:[#allocation2 + $0x1b8] sm:$0xff] }
  0xb0   :  { %562 = vmatmul.mubr.bf16.gmra.mrb[36].mxu0 %v189_v58  ;;  %722 = vmatmul.mubr.bf16.gmra.mrb[36].mxu1 %v221_v60  ;;  %v151_v58 = vld [vmem:[#allocation2 + $0x360] sm:$0xff]  ;;  %v153_v60 = vld [vmem:[#allocation2 + $0x370] sm:$0xff] }
  0xb1   :  { %571 = vmatprep.mubr.bf16.mxu0 %v192_v48  ;;  %731 = vmatprep.mubr.bf16.mxu1 %v224_v46  ;;  %v92_v48 = vld [vmem:[#allocation2 + $0x188] sm:$0xff]  ;;  %v94_v46 = vld [vmem:[#allocation2 + $0x198] sm:$0xff]  ;;  %v225_v37 = vpack.c.bf16 %v153_v60, %v151_v58  ;;  %v159_v58 = vld [vmem:[#allocation2 + $0x3a0] sm:$0xff] }
  0xb2   :  { %v196_v6 = vpack.c.bf16 %v94_v46, %v92_v48  ;;  %v161_v60 = vld [vmem:[#allocation2 + $0x3b0] sm:$0xff]  ;;  %v100_v48 = vld [vmem:[#allocation2 + $0x1c8] sm:$0xff]  ;;  %v102_v46 = vld [vmem:[#allocation2 + $0x1d8] sm:$0xff] }
  0xb8   :  { %572 = vmatmul.mubr.bf16.gmra.mrb[40].mxu0 %v191_v36  ;;  %732 = vmatmul.mubr.bf16.gmra.mrb[40].mxu1 %v223_v9  ;;  %v195_v36 = vpack.c.bf16 %v93_v47, %v91_v31  ;;  %v227_v9 = vpack.c.bf16 %v157_v32, %v155_v30  ;;  %v99_v31 = vld [vmem:[#allocation2 + $0x1c0] sm:$0xff]  ;;  %v101_v47 = vld [vmem:[#allocation2 + $0x1d0] sm:$0xff] }
  0xb9   :  { %581 = vmatprep.mubr.bf16.mxu0 %v194_v61  ;;  %741 = vmatprep.mubr.bf16.mxu1 %v226_v8  ;;  %v198_v61 = vpack.c.bf16 %v98_v59, %v96_v49  ;;  %v230_v8 = vpack.c.bf16 %v162_v34, %v160_v24  ;;  %v163_v30 = vld [vmem:[#allocation2 + $0x3c0] sm:$0xff]  ;;  %v165_v32 = vld [vmem:[#allocation2 + $0x3d0] sm:$0xff]  ;;  %v104_v49 = vld [vmem:[#allocation2 + $0x1e8] sm:$0xff] }
  0xba   :  { %v106_v59 = vld [vmem:[#allocation2 + $0x1f8] sm:$0xff]  ;;  %v168_v24 = vld [vmem:[#allocation2 + $0x3e8] sm:$0xff] }
  0xbb   :  { %v170_v34 = vld [vmem:[#allocation2 + $0x3f8] sm:$0xff] }
  0xc0   :  { %582 = vmatmul.mubr.bf16.gmra.mrb[44].mxu0 %v193_v35  ;;  %742 = vmatmul.mubr.bf16.gmra.mrb[44].mxu1 %v225_v37  ;;  %v197_v35 = vpack.c.bf16 %v97_v33, %v95_v22  ;;  %v229_v37 = vpack.c.bf16 %v161_v60, %v159_v58  ;;  %v103_v22 = vld [vmem:[#allocation2 + $0x1e0] sm:$0xff]  ;;  %v105_v33 = vld [vmem:[#allocation2 + $0x1f0] sm:$0xff] }
  0xc1   :  { %591 = vmatprep.mubr.bf16.mxu0 %v196_v6  ;;  %751 = vmatprep.mubr.bf16.mxu1 %v228_v7  ;;  %v200_v6 = vpack.c.bf16 %v102_v46, %v100_v48  ;;  %v232_v7 = vpack.c.bf16 %v166_v25, %v164_v23  ;;  %v167_v58 = vld [vmem:[#allocation2 + $0x3e0] sm:$0xff]  ;;  %v169_v60 = vld [vmem:[#allocation2 + $0x3f0] sm:$0xff]  ;;  %v201_v48 = vpack.c.bf16 %v105_v33, %v103_v22  ;;  %v269_v23 = vlaneseq }
  0xc2   :  { %v233_v46 = vpack.c.bf16 %v169_v60, %v167_v58 }
  0xc3   :  { %v270_v25 = vshrl.u32 %v269_v23, 7 }
  0xc8   :  { %592 = vmatmul.mubr.bf16.gmra.mrb[48].mxu0 %v195_v36  ;;  %752 = vmatmul.mubr.bf16.gmra.mrb[48].mxu1 %v227_v9  ;;  %v199_v36 = vpack.c.bf16 %v101_v47, %v99_v31  ;;  %v231_v9 = vpack.c.bf16 %v165_v32, %v163_v30 }
  0xc9   :  { %601 = vmatprep.mubr.bf16.mxu0 %v198_v61  ;;  %761 = vmatprep.mubr.bf16.mxu1 %v230_v8  ;;  %v202_v61 = vpack.c.bf16 %v106_v59, %v104_v49  ;;  %v234_v8 = vpack.c.bf16 %v170_v34, %v168_v24 }
  0xd0   :  { %602 = vmatmul.mubr.bf16.gmra.mrb[52].mxu0 %v197_v35  ;;  %762 = vmatmul.mubr.bf16.gmra.mrb[52].mxu1 %v229_v37  ;;  %v271_v35 = vsub.s32 0, %v270_v25  ;;  %v267_v37 = vld [vmem:[%s1974_s2] sm:$0x3]  ;;  %s1526_s2 = smov [#allocation7]  }
  0xd1   :  { %611 = vmatprep.mubr.bf16.mxu0 %v200_v6  ;;  %771 = vmatprep.mubr.bf16.mxu1 %v232_v7  ;;  %v275_v6 = vsub.s32 1, %v270_v25  ;;  %s1314_s13 = sshll.u32 %s1526_s2, 4  ;;  %s1315_s13 = int_to_ptr.vmem [resolvable:$true] %s1314_s13 }
  0xd2   :  { %v1763_v7 = vrot.slane %v267_v37, %v271_v35  ;;  %s1492_s14 = scalar_lea.vmem %s1315_s13, 16384  ;;  %p1497_p3 = scmp.lt.s32.totalorder %s1315_s13, %s1315_s13 }
  0xd3   :  { %v1765_v31 = vrot.slane %v267_v37, %v275_v6  ;;  %p1493_p2 = scmp.ne.s32.totalorder %s1315_s13, %s1492_s14  ;;  %p1498_p4 = scmp.lt.s32.totalorder %s1492_s14, %s1492_s14 }
  0xd5   :  { %p1499_p5 = por %p1498_p4, %p1497_p3 }
  0xd7   :  { %p1500_p6 = pnand %p1499_p5, %p1493_p2 }
  0xd8   :  { %612 = vmatmul.mubr.bf16.gmra.mrb[56].mxu0 %v199_v36  ;;  %772 = vmatmul.mubr.bf16.gmra.mrb[56].mxu1 %v231_v9 }
  0xd9   :  { %621 = vmatprep.mubr.bf16.mxu0 %v202_v61  ;;  %781 = vmatprep.mubr.bf16.mxu1 %v234_v8 }
  0xe0   :  { %622 = vmatmul.mubr.bf16.gmra.mrb[60].mxu0 %v201_v48  ;;  %782 = vmatmul.mubr.bf16.gmra.mrb[60].mxu1 %v233_v46 }
 0x13b   :  { %v473_v47 = vpop.f32.mrb[0].mxu0  ;;  %v633_v30 = vpop.f32.mrb[0].mxu1 }
 0x13c   :  { %v474_v32 = vadd.f32 %v473_v47, %v1763_v7  ;;  %v634_v49 = vadd.f32 %v633_v30, %v1763_v7  ;;  %v475_v59 = vpop.f32.mrb[1].mxu0  ;;  %v635_v24 = vpop.f32.mrb[1].mxu1 }
 0x13d   :  { %v476_v34 = vadd.f32 %v475_v59, %v1765_v31  ;;  %v636_v36 = vadd.f32 %v635_v24, %v1765_v31  ;;  %v477_v9 = vpop.f32.mrb[2].mxu0  ;;  %v637_v61 = vpop.f32.mrb[2].mxu1 }
 0x13e   :  { %v792_v8 = vmax.f32 %v474_v32, 0.0  ;;  %v856_v22 = vmax.f32 %v634_v49, 0.0  ;;  %v478_v33 = vadd.f32 %v477_v9, %v1763_v7  ;;  %v638_v58 = vadd.f32 %v637_v61, %v1763_v7  ;;  %v479_v60 = vpop.f32.mrb[3].mxu0  ;;  %v639_v48 = vpop.f32.mrb[3].mxu1 }
 0x13f   :  { %v793_v46 = vmax.f32 %v476_v34, 0.0  ;;  %v857_v23 = vmax.f32 %v636_v36, 0.0  ;;  %v480_v25 = vadd.f32 %v479_v60, %v1765_v31  ;;  %v640_v35 = vadd.f32 %v639_v48, %v1765_v31 }
 0x140   :  { %v1053_v37 = vadd.f32 %v792_v8, %v1586_v38  ;;  %v1117_v6 = vadd.f32 %v856_v22, %v1590_v40  ;;  %v794_v47 = vmax.f32 %v478_v33, 0.0  ;;  %v858_v30 = vmax.f32 %v638_v58, 0.0 }
 0x141   :  { %v1054_v32 = vadd.f32 %v793_v46, %v1574_v13  ;;  %v1118_v49 = vadd.f32 %v857_v23, %v1580_v16  ;;  %v795_v59 = vmax.f32 %v480_v25, 0.0  ;;  %v859_v24 = vmax.f32 %v640_v35, 0.0 }
 0x142   :  { %1181 = vst [vmem:[#allocation7] sm:$0xff] %v1053_v37  ;;  %1245 = vst [vmem:[#allocation7 + $0x200] sm:$0xff] %v1117_v6  ;;  %v1055_v34 = vadd.f32 %v794_v47, %v1588_v39  ;;  %v1119_v36 = vadd.f32 %v858_v30, %v1592_v41 }
 0x143   :  { %1182 = vst [vmem:[#allocation7 + $0x8] sm:$0xff] %v1054_v32  ;;  %1246 = vst [vmem:[#allocation7 + $0x208] sm:$0xff] %v1118_v49  ;;  %v1056_v38 = vadd.f32 %v795_v59, %v1576_v14  ;;  %v1120_v40 = vadd.f32 %v859_v24, %v1582_v17  ;;  %v483_v9 = vpop.f32.mrb[4].mxu0  ;;  %v643_v61 = vpop.f32.mrb[4].mxu1 }
 0x144   :  { %1183 = vst [vmem:[#allocation7 + $0x10] sm:$0xff] %v1055_v34  ;;  %1247 = vst [vmem:[#allocation7 + $0x210] sm:$0xff] %v1119_v36  ;;  %v484_v13 = vadd.f32 %v483_v9, %v1763_v7  ;;  %v644_v16 = vadd.f32 %v643_v61, %v1763_v7  ;;  %v485_v8 = vpop.f32.mrb[5].mxu0  ;;  %v645_v22 = vpop.f32.mrb[5].mxu1 }
 0x145   :  { %1184 = vst [vmem:[#allocation7 + $0x18] sm:$0xff] %v1056_v38  ;;  %1248 = vst [vmem:[#allocation7 + $0x218] sm:$0xff] %v1120_v40  ;;  %v486_v39 = vadd.f32 %v485_v8, %v1765_v31  ;;  %v646_v41 = vadd.f32 %v645_v22, %v1765_v31  ;;  %v487_v33 = vpop.f32.mrb[6].mxu0  ;;  %v647_v14 = vpop.f32.mrb[6].mxu1 }
 0x146   :  { %v796_v58 = vmax.f32 %v484_v13, 0.0  ;;  %v860_v17 = vmax.f32 %v644_v16, 0.0  ;;  %v488_v60 = vadd.f32 %v487_v33, %v1763_v7  ;;  %v648_v48 = vadd.f32 %v647_v14, %v1763_v7  ;;  %v489_v46 = vpop.f32.mrb[7].mxu0  ;;  %v649_v23 = vpop.f32.mrb[7].mxu1 }
 0x147   :  { %v797_v25 = vmax.f32 %v486_v39, 0.0  ;;  %v861_v35 = vmax.f32 %v646_v41, 0.0  ;;  %v490_v37 = vadd.f32 %v489_v46, %v1765_v31  ;;  %v650_v6 = vadd.f32 %v649_v23, %v1765_v31 }
 0x148   :  { %v1057_v47 = vadd.f32 %v796_v58, %v1610_v50  ;;  %v1121_v30 = vadd.f32 %v860_v17, %v1614_v52  ;;  %v798_v32 = vmax.f32 %v488_v60, 0.0  ;;  %v862_v49 = vmax.f32 %v648_v48, 0.0 }
 0x149   :  { %v1058_v59 = vadd.f32 %v797_v25, %v1594_v42  ;;  %v1122_v24 = vadd.f32 %v861_v35, %v1598_v44  ;;  %v799_v34 = vmax.f32 %v490_v37, 0.0  ;;  %v863_v36 = vmax.f32 %v650_v6, 0.0 }
 0x14a   :  { %1185 = vst [vmem:[#allocation7 + $0x20] sm:$0xff] %v1057_v47  ;;  %1249 = vst [vmem:[#allocation7 + $0x220] sm:$0xff] %v1121_v30  ;;  %v1059_v38 = vadd.f32 %v798_v32, %v1612_v51  ;;  %v1123_v40 = vadd.f32 %v862_v49, %v1616_v53 }
 0x14b   :  { %1186 = vst [vmem:[#allocation7 + $0x28] sm:$0xff] %v1058_v59  ;;  %1250 = vst [vmem:[#allocation7 + $0x228] sm:$0xff] %v1122_v24  ;;  %v1060_v50 = vadd.f32 %v799_v34, %v1596_v43  ;;  %v1124_v52 = vadd.f32 %v863_v36, %v1600_v45  ;;  %v493_v9 = vpop.f32.mrb[8].mxu0  ;;  %v653_v61 = vpop.f32.mrb[8].mxu1 }
 0x14c   :  { %1187 = vst [vmem:[#allocation7 + $0x30] sm:$0xff] %v1059_v38  ;;  %1251 = vst [vmem:[#allocation7 + $0x230] sm:$0xff] %v1123_v40  ;;  %v494_v42 = vadd.f32 %v493_v9, %v1763_v7  ;;  %v654_v44 = vadd.f32 %v653_v61, %v1763_v7  ;;  %v495_v13 = vpop.f32.mrb[9].mxu0  ;;  %v655_v16 = vpop.f32.mrb[9].mxu1 }
 0x14d   :  { %1188 = vst [vmem:[#allocation7 + $0x38] sm:$0xff] %v1060_v50  ;;  %1252 = vst [vmem:[#allocation7 + $0x238] sm:$0xff] %v1124_v52  ;;  %v496_v51 = vadd.f32 %v495_v13, %v1765_v31  ;;  %v656_v53 = vadd.f32 %v655_v16, %v1765_v31  ;;  %v497_v8 = vpop.f32.mrb[10].mxu0  ;;  %v657_v43 = vpop.f32.mrb[10].mxu1 }
 0x14e   :  { %v800_v22 = vmax.f32 %v494_v42, 0.0  ;;  %v864_v45 = vmax.f32 %v654_v44, 0.0  ;;  %v498_v39 = vadd.f32 %v497_v8, %v1763_v7  ;;  %v658_v41 = vadd.f32 %v657_v43, %v1763_v7  ;;  %v499_v33 = vpop.f32.mrb[11].mxu0  ;;  %v659_v14 = vpop.f32.mrb[11].mxu1 }
 0x14f   :  { %v801_v58 = vmax.f32 %v496_v51, 0.0  ;;  %v865_v17 = vmax.f32 %v656_v53, 0.0  ;;  %v500_v60 = vadd.f32 %v499_v33, %v1765_v31  ;;  %v660_v48 = vadd.f32 %v659_v14, %v1765_v31 }
 0x150   :  { %v1061_v46 = vadd.f32 %v800_v22, %v1634_v62  ;;  %v1125_v23 = vadd.f32 %v864_v45, %v1638_v0  ;;  %v802_v25 = vmax.f32 %v498_v39, 0.0  ;;  %v866_v35 = vmax.f32 %v658_v41, 0.0 }
 0x151   :  { %v1062_v37 = vadd.f32 %v801_v58, %v1618_v54  ;;  %v1126_v6 = vadd.f32 %v865_v17, %v1622_v56  ;;  %v803_v47 = vmax.f32 %v500_v60, 0.0  ;;  %v867_v30 = vmax.f32 %v660_v48, 0.0 }
 0x152   :  { %1189 = vst [vmem:[#allocation7 + $0x40] sm:$0xff] %v1061_v46  ;;  %1253 = vst [vmem:[#allocation7 + $0x240] sm:$0xff] %v1125_v23  ;;  %v1063_v32 = vadd.f32 %v802_v25, %v1636_v63  ;;  %v1127_v49 = vadd.f32 %v866_v35, %v1640_v1 }
 0x153   :  { %1190 = vst [vmem:[#allocation7 + $0x48] sm:$0xff] %v1062_v37  ;;  %1254 = vst [vmem:[#allocation7 + $0x248] sm:$0xff] %v1126_v6  ;;  %v1064_v62 = vadd.f32 %v803_v47, %v1620_v55  ;;  %v1128_v0 = vadd.f32 %v867_v30, %v1624_v57  ;;  %v503_v59 = vpop.f32.mrb[12].mxu0  ;;  %v663_v24 = vpop.f32.mrb[12].mxu1 }
 0x154   :  { %1191 = vst [vmem:[#allocation7 + $0x50] sm:$0xff] %v1063_v32  ;;  %1255 = vst [vmem:[#allocation7 + $0x250] sm:$0xff] %v1127_v49  ;;  %v504_v54 = vadd.f32 %v503_v59, %v1763_v7  ;;  %v664_v56 = vadd.f32 %v663_v24, %v1763_v7  ;;  %v505_v34 = vpop.f32.mrb[13].mxu0  ;;  %v665_v36 = vpop.f32.mrb[13].mxu1 }
 0x155   :  { %1192 = vst [vmem:[#allocation7 + $0x58] sm:$0xff] %v1064_v62  ;;  %1256 = vst [vmem:[#allocation7 + $0x258] sm:$0xff] %v1128_v0  ;;  %v506_v63 = vadd.f32 %v505_v34, %v1765_v31  ;;  %v666_v1 = vadd.f32 %v665_v36, %v1765_v31  ;;  %v507_v38 = vpop.f32.mrb[14].mxu0  ;;  %v667_v55 = vpop.f32.mrb[14].mxu1 }
 0x156   :  { %v804_v40 = vmax.f32 %v504_v54, 0.0  ;;  %v868_v57 = vmax.f32 %v664_v56, 0.0  ;;  %v508_v50 = vadd.f32 %v507_v38, %v1763_v7  ;;  %v668_v52 = vadd.f32 %v667_v55, %v1763_v7  ;;  %v509_v9 = vpop.f32.mrb[15].mxu0  ;;  %v669_v61 = vpop.f32.mrb[15].mxu1 }
 0x157   :  { %v805_v42 = vmax.f32 %v506_v63, 0.0  ;;  %v869_v44 = vmax.f32 %v666_v1, 0.0  ;;  %v510_v13 = vadd.f32 %v509_v9, %v1765_v31  ;;  %v670_v16 = vadd.f32 %v669_v61, %v1765_v31 }
 0x158   :  { %v1065_v51 = vadd.f32 %v804_v40, %v1658_v10  ;;  %v1129_v53 = vadd.f32 %v868_v57, %v1662_v12  ;;  %v806_v8 = vmax.f32 %v508_v50, 0.0  ;;  %v870_v43 = vmax.f32 %v668_v52, 0.0 }
 0x159   :  { %v1066_v22 = vadd.f32 %v805_v42, %v1642_v2  ;;  %v1130_v45 = vadd.f32 %v869_v44, %v1646_v4  ;;  %v807_v39 = vmax.f32 %v510_v13, 0.0  ;;  %v871_v41 = vmax.f32 %v670_v16, 0.0 }
 0x15a   :  { %1193 = vst [vmem:[#allocation7 + $0x60] sm:$0xff] %v1065_v51  ;;  %1257 = vst [vmem:[#allocation7 + $0x260] sm:$0xff] %v1129_v53  ;;  %v1067_v33 = vadd.f32 %v806_v8, %v1660_v11  ;;  %v1131_v14 = vadd.f32 %v870_v43, %v1664_v15  ;;  %v2020_v8 = vld [vmem:[#allocation15_spill] sm:$0xff] }
 0x15b   :  { %1194 = vst [vmem:[#allocation7 + $0x68] sm:$0xff] %v1066_v22  ;;  %1258 = vst [vmem:[#allocation7 + $0x268] sm:$0xff] %v1130_v45  ;;  %v1068_v10 = vadd.f32 %v807_v39, %v1644_v3  ;;  %v1132_v12 = vadd.f32 %v871_v41, %v1648_v5  ;;  %v513_v58 = vpop.f32.mrb[16].mxu0  ;;  %v673_v17 = vpop.f32.mrb[16].mxu1  ;;  %v2021_v22 = vld [vmem:[#allocation17_spill] sm:$0xff] }
 0x15c   :  { %1195 = vst [vmem:[#allocation7 + $0x70] sm:$0xff] %v1067_v33  ;;  %1259 = vst [vmem:[#allocation7 + $0x270] sm:$0xff] %v1131_v14  ;;  %v514_v2 = vadd.f32 %v513_v58, %v1763_v7  ;;  %v674_v4 = vadd.f32 %v673_v17, %v1763_v7  ;;  %v515_v60 = vpop.f32.mrb[17].mxu0  ;;  %v675_v48 = vpop.f32.mrb[17].mxu1  ;;  %v2022_v33 = vld [vmem:[#allocation11_spill] sm:$0xff] }
 0x15d   :  { %1196 = vst [vmem:[#allocation7 + $0x78] sm:$0xff] %v1068_v10  ;;  %1260 = vst [vmem:[#allocation7 + $0x278] sm:$0xff] %v1132_v12  ;;  %v516_v11 = vadd.f32 %v515_v60, %v1765_v31  ;;  %v676_v15 = vadd.f32 %v675_v48, %v1765_v31  ;;  %v517_v46 = vpop.f32.mrb[18].mxu0  ;;  %v677_v3 = vpop.f32.mrb[18].mxu1  ;;  %v2023_v10 = vld [vmem:[#allocation13_spill] sm:$0xff]  ;;  %v2025_v60 = vld [vmem:[#allocation18_spill] sm:$0xff] }
 0x15e   :  { %v808_v23 = vmax.f32 %v514_v2, 0.0  ;;  %v872_v5 = vmax.f32 %v674_v4, 0.0  ;;  %v518_v25 = vadd.f32 %v517_v46, %v1763_v7  ;;  %v678_v35 = vadd.f32 %v677_v3, %v1763_v7  ;;  %v519_v37 = vpop.f32.mrb[19].mxu0  ;;  %v679_v6 = vpop.f32.mrb[19].mxu1  ;;  %v2024_v2 = vld [vmem:[#allocation16_spill] sm:$0xff]  ;;  %v2027_v46 = vld [vmem:[#allocation14_spill] sm:$0xff] }
 0x15f   :  { %v809_v47 = vmax.f32 %v516_v11, 0.0  ;;  %v873_v30 = vmax.f32 %v676_v15, 0.0  ;;  %v520_v32 = vadd.f32 %v519_v37, %v1765_v31  ;;  %v680_v49 = vadd.f32 %v679_v6, %v1765_v31  ;;  %v2026_v11 = vld [vmem:[#allocation12_spill] sm:$0xff] }
 0x160   :  { %v1069_v62 = vadd.f32 %v808_v23, %v1682_v26  ;;  %v1133_v0 = vadd.f32 %v872_v5, %v1686_v28  ;;  %v810_v59 = vmax.f32 %v518_v25, 0.0  ;;  %v874_v24 = vmax.f32 %v678_v35, 0.0 }
 0x161   :  { %v1070_v54 = vadd.f32 %v809_v47, %v1666_v18  ;;  %v1134_v56 = vadd.f32 %v873_v30, %v1670_v20  ;;  %v811_v34 = vmax.f32 %v520_v32, 0.0  ;;  %v875_v36 = vmax.f32 %v680_v49, 0.0 }
 0x162   :  { %1197 = vst [vmem:[#allocation7 + $0x80] sm:$0xff] %v1069_v62  ;;  %1261 = vst [vmem:[#allocation7 + $0x280] sm:$0xff] %v1133_v0  ;;  %v1071_v63 = vadd.f32 %v810_v59, %v1684_v27  ;;  %v1135_v1 = vadd.f32 %v874_v24, %v1688_v29 }
 0x163   :  { %1198 = vst [vmem:[#allocation7 + $0x88] sm:$0xff] %v1070_v54  ;;  %1262 = vst [vmem:[#allocation7 + $0x288] sm:$0xff] %v1134_v56  ;;  %v1072_v26 = vadd.f32 %v811_v34, %v1668_v19  ;;  %v1136_v28 = vadd.f32 %v875_v36, %v1672_v21  ;;  %v523_v38 = vpop.f32.mrb[20].mxu0  ;;  %v683_v55 = vpop.f32.mrb[20].mxu1 }
 0x164   :  { %1199 = vst [vmem:[#allocation7 + $0x90] sm:$0xff] %v1071_v63  ;;  %1263 = vst [vmem:[#allocation7 + $0x290] sm:$0xff] %v1135_v1  ;;  %v524_v18 = vadd.f32 %v523_v38, %v1763_v7  ;;  %v684_v20 = vadd.f32 %v683_v55, %v1763_v7  ;;  %v525_v40 = vpop.f32.mrb[21].mxu0  ;;  %v685_v57 = vpop.f32.mrb[21].mxu1  ;;  %v2029_v38 = vld [vmem:[#allocation25_spill] sm:$0xff] }
 0x165   :  { %1200 = vst [vmem:[#allocation7 + $0x98] sm:$0xff] %v1072_v26  ;;  %1264 = vst [vmem:[#allocation7 + $0x298] sm:$0xff] %v1136_v28  ;;  %v526_v27 = vadd.f32 %v525_v40, %v1765_v31  ;;  %v686_v29 = vadd.f32 %v685_v57, %v1765_v31  ;;  %v527_v50 = vpop.f32.mrb[22].mxu0  ;;  %v687_v19 = vpop.f32.mrb[22].mxu1  ;;  %v2028_v26 = vld [vmem:[#allocation23_spill] sm:$0xff] }
 0x166   :  { %v812_v52 = vmax.f32 %v524_v18, 0.0  ;;  %v876_v21 = vmax.f32 %v684_v20, 0.0  ;;  %v528_v9 = vadd.f32 %v527_v50, %v1763_v7  ;;  %v688_v61 = vadd.f32 %v687_v19, %v1763_v7  ;;  %v529_v42 = vpop.f32.mrb[23].mxu0  ;;  %v689_v44 = vpop.f32.mrb[23].mxu1  ;;  %v2030_v40 = vld [vmem:[#allocation19_spill] sm:$0xff] }
 0x167   :  { %v813_v13 = vmax.f32 %v526_v27, 0.0  ;;  %v877_v16 = vmax.f32 %v686_v29, 0.0  ;;  %v530_v51 = vadd.f32 %v529_v42, %v1765_v31  ;;  %v690_v53 = vadd.f32 %v689_v44, %v1765_v31  ;;  %v2031_v27 = vld [vmem:[#allocation21_spill] sm:$0xff]  ;;  %v2034_v42 = vld [vmem:[#allocation20_spill] sm:$0xff] }
 0x168   :  { %v1073_v43 = vadd.f32 %v812_v52, %v2020_v8  ;;  %v1137_v45 = vadd.f32 %v876_v21, %v2021_v22  ;;  %v814_v39 = vmax.f32 %v528_v9, 0.0  ;;  %v878_v41 = vmax.f32 %v688_v61, 0.0  ;;  %v2032_v52 = vld [vmem:[#allocation24_spill] sm:$0xff]  ;;  %v2033_v9 = vld [vmem:[#allocation26_spill] sm:$0xff] }
 0x169   :  { %v1074_v14 = vadd.f32 %v813_v13, %v2022_v33  ;;  %v1138_v12 = vadd.f32 %v877_v16, %v2023_v10  ;;  %v815_v58 = vmax.f32 %v530_v51, 0.0  ;;  %v879_v17 = vmax.f32 %v690_v53, 0.0  ;;  %v2035_v13 = vld [vmem:[#allocation22_spill] sm:$0xff] }
 0x16a   :  { %1201 = vst [vmem:[#allocation7 + $0xa0] sm:$0xff] %v1073_v43  ;;  %1265 = vst [vmem:[#allocation7 + $0x2a0] sm:$0xff] %v1137_v45  ;;  %v1075_v4 = vadd.f32 %v814_v39, %v2024_v2  ;;  %v1139_v48 = vadd.f32 %v878_v41, %v2025_v60 }
 0x16b   :  { %1202 = vst [vmem:[#allocation7 + $0xa8] sm:$0xff] %v1074_v14  ;;  %1266 = vst [vmem:[#allocation7 + $0x2a8] sm:$0xff] %v1138_v12  ;;  %v1076_v15 = vadd.f32 %v815_v58, %v2026_v11  ;;  %v1140_v3 = vadd.f32 %v879_v17, %v2027_v46  ;;  %v533_v23 = vpop.f32.mrb[24].mxu0  ;;  %v693_v5 = vpop.f32.mrb[24].mxu1  ;;  %v2036_v46 = vld [vmem:[#allocation29_spill] sm:$0xff] }
 0x16c   :  { %1203 = vst [vmem:[#allocation7 + $0xb0] sm:$0xff] %v1075_v4  ;;  %1267 = vst [vmem:[#allocation7 + $0x2b0] sm:$0xff] %v1139_v48  ;;  %v534_v25 = vadd.f32 %v533_v23, %v1763_v7  ;;  %v694_v35 = vadd.f32 %v693_v5, %v1763_v7  ;;  %v535_v37 = vpop.f32.mrb[25].mxu0  ;;  %v695_v6 = vpop.f32.mrb[25].mxu1  ;;  %v2037_v23 = vld [vmem:[#allocation31_spill] sm:$0xff] }
 0x16d   :  { %1204 = vst [vmem:[#allocation7 + $0xb8] sm:$0xff] %v1076_v15  ;;  %1268 = vst [vmem:[#allocation7 + $0x2b8] sm:$0xff] %v1140_v3  ;;  %v536_v47 = vadd.f32 %v535_v37, %v1765_v31  ;;  %v696_v30 = vadd.f32 %v695_v6, %v1765_v31  ;;  %v537_v32 = vpop.f32.mrb[26].mxu0  ;;  %v697_v49 = vpop.f32.mrb[26].mxu1  ;;  %v956_v37 = vld [vmem:[#allocation2 + $0xf8] sm:$0xff] }
 0x16e   :  { %v816_v62 = vmax.f32 %v534_v25, 0.0  ;;  %v880_v0 = vmax.f32 %v694_v35, 0.0  ;;  %v538_v59 = vadd.f32 %v537_v32, %v1763_v7  ;;  %v698_v24 = vadd.f32 %v697_v49, %v1763_v7  ;;  %v539_v54 = vpop.f32.mrb[27].mxu0  ;;  %v699_v56 = vpop.f32.mrb[27].mxu1  ;;  %v1020_v6 = vld [vmem:[#allocation2 + $0x2f8] sm:$0xff]  ;;  %v2039_v32 = vld [vmem:[#allocation28_spill] sm:$0xff] }
 0x16f   :  { %v817_v34 = vmax.f32 %v536_v47, 0.0  ;;  %v881_v36 = vmax.f32 %v696_v30, 0.0  ;;  %v540_v63 = vadd.f32 %v539_v54, %v1765_v31  ;;  %v700_v1 = vadd.f32 %v699_v56, %v1765_v31  ;;  %v2038_v47 = vld [vmem:[#allocation27_spill] sm:$0xff]  ;;  %v2041_v54 = vld [vmem:[#allocation32_spill] sm:$0xff] }
 0x170   :  { %v1077_v28 = vadd.f32 %v816_v62, %v2028_v26  ;;  %v1141_v55 = vadd.f32 %v880_v0, %v2029_v38  ;;  %v818_v18 = vmax.f32 %v538_v59, 0.0  ;;  %v882_v20 = vmax.f32 %v698_v24, 0.0  ;;  %v2040_v59 = vld [vmem:[#allocation30_spill] sm:$0xff] }
 0x171   :  { %v1078_v57 = vadd.f32 %v817_v34, %v2030_v40  ;;  %v1142_v29 = vadd.f32 %v881_v36, %v2031_v27  ;;  %v819_v50 = vmax.f32 %v540_v63, 0.0  ;;  %v883_v19 = vmax.f32 %v700_v1, 0.0 }
 0x172   :  { %1205 = vst [vmem:[#allocation7 + $0xc0] sm:$0xff] %v1077_v28  ;;  %1269 = vst [vmem:[#allocation7 + $0x2c0] sm:$0xff] %v1141_v55  ;;  %v1079_v21 = vadd.f32 %v818_v18, %v2032_v52  ;;  %v1143_v61 = vadd.f32 %v882_v20, %v2033_v9  ;;  %v957_v18 = vld [vmem:[#allocation2 + $0x100] sm:$0xff]  ;;  %v958_v52 = vld [vmem:[#allocation2 + $0x108] sm:$0xff] }
 0x173   :  { %1206 = vst [vmem:[#allocation7 + $0xc8] sm:$0xff] %v1078_v57  ;;  %1270 = vst [vmem:[#allocation7 + $0x2c8] sm:$0xff] %v1142_v29  ;;  %v1080_v44 = vadd.f32 %v819_v50, %v2034_v42  ;;  %v1144_v16 = vadd.f32 %v883_v19, %v2035_v13  ;;  %v543_v51 = vpop.f32.mrb[28].mxu0  ;;  %v703_v53 = vpop.f32.mrb[28].mxu1  ;;  %v1021_v20 = vld [vmem:[#allocation2 + $0x300] sm:$0xff] }
 0x174   :  { %1207 = vst [vmem:[#allocation7 + $0xd0] sm:$0xff] %v1079_v21  ;;  %1271 = vst [vmem:[#allocation7 + $0x2d0] sm:$0xff] %v1143_v61  ;;  %v544_v8 = vadd.f32 %v543_v51, %v1763_v7  ;;  %v704_v43 = vadd.f32 %v703_v53, %v1763_v7  ;;  %v545_v22 = vpop.f32.mrb[29].mxu0  ;;  %v705_v45 = vpop.f32.mrb[29].mxu1  ;;  %v1022_v21 = vld [vmem:[#allocation2 + $0x308] sm:$0xff]  ;;  %v959_v51 = vld [vmem:[#allocation2 + $0x110] sm:$0xff] }
 0x175   :  { %1208 = vst [vmem:[#allocation7 + $0xd8] sm:$0xff] %v1080_v44  ;;  %1272 = vst [vmem:[#allocation7 + $0x2d8] sm:$0xff] %v1144_v16  ;;  %v546_v39 = vadd.f32 %v545_v22, %v1765_v31  ;;  %v706_v41 = vadd.f32 %v705_v45, %v1765_v31  ;;  %v547_v33 = vpop.f32.mrb[30].mxu0  ;;  %v707_v14 = vpop.f32.mrb[30].mxu1  ;;  %v1023_v53 = vld [vmem:[#allocation2 + $0x310] sm:$0xff] }
 0x176   :  { %v820_v10 = vmax.f32 %v544_v8, 0.0  ;;  %v884_v12 = vmax.f32 %v704_v43, 0.0  ;;  %v548_v58 = vadd.f32 %v547_v33, %v1763_v7  ;;  %v708_v17 = vadd.f32 %v707_v14, %v1763_v7  ;;  %v549_v2 = vpop.f32.mrb[31].mxu0  ;;  %v709_v4 = vpop.f32.mrb[31].mxu1  ;;  %v960_v33 = vld [vmem:[#allocation2 + $0x118] sm:$0xff] }
 0x177   :  { %v821_v60 = vmax.f32 %v546_v39, 0.0  ;;  %v885_v48 = vmax.f32 %v706_v41, 0.0  ;;  %v550_v11 = vadd.f32 %v549_v2, %v1765_v31  ;;  %v710_v15 = vadd.f32 %v709_v4, %v1765_v31  ;;  %v1024_v14 = vld [vmem:[#allocation2 + $0x318] sm:$0xff] }
 0x178   :  { %v1081_v3 = vadd.f32 %v820_v10, %v2036_v46  ;;  %v1145_v5 = vadd.f32 %v884_v12, %v2037_v23  ;;  %v822_v25 = vmax.f32 %v548_v58, 0.0  ;;  %v886_v35 = vmax.f32 %v708_v17, 0.0 }
 0x179   :  { %v1082_v30 = vadd.f32 %v821_v60, %v2038_v47  ;;  %v1146_v49 = vadd.f32 %v885_v48, %v2039_v32  ;;  %v823_v62 = vmax.f32 %v550_v11, 0.0  ;;  %v887_v0 = vmax.f32 %v710_v15, 0.0 }
 0x17a   :  { %1209 = vst [vmem:[#allocation7 + $0xe0] sm:$0xff] %v1081_v3  ;;  %1273 = vst [vmem:[#allocation7 + $0x2e0] sm:$0xff] %v1145_v5  ;;  %v1083_v24 = vadd.f32 %v822_v25, %v2040_v59  ;;  %v1147_v56 = vadd.f32 %v886_v35, %v2041_v54  ;;  %v961_v25 = vld [vmem:[#allocation2 + $0x120] sm:$0xff] }
 0x17b   :  { %1210 = vst [vmem:[#allocation7 + $0xe8] sm:$0xff] %v1082_v30  ;;  %1274 = vst [vmem:[#allocation7 + $0x2e8] sm:$0xff] %v1146_v49  ;;  %v1084_v34 = vadd.f32 %v956_v37, %v823_v62  ;;  %v1148_v36 = vadd.f32 %v1020_v6, %v887_v0  ;;  %v553_v63 = vpop.f32.mrb[32].mxu0  ;;  %v713_v1 = vpop.f32.mrb[32].mxu1  ;;  %v1025_v35 = vld [vmem:[#allocation2 + $0x320] sm:$0xff]  ;;  %v962_v62 = vld [vmem:[#allocation2 + $0x128] sm:$0xff] }
 0x17c   :  { %1211 = vst [vmem:[#allocation7 + $0xf0] sm:$0xff] %v1083_v24  ;;  %1275 = vst [vmem:[#allocation7 + $0x2f0] sm:$0xff] %v1147_v56  ;;  %v554_v26 = vadd.f32 %v553_v63, %v1763_v7  ;;  %v714_v28 = vadd.f32 %v713_v1, %v1763_v7  ;;  %v555_v38 = vpop.f32.mrb[33].mxu0  ;;  %v715_v55 = vpop.f32.mrb[33].mxu1  ;;  %v1026_v0 = vld [vmem:[#allocation2 + $0x328] sm:$0xff]  ;;  %v963_v63 = vld [vmem:[#allocation2 + $0x130] sm:$0xff] }
 0x17d   :  { %1212 = vst [vmem:[#allocation7 + $0xf8] sm:$0xff] %v1084_v34  ;;  %1276 = vst [vmem:[#allocation7 + $0x2f8] sm:$0xff] %v1148_v36  ;;  %v556_v40 = vadd.f32 %v555_v38, %v1765_v31  ;;  %v716_v57 = vadd.f32 %v715_v55, %v1765_v31  ;;  %v557_v27 = vpop.f32.mrb[34].mxu0  ;;  %v717_v29 = vpop.f32.mrb[34].mxu1  ;;  %v1027_v1 = vld [vmem:[#allocation2 + $0x330] sm:$0xff] }
 0x17e   :  { %v824_v50 = vmax.f32 %v554_v26, 0.0  ;;  %v888_v19 = vmax.f32 %v714_v28, 0.0  ;;  %v558_v9 = vadd.f32 %v557_v27, %v1763_v7  ;;  %v718_v61 = vadd.f32 %v717_v29, %v1763_v7  ;;  %v559_v42 = vpop.f32.mrb[35].mxu0  ;;  %v719_v44 = vpop.f32.mrb[35].mxu1 }
 0x17f   :  { %v825_v13 = vmax.f32 %v556_v40, 0.0  ;;  %v889_v16 = vmax.f32 %v716_v57, 0.0  ;;  %v560_v8 = vadd.f32 %v559_v42, %v1765_v31  ;;  %v720_v43 = vadd.f32 %v719_v44, %v1765_v31  ;;  %v964_v40 = vld [vmem:[#allocation2 + $0x138] sm:$0xff] }
 0x180   :  { %v1085_v22 = vadd.f32 %v957_v18, %v824_v50  ;;  %v1149_v45 = vadd.f32 %v1021_v20, %v888_v19  ;;  %v826_v39 = vmax.f32 %v558_v9, 0.0  ;;  %v890_v41 = vmax.f32 %v718_v61, 0.0  ;;  %v1028_v57 = vld [vmem:[#allocation2 + $0x338] sm:$0xff] }
 0x181   :  { %v1086_v10 = vadd.f32 %v958_v52, %v825_v13  ;;  %v1150_v12 = vadd.f32 %v1022_v21, %v889_v16  ;;  %v827_v58 = vmax.f32 %v560_v8, 0.0  ;;  %v891_v17 = vmax.f32 %v720_v43, 0.0  ;;  %v965_v8 = vld [vmem:[#allocation2 + $0x140] sm:$0xff] }
 0x182   :  { %1213 = vst [vmem:[#allocation7 + $0x100] sm:$0xff] %v1085_v22  ;;  %1277 = vst [vmem:[#allocation7 + $0x300] sm:$0xff] %v1149_v45  ;;  %v1087_v2 = vadd.f32 %v959_v51, %v826_v39  ;;  %v1151_v4 = vadd.f32 %v1023_v53, %v890_v41  ;;  %v1029_v43 = vld [vmem:[#allocation2 + $0x340] sm:$0xff] }
 0x183   :  { %1214 = vst [vmem:[#allocation7 + $0x108] sm:$0xff] %v1086_v10  ;;  %1278 = vst [vmem:[#allocation7 + $0x308] sm:$0xff] %v1150_v12  ;;  %v1088_v60 = vadd.f32 %v960_v33, %v827_v58  ;;  %v1152_v48 = vadd.f32 %v1024_v14, %v891_v17  ;;  %v563_v11 = vpop.f32.mrb[36].mxu0  ;;  %v723_v15 = vpop.f32.mrb[36].mxu1  ;;  %v966_v10 = vld [vmem:[#allocation2 + $0x148] sm:$0xff] }
 0x184   :  { %1215 = vst [vmem:[#allocation7 + $0x110] sm:$0xff] %v1087_v2  ;;  %1279 = vst [vmem:[#allocation7 + $0x310] sm:$0xff] %v1151_v4  ;;  %v564_v46 = vadd.f32 %v563_v11, %v1763_v7  ;;  %v724_v3 = vadd.f32 %v723_v15, %v1763_v7  ;;  %v565_v23 = vpop.f32.mrb[37].mxu0  ;;  %v725_v5 = vpop.f32.mrb[37].mxu1  ;;  %v1030_v12 = vld [vmem:[#allocation2 + $0x348] sm:$0xff]  ;;  %v967_v11 = vld [vmem:[#allocation2 + $0x150] sm:$0xff] }
 0x185   :  { %1216 = vst [vmem:[#allocation7 + $0x118] sm:$0xff] %v1088_v60  ;;  %1280 = vst [vmem:[#allocation7 + $0x318] sm:$0xff] %v1152_v48  ;;  %v566_v37 = vadd.f32 %v565_v23, %v1765_v31  ;;  %v726_v6 = vadd.f32 %v725_v5, %v1765_v31  ;;  %v567_v47 = vpop.f32.mrb[38].mxu0  ;;  %v727_v30 = vpop.f32.mrb[38].mxu1  ;;  %v1031_v15 = vld [vmem:[#allocation2 + $0x350] sm:$0xff] }
 0x186   :  { %v828_v32 = vmax.f32 %v564_v46, 0.0  ;;  %v892_v49 = vmax.f32 %v724_v3, 0.0  ;;  %v568_v59 = vadd.f32 %v567_v47, %v1763_v7  ;;  %v728_v24 = vadd.f32 %v727_v30, %v1763_v7  ;;  %v569_v54 = vpop.f32.mrb[39].mxu0  ;;  %v729_v56 = vpop.f32.mrb[39].mxu1 }
 0x187   :  { %v829_v34 = vmax.f32 %v566_v37, 0.0  ;;  %v893_v36 = vmax.f32 %v726_v6, 0.0  ;;  %v570_v26 = vadd.f32 %v569_v54, %v1765_v31  ;;  %v730_v28 = vadd.f32 %v729_v56, %v1765_v31  ;;  %v968_v37 = vld [vmem:[#allocation2 + $0x158] sm:$0xff] }
 0x188   :  { %v1089_v38 = vadd.f32 %v961_v25, %v828_v32  ;;  %v1153_v55 = vadd.f32 %v1025_v35, %v892_v49  ;;  %v830_v18 = vmax.f32 %v568_v59, 0.0  ;;  %v894_v20 = vmax.f32 %v728_v24, 0.0  ;;  %v1032_v6 = vld [vmem:[#allocation2 + $0x358] sm:$0xff] }
 0x189   :  { %v1090_v27 = vadd.f32 %v962_v62, %v829_v34  ;;  %v1154_v29 = vadd.f32 %v1026_v0, %v893_v36  ;;  %v831_v50 = vmax.f32 %v570_v26, 0.0  ;;  %v895_v19 = vmax.f32 %v730_v28, 0.0  ;;  %v969_v26 = vld [vmem:[#allocation2 + $0x160] sm:$0xff] }
 0x18a   :  { %1217 = vst [vmem:[#allocation7 + $0x120] sm:$0xff] %v1089_v38  ;;  %1281 = vst [vmem:[#allocation7 + $0x320] sm:$0xff] %v1153_v55  ;;  %v1091_v52 = vadd.f32 %v963_v63, %v830_v18  ;;  %v1155_v21 = vadd.f32 %v1027_v1, %v894_v20  ;;  %v1033_v28 = vld [vmem:[#allocation2 + $0x360] sm:$0xff] }
 0x18b   :  { %1218 = vst [vmem:[#allocation7 + $0x128] sm:$0xff] %v1090_v27  ;;  %1282 = vst [vmem:[#allocation7 + $0x328] sm:$0xff] %v1154_v29  ;;  %v1092_v9 = vadd.f32 %v964_v40, %v831_v50  ;;  %v1156_v61 = vadd.f32 %v1028_v57, %v895_v19  ;;  %v573_v42 = vpop.f32.mrb[40].mxu0  ;;  %v733_v44 = vpop.f32.mrb[40].mxu1  ;;  %v970_v27 = vld [vmem:[#allocation2 + $0x168] sm:$0xff] }
 0x18c   :  { %1219 = vst [vmem:[#allocation7 + $0x130] sm:$0xff] %v1091_v52  ;;  %1283 = vst [vmem:[#allocation7 + $0x330] sm:$0xff] %v1155_v21  ;;  %v574_v13 = vadd.f32 %v573_v42, %v1763_v7  ;;  %v734_v16 = vadd.f32 %v733_v44, %v1763_v7  ;;  %v575_v51 = vpop.f32.mrb[41].mxu0  ;;  %v735_v53 = vpop.f32.mrb[41].mxu1  ;;  %v1034_v29 = vld [vmem:[#allocation2 + $0x368] sm:$0xff]  ;;  %v971_v42 = vld [vmem:[#allocation2 + $0x170] sm:$0xff] }
 0x18d   :  { %1220 = vst [vmem:[#allocation7 + $0x138] sm:$0xff] %v1092_v9  ;;  %1284 = vst [vmem:[#allocation7 + $0x338] sm:$0xff] %v1156_v61  ;;  %v576_v22 = vadd.f32 %v575_v51, %v1765_v31  ;;  %v736_v45 = vadd.f32 %v735_v53, %v1765_v31  ;;  %v577_v39 = vpop.f32.mrb[42].mxu0  ;;  %v737_v41 = vpop.f32.mrb[42].mxu1  ;;  %v1035_v44 = vld [vmem:[#allocation2 + $0x370] sm:$0xff] }
 0x18e   :  { %v832_v33 = vmax.f32 %v574_v13, 0.0  ;;  %v896_v14 = vmax.f32 %v734_v16, 0.0  ;;  %v578_v58 = vadd.f32 %v577_v39, %v1763_v7  ;;  %v738_v17 = vadd.f32 %v737_v41, %v1763_v7  ;;  %v579_v2 = vpop.f32.mrb[43].mxu0  ;;  %v739_v4 = vpop.f32.mrb[43].mxu1 }
 0x18f   :  { %v833_v60 = vmax.f32 %v576_v22, 0.0  ;;  %v897_v48 = vmax.f32 %v736_v45, 0.0  ;;  %v580_v46 = vadd.f32 %v579_v2, %v1765_v31  ;;  %v740_v3 = vadd.f32 %v739_v4, %v1765_v31  ;;  %v972_v22 = vld [vmem:[#allocation2 + $0x178] sm:$0xff] }
 0x190   :  { %v1093_v23 = vadd.f32 %v965_v8, %v832_v33  ;;  %v1157_v5 = vadd.f32 %v1029_v43, %v896_v14  ;;  %v834_v25 = vmax.f32 %v578_v58, 0.0  ;;  %v898_v35 = vmax.f32 %v738_v17, 0.0  ;;  %v1036_v45 = vld [vmem:[#allocation2 + $0x378] sm:$0xff] }
 0x191   :  { %v1094_v47 = vadd.f32 %v966_v10, %v833_v60  ;;  %v1158_v30 = vadd.f32 %v1030_v12, %v897_v48  ;;  %v835_v32 = vmax.f32 %v580_v46, 0.0  ;;  %v899_v49 = vmax.f32 %v740_v3, 0.0  ;;  %v973_v46 = vld [vmem:[#allocation2 + $0x180] sm:$0xff] }
 0x192   :  { %1221 = vst [vmem:[#allocation7 + $0x140] sm:$0xff] %v1093_v23  ;;  %1285 = vst [vmem:[#allocation7 + $0x340] sm:$0xff] %v1157_v5  ;;  %v1095_v62 = vadd.f32 %v967_v11, %v834_v25  ;;  %v1159_v0 = vadd.f32 %v1031_v15, %v898_v35  ;;  %v1037_v3 = vld [vmem:[#allocation2 + $0x380] sm:$0xff] }
 0x193   :  { %1222 = vst [vmem:[#allocation7 + $0x148] sm:$0xff] %v1094_v47  ;;  %1286 = vst [vmem:[#allocation7 + $0x348] sm:$0xff] %v1158_v30  ;;  %v1096_v59 = vadd.f32 %v968_v37, %v835_v32  ;;  %v1160_v24 = vadd.f32 %v1032_v6, %v899_v49  ;;  %v583_v54 = vpop.f32.mrb[44].mxu0  ;;  %v743_v56 = vpop.f32.mrb[44].mxu1  ;;  %v974_v47 = vld [vmem:[#allocation2 + $0x188] sm:$0xff] }
 0x194   :  { %1223 = vst [vmem:[#allocation7 + $0x150] sm:$0xff] %v1095_v62  ;;  %1287 = vst [vmem:[#allocation7 + $0x350] sm:$0xff] %v1159_v0  ;;  %v584_v34 = vadd.f32 %v583_v54, %v1763_v7  ;;  %v744_v36 = vadd.f32 %v743_v56, %v1763_v7  ;;  %v585_v63 = vpop.f32.mrb[45].mxu0  ;;  %v745_v1 = vpop.f32.mrb[45].mxu1  ;;  %v1038_v30 = vld [vmem:[#allocation2 + $0x388] sm:$0xff]  ;;  %v975_v54 = vld [vmem:[#allocation2 + $0x190] sm:$0xff] }
 0x195   :  { %1224 = vst [vmem:[#allocation7 + $0x158] sm:$0xff] %v1096_v59  ;;  %1288 = vst [vmem:[#allocation7 + $0x358] sm:$0xff] %v1160_v24  ;;  %v586_v38 = vadd.f32 %v585_v63, %v1765_v31  ;;  %v746_v55 = vadd.f32 %v745_v1, %v1765_v31  ;;  %v587_v18 = vpop.f32.mrb[46].mxu0  ;;  %v747_v20 = vpop.f32.mrb[46].mxu1  ;;  %v1039_v56 = vld [vmem:[#allocation2 + $0x390] sm:$0xff] }
 0x196   :  { %v836_v40 = vmax.f32 %v584_v34, 0.0  ;;  %v900_v57 = vmax.f32 %v744_v36, 0.0  ;;  %v588_v50 = vadd.f32 %v587_v18, %v1763_v7  ;;  %v748_v19 = vadd.f32 %v747_v20, %v1763_v7  ;;  %v589_v52 = vpop.f32.mrb[47].mxu0  ;;  %v749_v21 = vpop.f32.mrb[47].mxu1 }
 0x197   :  { %v837_v9 = vmax.f32 %v586_v38, 0.0  ;;  %v901_v61 = vmax.f32 %v746_v55, 0.0  ;;  %v590_v13 = vadd.f32 %v589_v52, %v1765_v31  ;;  %v750_v16 = vadd.f32 %v749_v21, %v1765_v31  ;;  %v976_v38 = vld [vmem:[#allocation2 + $0x198] sm:$0xff] }
 0x198   :  { %v1097_v51 = vadd.f32 %v969_v26, %v836_v40  ;;  %v1161_v53 = vadd.f32 %v1033_v28, %v900_v57  ;;  %v838_v8 = vmax.f32 %v588_v50, 0.0  ;;  %v902_v43 = vmax.f32 %v748_v19, 0.0  ;;  %v1040_v55 = vld [vmem:[#allocation2 + $0x398] sm:$0xff] }
 0x199   :  { %v1098_v39 = vadd.f32 %v970_v27, %v837_v9  ;;  %v1162_v41 = vadd.f32 %v1034_v29, %v901_v61  ;;  %v839_v33 = vmax.f32 %v590_v13, 0.0  ;;  %v903_v14 = vmax.f32 %v750_v16, 0.0  ;;  %v977_v13 = vld [vmem:[#allocation2 + $0x1a0] sm:$0xff] }
 0x19a   :  { %1225 = vst [vmem:[#allocation7 + $0x160] sm:$0xff] %v1097_v51  ;;  %1289 = vst [vmem:[#allocation7 + $0x360] sm:$0xff] %v1161_v53  ;;  %v1099_v10 = vadd.f32 %v971_v42, %v838_v8  ;;  %v1163_v12 = vadd.f32 %v1035_v44, %v902_v43  ;;  %v1041_v16 = vld [vmem:[#allocation2 + $0x3a0] sm:$0xff] }
 0x19b   :  { %1226 = vst [vmem:[#allocation7 + $0x168] sm:$0xff] %v1098_v39  ;;  %1290 = vst [vmem:[#allocation7 + $0x368] sm:$0xff] %v1162_v41  ;;  %v1100_v58 = vadd.f32 %v972_v22, %v839_v33  ;;  %v1164_v17 = vadd.f32 %v1036_v45, %v903_v14  ;;  %v593_v2 = vpop.f32.mrb[48].mxu0  ;;  %v753_v4 = vpop.f32.mrb[48].mxu1  ;;  %v978_v39 = vld [vmem:[#allocation2 + $0x1a8] sm:$0xff] }
 0x19c   :  { %1227 = vst [vmem:[#allocation7 + $0x170] sm:$0xff] %v1099_v10  ;;  %1291 = vst [vmem:[#allocation7 + $0x370] sm:$0xff] %v1163_v12  ;;  %v594_v60 = vadd.f32 %v593_v2, %v1763_v7  ;;  %v754_v48 = vadd.f32 %v753_v4, %v1763_v7  ;;  %v595_v11 = vpop.f32.mrb[49].mxu0  ;;  %v755_v15 = vpop.f32.mrb[49].mxu1  ;;  %v1042_v41 = vld [vmem:[#allocation2 + $0x3a8] sm:$0xff]  ;;  %v979_v2 = vld [vmem:[#allocation2 + $0x1b0] sm:$0xff] }
 0x19d   :  { %1228 = vst [vmem:[#allocation7 + $0x178] sm:$0xff] %v1100_v58  ;;  %1292 = vst [vmem:[#allocation7 + $0x378] sm:$0xff] %v1164_v17  ;;  %v596_v23 = vadd.f32 %v595_v11, %v1765_v31  ;;  %v756_v5 = vadd.f32 %v755_v15, %v1765_v31  ;;  %v597_v25 = vpop.f32.mrb[50].mxu0  ;;  %v757_v35 = vpop.f32.mrb[50].mxu1  ;;  %v1043_v4 = vld [vmem:[#allocation2 + $0x3b0] sm:$0xff] }
 0x19e   :  { %v840_v37 = vmax.f32 %v594_v60, 0.0  ;;  %v904_v6 = vmax.f32 %v754_v48, 0.0  ;;  %v598_v32 = vadd.f32 %v597_v25, %v1763_v7  ;;  %v758_v49 = vadd.f32 %v757_v35, %v1763_v7  ;;  %v599_v62 = vpop.f32.mrb[51].mxu0  ;;  %v759_v0 = vpop.f32.mrb[51].mxu1 }
 0x19f   :  { %v841_v59 = vmax.f32 %v596_v23, 0.0  ;;  %v905_v24 = vmax.f32 %v756_v5, 0.0  ;;  %v600_v34 = vadd.f32 %v599_v62, %v1765_v31  ;;  %v760_v36 = vadd.f32 %v759_v0, %v1765_v31  ;;  %v980_v23 = vld [vmem:[#allocation2 + $0x1b8] sm:$0xff] }
 0x1a0   :  { %v1101_v63 = vadd.f32 %v973_v46, %v840_v37  ;;  %v1165_v1 = vadd.f32 %v1037_v3, %v904_v6  ;;  %v842_v26 = vmax.f32 %v598_v32, 0.0  ;;  %v906_v28 = vmax.f32 %v758_v49, 0.0  ;;  %v1044_v5 = vld [vmem:[#allocation2 + $0x3b8] sm:$0xff] }
 0x1a1   :  { %v1102_v18 = vadd.f32 %v974_v47, %v841_v59  ;;  %v1166_v20 = vadd.f32 %v1038_v30, %v905_v24  ;;  %v843_v40 = vmax.f32 %v600_v34, 0.0  ;;  %v907_v57 = vmax.f32 %v760_v36, 0.0  ;;  %v981_v34 = vld [vmem:[#allocation2 + $0x1c0] sm:$0xff] }
 0x1a2   :  { %1229 = vst [vmem:[#allocation7 + $0x180] sm:$0xff] %v1101_v63  ;;  %1293 = vst [vmem:[#allocation7 + $0x380] sm:$0xff] %v1165_v1  ;;  %v1103_v27 = vadd.f32 %v975_v54, %v842_v26  ;;  %v1167_v29 = vadd.f32 %v1039_v56, %v906_v28  ;;  %v1045_v36 = vld [vmem:[#allocation2 + $0x3c0] sm:$0xff] }
 0x1a3   :  { %1230 = vst [vmem:[#allocation7 + $0x188] sm:$0xff] %v1102_v18  ;;  %1294 = vst [vmem:[#allocation7 + $0x388] sm:$0xff] %v1166_v20  ;;  %v1104_v50 = vadd.f32 %v976_v38, %v843_v40  ;;  %v1168_v19 = vadd.f32 %v1040_v55, %v907_v57  ;;  %v603_v52 = vpop.f32.mrb[52].mxu0  ;;  %v763_v21 = vpop.f32.mrb[52].mxu1  ;;  %v982_v18 = vld [vmem:[#allocation2 + $0x1c8] sm:$0xff] }
 0x1a4   :  { %1231 = vst [vmem:[#allocation7 + $0x190] sm:$0xff] %v1103_v27  ;;  %1295 = vst [vmem:[#allocation7 + $0x390] sm:$0xff] %v1167_v29  ;;  %v604_v9 = vadd.f32 %v603_v52, %v1763_v7  ;;  %v764_v61 = vadd.f32 %v763_v21, %v1763_v7  ;;  %v605_v42 = vpop.f32.mrb[53].mxu0  ;;  %v765_v44 = vpop.f32.mrb[53].mxu1  ;;  %v1046_v20 = vld [vmem:[#allocation2 + $0x3c8] sm:$0xff]  ;;  %v983_v52 = vld [vmem:[#allocation2 + $0x1d0] sm:$0xff] }
 0x1a5   :  { %1232 = vst [vmem:[#allocation7 + $0x198] sm:$0xff] %v1104_v50  ;;  %1296 = vst [vmem:[#allocation7 + $0x398] sm:$0xff] %v1168_v19  ;;  %v606_v51 = vadd.f32 %v605_v42, %v1765_v31  ;;  %v766_v53 = vadd.f32 %v765_v44, %v1765_v31  ;;  %v607_v8 = vpop.f32.mrb[54].mxu0  ;;  %v767_v43 = vpop.f32.mrb[54].mxu1  ;;  %v1047_v21 = vld [vmem:[#allocation2 + $0x3d0] sm:$0xff] }
 0x1a6   :  { %v844_v22 = vmax.f32 %v604_v9, 0.0  ;;  %v908_v45 = vmax.f32 %v764_v61, 0.0  ;;  %v608_v33 = vadd.f32 %v607_v8, %v1763_v7  ;;  %v768_v14 = vadd.f32 %v767_v43, %v1763_v7  ;;  %v609_v10 = vpop.f32.mrb[55].mxu0  ;;  %v769_v12 = vpop.f32.mrb[55].mxu1 }
 0x1a7   :  { %v845_v58 = vmax.f32 %v606_v51, 0.0  ;;  %v909_v17 = vmax.f32 %v766_v53, 0.0  ;;  %v610_v60 = vadd.f32 %v609_v10, %v1765_v31  ;;  %v770_v48 = vadd.f32 %v769_v12, %v1765_v31  ;;  %v984_v51 = vld [vmem:[#allocation2 + $0x1d8] sm:$0xff] }
 0x1a8   :  { %v1105_v11 = vadd.f32 %v977_v13, %v844_v22  ;;  %v1169_v15 = vadd.f32 %v1041_v16, %v908_v45  ;;  %v846_v46 = vmax.f32 %v608_v33, 0.0  ;;  %v910_v3 = vmax.f32 %v768_v14, 0.0  ;;  %v1048_v53 = vld [vmem:[#allocation2 + $0x3d8] sm:$0xff] }
 0x1a9   :  { %v1106_v25 = vadd.f32 %v978_v39, %v845_v58  ;;  %v1170_v35 = vadd.f32 %v1042_v41, %v909_v17  ;;  %v847_v37 = vmax.f32 %v610_v60, 0.0  ;;  %v911_v6 = vmax.f32 %v770_v48, 0.0  ;;  %v985_v60 = vld [vmem:[#allocation2 + $0x1e0] sm:$0xff] }
 0x1aa   :  { %1233 = vst [vmem:[#allocation7 + $0x1a0] sm:$0xff] %v1105_v11  ;;  %1297 = vst [vmem:[#allocation7 + $0x3a0] sm:$0xff] %v1169_v15  ;;  %v1107_v47 = vadd.f32 %v979_v2, %v846_v46  ;;  %v1171_v30 = vadd.f32 %v1043_v4, %v910_v3  ;;  %v1049_v48 = vld [vmem:[#allocation2 + $0x3e0] sm:$0xff] }
 0x1ab   :  { %1234 = vst [vmem:[#allocation7 + $0x1a8] sm:$0xff] %v1106_v25  ;;  %1298 = vst [vmem:[#allocation7 + $0x3a8] sm:$0xff] %v1170_v35  ;;  %v1108_v32 = vadd.f32 %v980_v23, %v847_v37  ;;  %v1172_v49 = vadd.f32 %v1044_v5, %v911_v6  ;;  %v613_v62 = vpop.f32.mrb[56].mxu0  ;;  %v773_v0 = vpop.f32.mrb[56].mxu1  ;;  %v986_v25 = vld [vmem:[#allocation2 + $0x1e8] sm:$0xff] }
 0x1ac   :  { %1235 = vst [vmem:[#allocation7 + $0x1b0] sm:$0xff] %v1107_v47  ;;  %1299 = vst [vmem:[#allocation7 + $0x3b0] sm:$0xff] %v1171_v30  ;;  %v614_v59 = vadd.f32 %v613_v62, %v1763_v7  ;;  %v774_v24 = vadd.f32 %v773_v0, %v1763_v7  ;;  %v615_v54 = vpop.f32.mrb[57].mxu0  ;;  %v775_v56 = vpop.f32.mrb[57].mxu1  ;;  %v1050_v35 = vld [vmem:[#allocation2 + $0x3e8] sm:$0xff]  ;;  %v987_v62 = vld [vmem:[#allocation2 + $0x1f0] sm:$0xff] }
 0x1ad   :  { %1236 = vst [vmem:[#allocation7 + $0x1b8] sm:$0xff] %v1108_v32  ;;  %1300 = vst [vmem:[#allocation7 + $0x3b8] sm:$0xff] %v1172_v49  ;;  %v616_v63 = vadd.f32 %v615_v54, %v1765_v31  ;;  %v776_v1 = vadd.f32 %v775_v56, %v1765_v31  ;;  %v617_v26 = vpop.f32.mrb[58].mxu0  ;;  %v777_v28 = vpop.f32.mrb[58].mxu1  ;;  %v1051_v0 = vld [vmem:[#allocation2 + $0x3f0] sm:$0xff] }
 0x1ae   :  { %v848_v38 = vmax.f32 %v614_v59, 0.0  ;;  %v912_v55 = vmax.f32 %v774_v24, 0.0  ;;  %v618_v40 = vadd.f32 %v617_v26, %v1763_v7  ;;  %v778_v57 = vadd.f32 %v777_v28, %v1763_v7  ;;  %v619_v27 = vpop.f32.mrb[59].mxu0  ;;  %v779_v29 = vpop.f32.mrb[59].mxu1 }
 0x1af   :  { %v849_v50 = vmax.f32 %v616_v63, 0.0  ;;  %v913_v19 = vmax.f32 %v776_v1, 0.0  ;;  %v620_v9 = vadd.f32 %v619_v27, %v1765_v31  ;;  %v780_v61 = vadd.f32 %v779_v29, %v1765_v31  ;;  %v988_v63 = vld [vmem:[#allocation2 + $0x1f8] sm:$0xff] }
 0x1b0   :  { %v1109_v42 = vadd.f32 %v981_v34, %v848_v38  ;;  %v1173_v44 = vadd.f32 %v1045_v36, %v912_v55  ;;  %v850_v13 = vmax.f32 %v618_v40, 0.0  ;;  %v914_v16 = vmax.f32 %v778_v57, 0.0  ;;  %v1052_v1 = vld [vmem:[#allocation2 + $0x3f8] sm:$0xff] }
 0x1b1   :  { %v1110_v8 = vadd.f32 %v982_v18, %v849_v50  ;;  %v1174_v43 = vadd.f32 %v1046_v20, %v913_v19  ;;  %v851_v22 = vmax.f32 %v620_v9, 0.0  ;;  %v915_v45 = vmax.f32 %v780_v61, 0.0 }
 0x1b2   :  { %1237 = vst [vmem:[#allocation7 + $0x1c0] sm:$0xff] %v1109_v42  ;;  %1301 = vst [vmem:[#allocation7 + $0x3c0] sm:$0xff] %v1173_v44  ;;  %v1111_v39 = vadd.f32 %v983_v52, %v850_v13  ;;  %v1175_v41 = vadd.f32 %v1047_v21, %v914_v16 }
 0x1b3   :  { %1238 = vst [vmem:[#allocation7 + $0x1c8] sm:$0xff] %v1110_v8  ;;  %1302 = vst [vmem:[#allocation7 + $0x3c8] sm:$0xff] %v1174_v43  ;;  %v1112_v33 = vadd.f32 %v984_v51, %v851_v22  ;;  %v1176_v14 = vadd.f32 %v1048_v53, %v915_v45  ;;  %v623_v10 = vpop.f32.mrb[60].mxu0  ;;  %v783_v12 = vpop.f32.mrb[60].mxu1 }
 0x1b4   :  { %1239 = vst [vmem:[#allocation7 + $0x1d0] sm:$0xff] %v1111_v39  ;;  %1303 = vst [vmem:[#allocation7 + $0x3d0] sm:$0xff] %v1175_v41  ;;  %v624_v58 = vadd.f32 %v623_v10, %v1763_v7  ;;  %v784_v17 = vadd.f32 %v783_v12, %v1763_v7  ;;  %v625_v2 = vpop.f32.mrb[61].mxu0  ;;  %v785_v4 = vpop.f32.mrb[61].mxu1 }
 0x1b5   :  { %1240 = vst [vmem:[#allocation7 + $0x1d8] sm:$0xff] %v1112_v33  ;;  %1304 = vst [vmem:[#allocation7 + $0x3d8] sm:$0xff] %v1176_v14  ;;  %v626_v11 = vadd.f32 %v625_v2, %v1765_v31  ;;  %v786_v15 = vadd.f32 %v785_v4, %v1765_v31  ;;  %v627_v46 = vpop.f32.mrb[62].mxu0  ;;  %v787_v3 = vpop.f32.mrb[62].mxu1 }
 0x1b6   :  { %v852_v23 = vmax.f32 %v624_v58, 0.0  ;;  %v916_v5 = vmax.f32 %v784_v17, 0.0  ;;  %v628_v37 = vadd.f32 %v627_v46, %v1763_v7  ;;  %v788_v6 = vadd.f32 %v787_v3, %v1763_v7  ;;  %v629_v47 = vpop.f32.mrb[63].mxu0  ;;  %v789_v30 = vpop.f32.mrb[63].mxu1 }
 0x1b7   :  { %v853_v32 = vmax.f32 %v626_v11, 0.0  ;;  %v917_v49 = vmax.f32 %v786_v15, 0.0  ;;  %v630_v59 = vadd.f32 %v629_v47, %v1765_v31  ;;  %v790_v24 = vadd.f32 %v789_v30, %v1765_v31 }
 0x1b8   :  { %v1113_v54 = vadd.f32 %v985_v60, %v852_v23  ;;  %v1177_v56 = vadd.f32 %v1049_v48, %v916_v5  ;;  %v854_v34 = vmax.f32 %v628_v37, 0.0  ;;  %v918_v36 = vmax.f32 %v788_v6, 0.0 }
 0x1b9   :  { %v1114_v26 = vadd.f32 %v986_v25, %v853_v32  ;;  %v1178_v7 = vadd.f32 %v1050_v35, %v917_v49  ;;  %v855_v28 = vmax.f32 %v630_v59, 0.0  ;;  %v919_v38 = vmax.f32 %v790_v24, 0.0 }
 0x1ba   :  { %1241 = vst [vmem:[#allocation7 + $0x1e0] sm:$0xff] %v1113_v54  ;;  %1305 = vst [vmem:[#allocation7 + $0x3e0] sm:$0xff] %v1177_v56  ;;  %v1115_v55 = vadd.f32 %v987_v62, %v854_v34  ;;  %v1179_v18 = vadd.f32 %v1051_v0, %v918_v36 }
 0x1bb   :  { %1242 = vst [vmem:[#allocation7 + $0x1e8] sm:$0xff] %v1114_v26  ;;  %1306 = vst [vmem:[#allocation7 + $0x3e8] sm:$0xff] %v1178_v7  ;;  %v1116_v20 = vadd.f32 %v988_v63, %v855_v28  ;;  %v1180_v31 = vadd.f32 %v1052_v1, %v919_v38 }
 0x1bc   :  { %1243 = vst [vmem:[#allocation7 + $0x1f0] sm:$0xff] %v1115_v55  ;;  %1307 = vst [vmem:[#allocation7 + $0x3f0] sm:$0xff] %v1179_v18 }
 0x1bd   :  { %1244 = vst [vmem:[#allocation7 + $0x1f8] sm:$0xff] %v1116_v20  ;;  %1308 = vst [vmem:[#allocation7 + $0x3f8] sm:$0xff] %v1180_v31 }
 0x1be   :  { %1503 = shalt.err (!%p1500_p6)
}
 0x1bf   :  { %s1504_s17 = scalar_lea.hbm %s1975_s3, 16384 }
 0x1c0   :  { %p1505_p7 = scmp.ne.s32.totalorder %s1975_s3, %s1504_s17  ;;  %p1508_p8 = scmp.lt.u32.totalorder %s1504_s17, %s1975_s3 }
 0x1c2   :  { %p1510_p9 = pnand %p1508_p8, %p1505_p7 }
 0x1c4   :  { %1513 = shalt.err (!%p1510_p9)
}
 0x1c5   :  { %1320 = dma.vmem_to_hbm [thread:$0]  %s1315_s13, 16384, %s1975_s3, [#allocation4], %s1521_s22, %s1521_s22, %s1522_s23  }
 0x1c6   :  { %1518 = dma.done.wait [#allocation4], 16384  }
 0x1c7   :  { %1519 = vsyncadd [#allocation4], 4294950912 }
 0x1c8   :  { %1324 = vsyncpa [#allocation3], 1 }
 0x1c9   :  { %1325 = vsyncpa [#allocation6], 1 }
 0x1ca   :  { %1326 = vsyncpa [#allocation4], 1 }

</bundles_post_ra>
